<compile_context>
chip_gen: v7x
topology: tpu7x:2x2x1
jax: 0.10.0
libtpu: 0.0.40
codegen_flags: <defaults>
</compile_context>

<pallas_src>
import functools

import numpy as np
import jax
import jax.numpy as jnp
from jax import lax
from jax.experimental import pallas as pl
from jax.experimental.pallas import tpu as pltpu

CLASSES = ["child", "female", "male"]
_LANE_PAD = 128  # lane-dense classifier output width


def _round_up(x, m):
    return (x + m - 1) // m * m


# ------------------------------ fused kernel -------------------------------
def _fused_forward_kernel(n_layers, *refs):
    """refs = [x, (S, M, b) * n_layers, gapL, w_fc, b_fc, out, patch_scratch].

    x      : [N*H, W*Cin]                 activations, rows=(n,h), lanes=(w,c)
    S      : [KH, N*OH, N*H]   bf16 0/1   per-kh-tap row gather (stride + H-pad)
    M      : [KH*W_in*Cin, OW*Cout] bf16  W-gather/pad/stride + channel contraction
    b      : [1, OW*Cout]      f32        conv bias tiled across OW
    gapL   : [N, N*H_last]     f32        mean over H per image
    w_fc   : [W_last*C_last, 128] bf16    (mean over W) @ classifier.T, 128-lane padded
    b_fc   : [1, 128]          f32
    out    : [N, 128]          f32
    patch  : VMEM scratch [max(N*OH), max(KH*W_in*Cin)] bf16  (im2col slab)
    """
    x_ref = refs[0]
    layer_refs = refs[1:1 + 3 * n_layers]
    gapl_ref, wfc_ref, bfc_ref, out_ref, patch_ref = refs[1 + 3 * n_layers:]

    a = x_ref[...]                                        # f32 [N*H, W*Cin]
    for li in range(n_layers):
        s_ref, m_ref, b_ref = layer_refs[3 * li:3 * li + 3]
        taps = s_ref.shape[0]                             # KH (=5)
        rows = s_ref.shape[1]                             # N*OH
        piece = a.shape[1]                                # W_in*Cin (128-multiple)
        a_bf = a.astype(jnp.bfloat16)
        for k in range(taps):                             # 5 tiny row-gather matmuls
            tap = jnp.dot(s_ref[k], a_bf, preferred_element_type=jnp.float32)
            patch_ref[0:rows, k * piece:(k + 1) * piece] = tap.astype(jnp.bfloat16)
        patches = patch_ref[0:rows, 0:taps * piece]       # [N*OH, KH*W_in*Cin] bf16
        acc = jnp.dot(patches, m_ref[...],                # ONE fat-K matmul per layer
                      preferred_element_type=jnp.float32)
        a = jnp.maximum(acc + b_ref[...], 0.0)            # bias + ReLU (f32)

    feat = jnp.dot(gapl_ref[...], a, preferred_element_type=jnp.float32)   # GAP over H
    logits = jnp.dot(feat.astype(jnp.bfloat16), wfc_ref[...],              # GAP over W + FC
                     preferred_element_type=jnp.float32)
    out_ref[...] = (logits + bfc_ref[...]).astype(out_ref.dtype)


# --------------------- host-side constant construction ---------------------
def make_forward(params, batch, height, width, *, stride=2,
                 n_classes=len(CLASSES)):
    """Builds the single fused pallas_call + all constants ONCE."""
    conv_params, (w_cls, b_cls) = params
    cin0 = conv_params[0][0].shape[1]
    cin_pad = _round_up(cin0, 8)          # pad layer-1 input channels (3 -> 8)

    consts = []
    h, w_sp, c_in = height, width, cin_pad
    max_rows, max_k = 1, 1
    for (wt, b) in conv_params:
        wt = np.asarray(wt, np.float32)
        b = np.asarray(b, np.float32)
        c_out, c_in_real, kh, kw = wt.shape
        pad = kh // 2
        oh = (h + 2 * pad - kh) // stride + 1
        ow = (w_sp + 2 * pad - kw) // stride + 1
        if c_in > c_in_real:                              # zero-pad input channels
            wt_p = np.zeros((c_out, c_in, kh, kw), np.float32)
            wt_p[:, :c_in_real] = wt
        else:
            wt_p = wt

        # S[t]: pick padded input row 2r+t-pad for each output row r (0 if padding).
        S = np.zeros((kh, batch * oh, batch * h), np.float32)
        for t in range(kh):
            for n in range(batch):
                for r in range(oh):
                    ih = stride * r + t - pad
                    if 0 <= ih < h:
                        S[t, n * oh + r, n * h + ih] = 1.0

        # M[(t, iw, i), (c, o)] = w[o, i, t, kw] where iw = stride*c + kw - pad.
        M = np.zeros((kh, w_sp, c_in, ow, c_out), np.float32)
        for t_kw in range(kw):
            for c in range(ow):
                iw = stride * c + t_kw - pad
                if 0 <= iw < w_sp:
                    M[:, iw, :, c, :] = np.transpose(wt_p[:, :, :, t_kw], (2, 1, 0))
        M = M.reshape(kh * w_sp * c_in, ow * c_out)
        b_row = np.tile(b, ow).reshape(1, ow * c_out)

        consts += [jnp.asarray(S, jnp.bfloat16),
                   jnp.asarray(M, jnp.bfloat16),
                   jnp.asarray(b_row, jnp.float32)]
        max_rows = max(max_rows, batch * oh)
        max_k = max(max_k, kh * w_sp * c_in)
        h, w_sp, c_in = oh, ow, c_out

    # GAP over H (left matmul) + GAP over W folded into 128-lane-padded classifier.
    gapL = np.zeros((batch, batch * h), np.float32)
    for n in range(batch):
        gapL[n, n * h:(n + 1) * h] = 1.0 / h
    w_cls = np.asarray(w_cls, np.float32)                 # [n_classes, c_last]
    b_cls = np.asarray(b_cls, np.float32)
    w_fc = np.zeros((w_sp * c_in, _LANE_PAD), np.float32)
    for wp in range(w_sp):
        w_fc[wp * c_in:(wp + 1) * c_in, :n_classes] = w_cls.T / w_sp
    b_fc = np.zeros((1, _LANE_PAD), np.float32)
    b_fc[0, :n_classes] = b_cls
    consts += [jnp.asarray(gapL, jnp.float32),
               jnp.asarray(w_fc, jnp.bfloat16),
               jnp.asarray(b_fc, jnp.float32)]

    x_rows, x_lanes = batch * height, width * cin_pad

    def _full_spec(shape):
        nd = len(shape)
        return pl.BlockSpec(shape, lambda i, _nd=nd: (0,) * _nd)

    in_specs = [_full_spec((x_rows, x_lanes))] + [_full_spec(tuple(c.shape))
                                                  for c in consts]

    fused = pl.pallas_call(
        functools.partial(_fused_forward_kernel, len(conv_params)),
        out_shape=jax.ShapeDtypeStruct((batch, _LANE_PAD), jnp.float32),
        grid=(1,),
        in_specs=in_specs,
        out_specs=pl.BlockSpec((batch, _LANE_PAD), lambda i: (0, 0)),
        scratch_shapes=[pltpu.VMEM((max_rows, max_k), jnp.bfloat16)],
        compiler_params=pltpu.CompilerParams(
            dimension_semantics=("arbitrary",),
            vmem_limit_bytes=16 * 1024 * 1024),
    )

    @jax.jit
    def _forward(x_nchw, const_args):
        xn = jnp.transpose(x_nchw, (0, 2, 3, 1))          # NCHW -> NHWC
        xn = jnp.pad(xn, ((0, 0), (0, 0), (0, 0), (0, cin_pad - cin0)))
        a0 = xn.reshape(x_rows, x_lanes).astype(jnp.float32)
        return fused(a0, *const_args)[:, :n_classes]

    return lambda x: _forward(x, consts)


# ------------------------------ model params -------------------------------
def init_params(key, layers=(32, 64, 128, 256), n_input_channels=3,
                kernel_size=5, n_classes=len(CLASSES)):
    conv_params = []
    c = n_input_channels
    for l in layers:
        key, k1, k2 = jax.random.split(key, 3)
        w = jax.random.normal(k1, (l, c, kernel_size, kernel_size), jnp.float32) * 0.05
        b = jax.random.normal(k2, (l,), jnp.float32) * 0.05
        conv_params.append((w, b))
        c = l
    key, k1, k2 = jax.random.split(key, 3)
    w_cls = jax.random.normal(k1, (n_classes, c), jnp.float32) * 0.05  # PyTorch Linear [out, in]
    b_cls = jax.random.normal(k2, (n_classes,), jnp.float32) * 0.05
    return conv_params, (w_cls, b_cls)


# ------------------------- pure-JAX reference check ------------------------
def forward_reference(params, x_nchw):
    conv_params, (w_cls, b_cls) = params
    x = x_nchw
    for (w, b) in conv_params:
        x = lax.conv_general_dilated(
            x, w, window_strides=(2, 2), padding=((2, 2), (2, 2)),
            dimension_numbers=("NCHW", "OIHW", "NCHW"))
        x = jnp.maximum(x + b.reshape(1, -1, 1, 1), 0.0)
    feat = jnp.mean(x, axis=(2, 3))
    return feat @ w_cls.T + b_cls


if __name__ == "__main__":
    key = jax.random.PRNGKey(0)
    key, pkey, xkey = jax.random.split(key, 3)
    params = init_params(pkey)

    N, C, H, W = 2, 3, 16, 16
    x = jax.random.normal(xkey, (N, C, H, W), jnp.float32)

    fwd = make_forward(params, N, H, W)
    logits = jax.block_until_ready(fwd(x))
    ref = jax.block_until_ready(forward_reference(params, x))

    assert logits.shape == (N, len(CLASSES)), logits.shape
    # bf16 weights/activations (f32 accumulation) through 4 conv layers + FC:
    # observed error is O(1e-2) relative; 3e-2 is a comfortable bound.
    assert jnp.allclose(logits, ref, atol=3e-2, rtol=3e-2), (logits, ref)
    print("KERNEL_OK")
</pallas_src>

<mosaic_0001>
module attributes {stable_mosaic.version = 11 : i64} {
  func.func @_fused_forward_kernel(%arg0: i32, %arg1: memref<32x128xf32, #tpu.memory_space<vmem>>, %arg2: memref<5x16x32xbf16, #tpu.memory_space<vmem>>, %arg3: memref<640x256xbf16, #tpu.memory_space<vmem>>, %arg4: memref<1x256xf32, #tpu.memory_space<vmem>>, %arg5: memref<5x8x16xbf16, #tpu.memory_space<vmem>>, %arg6: memref<1280x256xbf16, #tpu.memory_space<vmem>>, %arg7: memref<1x256xf32, #tpu.memory_space<vmem>>, %arg8: memref<5x4x8xbf16, #tpu.memory_space<vmem>>, %arg9: memref<1280x256xbf16, #tpu.memory_space<vmem>>, %arg10: memref<1x256xf32, #tpu.memory_space<vmem>>, %arg11: memref<5x2x4xbf16, #tpu.memory_space<vmem>>, %arg12: memref<1280x256xbf16, #tpu.memory_space<vmem>>, %arg13: memref<1x256xf32, #tpu.memory_space<vmem>>, %arg14: memref<2x2xf32, #tpu.memory_space<vmem>>, %arg15: memref<256x128xbf16, #tpu.memory_space<vmem>>, %arg16: memref<1x128xf32, #tpu.memory_space<vmem>>, %arg17: memref<2x128xf32, #tpu.memory_space<vmem>>, %arg18: memref<16x1280xbf16, #tpu.memory_space<vmem>>) attributes {dimension_semantics = [#tpu.dimension_semantics<arbitrary>], iteration_bounds = array<i64: 1>, scalar_prefetch = 0 : i64, scratch_operands = 1 : i64, tpu.core_type = #tpu.core_type<tc>, window_params = [{pipeline_mode = #tpu.pipeline_mode<synchronous>, transform_indices = @transform_0, window_bounds = array<i64: 32, 128>}, {pipeline_mode = #tpu.pipeline_mode<synchronous>, transform_indices = @transform_1, window_bounds = array<i64: 5, 16, 32>}, {pipeline_mode = #tpu.pipeline_mode<synchronous>, transform_indices = @transform_2, window_bounds = array<i64: 640, 256>}, {pipeline_mode = #tpu.pipeline_mode<synchronous>, transform_indices = @transform_3, window_bounds = array<i64: 1, 256>}, {pipeline_mode = #tpu.pipeline_mode<synchronous>, transform_indices = @transform_4, window_bounds = array<i64: 5, 8, 16>}, {pipeline_mode = #tpu.pipeline_mode<synchronous>, transform_indices = @transform_5, window_bounds = array<i64: 1280, 256>}, {pipeline_mode = #tpu.pipeline_mode<synchronous>, transform_indices = @transform_6, window_bounds = array<i64: 1, 256>}, {pipeline_mode = #tpu.pipeline_mode<synchronous>, transform_indices = @transform_7, window_bounds = array<i64: 5, 4, 8>}, {pipeline_mode = #tpu.pipeline_mode<synchronous>, transform_indices = @transform_8, window_bounds = array<i64: 1280, 256>}, {pipeline_mode = #tpu.pipeline_mode<synchronous>, transform_indices = @transform_9, window_bounds = array<i64: 1, 256>}, {pipeline_mode = #tpu.pipeline_mode<synchronous>, transform_indices = @transform_10, window_bounds = array<i64: 5, 2, 4>}, {pipeline_mode = #tpu.pipeline_mode<synchronous>, transform_indices = @transform_11, window_bounds = array<i64: 1280, 256>}, {pipeline_mode = #tpu.pipeline_mode<synchronous>, transform_indices = @transform_12, window_bounds = array<i64: 1, 256>}, {pipeline_mode = #tpu.pipeline_mode<synchronous>, transform_indices = @transform_13, window_bounds = array<i64: 2, 2>}, {pipeline_mode = #tpu.pipeline_mode<synchronous>, transform_indices = @transform_14, window_bounds = array<i64: 256, 128>}, {pipeline_mode = #tpu.pipeline_mode<synchronous>, transform_indices = @transform_15, window_bounds = array<i64: 1, 128>}, {pipeline_mode = #tpu.pipeline_mode<synchronous>, transform_indices = @transform_16, window_bounds = array<i64: 2, 128>}]} {
    %c0 = arith.constant 0 : index
    %c0_0 = arith.constant 0 : index
    %0 = vector.load %arg1[%c0, %c0_0] : memref<32x128xf32, #tpu.memory_space<vmem>>, vector<32x128xf32>
    %1 = arith.truncf %0 : vector<32x128xf32> to vector<32x128xbf16>
    %c0_1 = arith.constant 0 : index
    %c0_2 = arith.constant 0 : index
    %c0_3 = arith.constant 0 : index
    %2 = vector.load %arg2[%c0_1, %c0_2, %c0_3] : memref<5x16x32xbf16, #tpu.memory_space<vmem>>, vector<1x16x32xbf16>
    %3 = vector.shape_cast %2 : vector<1x16x32xbf16> to vector<16x32xbf16>
    %cst = arith.constant dense<0.000000e+00> : vector<16x128xf32>
    %4 = tpu.matmul %3, %1, %cst {dimension_numbers = #tpu.dot_dimension_numbers<[1], [0], [0], [1], [0, 0, 1, 1], [], []>} : vector<16x32xbf16>, vector<32x128xbf16>, vector<16x128xf32> -> vector<16x128xf32>
    %5 = arith.truncf %4 : vector<16x128xf32> to vector<16x128xbf16>
    %c0_4 = arith.constant 0 : index
    %c0_5 = arith.constant 0 : index
    %6 = vector.load %arg18[%c0_4, %c0_5] : memref<16x1280xbf16, #tpu.memory_space<vmem>>, vector<16x128xbf16>
    tpu.vector_store %arg18[%c0_4, %c0_5], %5 {strides = array<i32>} : memref<16x1280xbf16, #tpu.memory_space<vmem>>, vector<16x128xbf16>,
    %c1 = arith.constant 1 : index
    %c0_6 = arith.constant 0 : index
    %c0_7 = arith.constant 0 : index
    %7 = vector.load %arg2[%c1, %c0_6, %c0_7] : memref<5x16x32xbf16, #tpu.memory_space<vmem>>, vector<1x16x32xbf16>
    %8 = vector.shape_cast %7 : vector<1x16x32xbf16> to vector<16x32xbf16>
    %cst_8 = arith.constant dense<0.000000e+00> : vector<16x128xf32>
    %9 = tpu.matmul %8, %1, %cst_8 {dimension_numbers = #tpu.dot_dimension_numbers<[1], [0], [0], [1], [0, 0, 1, 1], [], []>} : vector<16x32xbf16>, vector<32x128xbf16>, vector<16x128xf32> -> vector<16x128xf32>
    %10 = arith.truncf %9 : vector<16x128xf32> to vector<16x128xbf16>
    %c0_9 = arith.constant 0 : index
    %c128 = arith.constant 128 : index
    %11 = vector.load %arg18[%c0_9, %c128] : memref<16x1280xbf16, #tpu.memory_space<vmem>>, vector<16x128xbf16>
    tpu.vector_store %arg18[%c0_9, %c128], %10 {strides = array<i32>} : memref<16x1280xbf16, #tpu.memory_space<vmem>>, vector<16x128xbf16>,
    %c2 = arith.constant 2 : index
    %c0_10 = arith.constant 0 : index
    %c0_11 = arith.constant 0 : index
    %12 = vector.load %arg2[%c2, %c0_10, %c0_11] : memref<5x16x32xbf16, #tpu.memory_space<vmem>>, vector<1x16x32xbf16>
    %13 = vector.shape_cast %12 : vector<1x16x32xbf16> to vector<16x32xbf16>
    %cst_12 = arith.constant dense<0.000000e+00> : vector<16x128xf32>
    %14 = tpu.matmul %13, %1, %cst_12 {dimension_numbers = #tpu.dot_dimension_numbers<[1], [0], [0], [1], [0, 0, 1, 1], [], []>} : vector<16x32xbf16>, vector<32x128xbf16>, vector<16x128xf32> -> vector<16x128xf32>
    %15 = arith.truncf %14 : vector<16x128xf32> to vector<16x128xbf16>
    %c0_13 = arith.constant 0 : index
    %c256 = arith.constant 256 : index
    %16 = vector.load %arg18[%c0_13, %c256] : memref<16x1280xbf16, #tpu.memory_space<vmem>>, vector<16x128xbf16>
    tpu.vector_store %arg18[%c0_13, %c256], %15 {strides = array<i32>} : memref<16x1280xbf16, #tpu.memory_space<vmem>>, vector<16x128xbf16>,
    %c3 = arith.constant 3 : index
    %c0_14 = arith.constant 0 : index
    %c0_15 = arith.constant 0 : index
    %17 = vector.load %arg2[%c3, %c0_14, %c0_15] : memref<5x16x32xbf16, #tpu.memory_space<vmem>>, vector<1x16x32xbf16>
    %18 = vector.shape_cast %17 : vector<1x16x32xbf16> to vector<16x32xbf16>
    %cst_16 = arith.constant dense<0.000000e+00> : vector<16x128xf32>
    %19 = tpu.matmul %18, %1, %cst_16 {dimension_numbers = #tpu.dot_dimension_numbers<[1], [0], [0], [1], [0, 0, 1, 1], [], []>} : vector<16x32xbf16>, vector<32x128xbf16>, vector<16x128xf32> -> vector<16x128xf32>
    %20 = arith.truncf %19 : vector<16x128xf32> to vector<16x128xbf16>
    %c0_17 = arith.constant 0 : index
    %c384 = arith.constant 384 : index
    %21 = vector.load %arg18[%c0_17, %c384] : memref<16x1280xbf16, #tpu.memory_space<vmem>>, vector<16x128xbf16>
    tpu.vector_store %arg18[%c0_17, %c384], %20 {strides = array<i32>} : memref<16x1280xbf16, #tpu.memory_space<vmem>>, vector<16x128xbf16>,
    %c4 = arith.constant 4 : index
    %c0_18 = arith.constant 0 : index
    %c0_19 = arith.constant 0 : index
    %22 = vector.load %arg2[%c4, %c0_18, %c0_19] : memref<5x16x32xbf16, #tpu.memory_space<vmem>>, vector<1x16x32xbf16>
    %23 = vector.shape_cast %22 : vector<1x16x32xbf16> to vector<16x32xbf16>
    %cst_20 = arith.constant dense<0.000000e+00> : vector<16x128xf32>
    %24 = tpu.matmul %23, %1, %cst_20 {dimension_numbers = #tpu.dot_dimension_numbers<[1], [0], [0], [1], [0, 0, 1, 1], [], []>} : vector<16x32xbf16>, vector<32x128xbf16>, vector<16x128xf32> -> vector<16x128xf32>
    %25 = arith.truncf %24 : vector<16x128xf32> to vector<16x128xbf16>
    %c0_21 = arith.constant 0 : index
    %c512 = arith.constant 512 : index
    %26 = vector.load %arg18[%c0_21, %c512] : memref<16x1280xbf16, #tpu.memory_space<vmem>>, vector<16x128xbf16>
    tpu.vector_store %arg18[%c0_21, %c512], %25 {strides = array<i32>} : memref<16x1280xbf16, #tpu.memory_space<vmem>>, vector<16x128xbf16>,
    %c0_22 = arith.constant 0 : index
    %c0_23 = arith.constant 0 : index
    %27 = vector.load %arg18[%c0_22, %c0_23] : memref<16x1280xbf16, #tpu.memory_space<vmem>>, vector<16x640xbf16>
    %c0_24 = arith.constant 0 : index
    %c0_25 = arith.constant 0 : index
    %28 = vector.load %arg3[%c0_24, %c0_25] : memref<640x256xbf16, #tpu.memory_space<vmem>>, vector<640x256xbf16>
    %cst_26 = arith.constant dense<0.000000e+00> : vector<16x256xf32>
    %29 = tpu.matmul %27, %28, %cst_26 {dimension_numbers = #tpu.dot_dimension_numbers<[1], [0], [0], [1], [0, 0, 1, 1], [], []>} : vector<16x640xbf16>, vector<640x256xbf16>, vector<16x256xf32> -> vector<16x256xf32>
    %c0_27 = arith.constant 0 : index
    %c0_28 = arith.constant 0 : index
    %30 = vector.load %arg4[%c0_27, %c0_28] : memref<1x256xf32, #tpu.memory_space<vmem>>, vector<1x256xf32>
    %31 = vector.broadcast %30 : vector<1x256xf32> to vector<16x256xf32>
    %32 = arith.addf %29, %31 : vector<16x256xf32>
    %cst_29 = arith.constant 0.000000e+00 : f32
    %33 = vector.broadcast %cst_29 : f32 to vector<16x256xf32>
    %34 = arith.maximumf %32, %33 : vector<16x256xf32>
    %35 = arith.truncf %34 : vector<16x256xf32> to vector<16x256xbf16>
    %c0_30 = arith.constant 0 : index
    %c0_31 = arith.constant 0 : index
    %c0_32 = arith.constant 0 : index
    %36 = vector.load %arg5[%c0_30, %c0_31, %c0_32] : memref<5x8x16xbf16, #tpu.memory_space<vmem>>, vector<1x8x16xbf16>
    %37 = vector.shape_cast %36 : vector<1x8x16xbf16> to vector<8x16xbf16>
    %cst_33 = arith.constant dense<0.000000e+00> : vector<8x256xf32>
    %38 = tpu.matmul %37, %35, %cst_33 {dimension_numbers = #tpu.dot_dimension_numbers<[1], [0], [0], [1], [0, 0, 1, 1], [], []>} : vector<8x16xbf16>, vector<16x256xbf16>, vector<8x256xf32> -> vector<8x256xf32>
    %39 = arith.truncf %38 : vector<8x256xf32> to vector<8x256xbf16>
    %c0_34 = arith.constant 0 : index
    %c0_35 = arith.constant 0 : index
    %40 = vector.load %arg18[%c0_34, %c0_35] : memref<16x1280xbf16, #tpu.memory_space<vmem>>, vector<8x256xbf16>
    tpu.vector_store %arg18[%c0_34, %c0_35], %39 {strides = array<i32>} : memref<16x1280xbf16, #tpu.memory_space<vmem>>, vector<8x256xbf16>,
    %c1_36 = arith.constant 1 : index
    %c0_37 = arith.constant 0 : index
    %c0_38 = arith.constant 0 : index
    %41 = vector.load %arg5[%c1_36, %c0_37, %c0_38] : memref<5x8x16xbf16, #tpu.memory_space<vmem>>, vector<1x8x16xbf16>
    %42 = vector.shape_cast %41 : vector<1x8x16xbf16> to vector<8x16xbf16>
    %cst_39 = arith.constant dense<0.000000e+00> : vector<8x256xf32>
    %43 = tpu.matmul %42, %35, %cst_39 {dimension_numbers = #tpu.dot_dimension_numbers<[1], [0], [0], [1], [0, 0, 1, 1], [], []>} : vector<8x16xbf16>, vector<16x256xbf16>, vector<8x256xf32> -> vector<8x256xf32>
    %44 = arith.truncf %43 : vector<8x256xf32> to vector<8x256xbf16>
    %c0_40 = arith.constant 0 : index
    %c256_41 = arith.constant 256 : index
    %45 = vector.load %arg18[%c0_40, %c256_41] : memref<16x1280xbf16, #tpu.memory_space<vmem>>, vector<8x256xbf16>
    tpu.vector_store %arg18[%c0_40, %c256_41], %44 {strides = array<i32>} : memref<16x1280xbf16, #tpu.memory_space<vmem>>, vector<8x256xbf16>,
    %c2_42 = arith.constant 2 : index
    %c0_43 = arith.constant 0 : index
    %c0_44 = arith.constant 0 : index
    %46 = vector.load %arg5[%c2_42, %c0_43, %c0_44] : memref<5x8x16xbf16, #tpu.memory_space<vmem>>, vector<1x8x16xbf16>
    %47 = vector.shape_cast %46 : vector<1x8x16xbf16> to vector<8x16xbf16>
    %cst_45 = arith.constant dense<0.000000e+00> : vector<8x256xf32>
    %48 = tpu.matmul %47, %35, %cst_45 {dimension_numbers = #tpu.dot_dimension_numbers<[1], [0], [0], [1], [0, 0, 1, 1], [], []>} : vector<8x16xbf16>, vector<16x256xbf16>, vector<8x256xf32> -> vector<8x256xf32>
    %49 = arith.truncf %48 : vector<8x256xf32> to vector<8x256xbf16>
    %c0_46 = arith.constant 0 : index
    %c512_47 = arith.constant 512 : index
    %50 = vector.load %arg18[%c0_46, %c512_47] : memref<16x1280xbf16, #tpu.memory_space<vmem>>, vector<8x256xbf16>
    tpu.vector_store %arg18[%c0_46, %c512_47], %49 {strides = array<i32>} : memref<16x1280xbf16, #tpu.memory_space<vmem>>, vector<8x256xbf16>,
    %c3_48 = arith.constant 3 : index
    %c0_49 = arith.constant 0 : index
    %c0_50 = arith.constant 0 : index
    %51 = vector.load %arg5[%c3_48, %c0_49, %c0_50] : memref<5x8x16xbf16, #tpu.memory_space<vmem>>, vector<1x8x16xbf16>
    %52 = vector.shape_cast %51 : vector<1x8x16xbf16> to vector<8x16xbf16>
    %cst_51 = arith.constant dense<0.000000e+00> : vector<8x256xf32>
    %53 = tpu.matmul %52, %35, %cst_51 {dimension_numbers = #tpu.dot_dimension_numbers<[1], [0], [0], [1], [0, 0, 1, 1], [], []>} : vector<8x16xbf16>, vector<16x256xbf16>, vector<8x256xf32> -> vector<8x256xf32>
    %54 = arith.truncf %53 : vector<8x256xf32> to vector<8x256xbf16>
    %c0_52 = arith.constant 0 : index
    %c768 = arith.constant 768 : index
    %55 = vector.load %arg18[%c0_52, %c768] : memref<16x1280xbf16, #tpu.memory_space<vmem>>, vector<8x256xbf16>
    tpu.vector_store %arg18[%c0_52, %c768], %54 {strides = array<i32>} : memref<16x1280xbf16, #tpu.memory_space<vmem>>, vector<8x256xbf16>,
    %c4_53 = arith.constant 4 : index
    %c0_54 = arith.constant 0 : index
    %c0_55 = arith.constant 0 : index
    %56 = vector.load %arg5[%c4_53, %c0_54, %c0_55] : memref<5x8x16xbf16, #tpu.memory_space<vmem>>, vector<1x8x16xbf16>
    %57 = vector.shape_cast %56 : vector<1x8x16xbf16> to vector<8x16xbf16>
    %cst_56 = arith.constant dense<0.000000e+00> : vector<8x256xf32>
    %58 = tpu.matmul %57, %35, %cst_56 {dimension_numbers = #tpu.dot_dimension_numbers<[1], [0], [0], [1], [0, 0, 1, 1], [], []>} : vector<8x16xbf16>, vector<16x256xbf16>, vector<8x256xf32> -> vector<8x256xf32>
    %59 = arith.truncf %58 : vector<8x256xf32> to vector<8x256xbf16>
    %c0_57 = arith.constant 0 : index
    %c1024 = arith.constant 1024 : index
    %60 = vector.load %arg18[%c0_57, %c1024] : memref<16x1280xbf16, #tpu.memory_space<vmem>>, vector<8x256xbf16>
    tpu.vector_store %arg18[%c0_57, %c1024], %59 {strides = array<i32>} : memref<16x1280xbf16, #tpu.memory_space<vmem>>, vector<8x256xbf16>,
    %c0_58 = arith.constant 0 : index
    %c0_59 = arith.constant 0 : index
    %61 = vector.load %arg18[%c0_58, %c0_59] : memref<16x1280xbf16, #tpu.memory_space<vmem>>, vector<8x1280xbf16>
    %c0_60 = arith.constant 0 : index
    %c0_61 = arith.constant 0 : index
    %62 = vector.load %arg6[%c0_60, %c0_61] : memref<1280x256xbf16, #tpu.memory_space<vmem>>, vector<1280x256xbf16>
    %cst_62 = arith.constant dense<0.000000e+00> : vector<8x256xf32>
    %63 = tpu.matmul %61, %62, %cst_62 {dimension_numbers = #tpu.dot_dimension_numbers<[1], [0], [0], [1], [0, 0, 1, 1], [], []>} : vector<8x1280xbf16>, vector<1280x256xbf16>, vector<8x256xf32> -> vector<8x256xf32>
    %c0_63 = arith.constant 0 : index
    %c0_64 = arith.constant 0 : index
    %64 = vector.load %arg7[%c0_63, %c0_64] : memref<1x256xf32, #tpu.memory_space<vmem>>, vector<1x256xf32>
    %65 = vector.broadcast %64 : vector<1x256xf32> to vector<8x256xf32>
    %66 = arith.addf %63, %65 : vector<8x256xf32>
    %cst_65 = arith.constant 0.000000e+00 : f32
    %67 = vector.broadcast %cst_65 : f32 to vector<8x256xf32>
    %68 = arith.maximumf %66, %67 : vector<8x256xf32>
    %69 = arith.truncf %68 : vector<8x256xf32> to vector<8x256xbf16>
    %c0_66 = arith.constant 0 : index
    %c0_67 = arith.constant 0 : index
    %c0_68 = arith.constant 0 : index
    %70 = vector.load %arg8[%c0_66, %c0_67, %c0_68] : memref<5x4x8xbf16, #tpu.memory_space<vmem>>, vector<1x4x8xbf16>
    %71 = vector.shape_cast %70 : vector<1x4x8xbf16> to vector<4x8xbf16>
    %cst_69 = arith.constant dense<0.000000e+00> : vector<4x256xf32>
    %72 = tpu.matmul %71, %69, %cst_69 {dimension_numbers = #tpu.dot_dimension_numbers<[1], [0], [0], [1], [0, 0, 1, 1], [], []>} : vector<4x8xbf16>, vector<8x256xbf16>, vector<4x256xf32> -> vector<4x256xf32>
    %73 = arith.truncf %72 : vector<4x256xf32> to vector<4x256xbf16>
    %c0_70 = arith.constant 0 : index
    %c0_71 = arith.constant 0 : index
    %74 = vector.load %arg18[%c0_70, %c0_71] : memref<16x1280xbf16, #tpu.memory_space<vmem>>, vector<4x256xbf16>
    tpu.vector_store %arg18[%c0_70, %c0_71], %73 {strides = array<i32>} : memref<16x1280xbf16, #tpu.memory_space<vmem>>, vector<4x256xbf16>,
    %c1_72 = arith.constant 1 : index
    %c0_73 = arith.constant 0 : index
    %c0_74 = arith.constant 0 : index
    %75 = vector.load %arg8[%c1_72, %c0_73, %c0_74] : memref<5x4x8xbf16, #tpu.memory_space<vmem>>, vector<1x4x8xbf16>
    %76 = vector.shape_cast %75 : vector<1x4x8xbf16> to vector<4x8xbf16>
    %cst_75 = arith.constant dense<0.000000e+00> : vector<4x256xf32>
    %77 = tpu.matmul %76, %69, %cst_75 {dimension_numbers = #tpu.dot_dimension_numbers<[1], [0], [0], [1], [0, 0, 1, 1], [], []>} : vector<4x8xbf16>, vector<8x256xbf16>, vector<4x256xf32> -> vector<4x256xf32>
    %78 = arith.truncf %77 : vector<4x256xf32> to vector<4x256xbf16>
    %c0_76 = arith.constant 0 : index
    %c256_77 = arith.constant 256 : index
    %79 = vector.load %arg18[%c0_76, %c256_77] : memref<16x1280xbf16, #tpu.memory_space<vmem>>, vector<4x256xbf16>
    tpu.vector_store %arg18[%c0_76, %c256_77], %78 {strides = array<i32>} : memref<16x1280xbf16, #tpu.memory_space<vmem>>, vector<4x256xbf16>,
    %c2_78 = arith.constant 2 : index
    %c0_79 = arith.constant 0 : index
    %c0_80 = arith.constant 0 : index
    %80 = vector.load %arg8[%c2_78, %c0_79, %c0_80] : memref<5x4x8xbf16, #tpu.memory_space<vmem>>, vector<1x4x8xbf16>
    %81 = vector.shape_cast %80 : vector<1x4x8xbf16> to vector<4x8xbf16>
    %cst_81 = arith.constant dense<0.000000e+00> : vector<4x256xf32>
    %82 = tpu.matmul %81, %69, %cst_81 {dimension_numbers = #tpu.dot_dimension_numbers<[1], [0], [0], [1], [0, 0, 1, 1], [], []>} : vector<4x8xbf16>, vector<8x256xbf16>, vector<4x256xf32> -> vector<4x256xf32>
    %83 = arith.truncf %82 : vector<4x256xf32> to vector<4x256xbf16>
    %c0_82 = arith.constant 0 : index
    %c512_83 = arith.constant 512 : index
    %84 = vector.load %arg18[%c0_82, %c512_83] : memref<16x1280xbf16, #tpu.memory_space<vmem>>, vector<4x256xbf16>
    tpu.vector_store %arg18[%c0_82, %c512_83], %83 {strides = array<i32>} : memref<16x1280xbf16, #tpu.memory_space<vmem>>, vector<4x256xbf16>,
    %c3_84 = arith.constant 3 : index
    %c0_85 = arith.constant 0 : index
    %c0_86 = arith.constant 0 : index
    %85 = vector.load %arg8[%c3_84, %c0_85, %c0_86] : memref<5x4x8xbf16, #tpu.memory_space<vmem>>, vector<1x4x8xbf16>
    %86 = vector.shape_cast %85 : vector<1x4x8xbf16> to vector<4x8xbf16>
    %cst_87 = arith.constant dense<0.000000e+00> : vector<4x256xf32>
    %87 = tpu.matmul %86, %69, %cst_87 {dimension_numbers = #tpu.dot_dimension_numbers<[1], [0], [0], [1], [0, 0, 1, 1], [], []>} : vector<4x8xbf16>, vector<8x256xbf16>, vector<4x256xf32> -> vector<4x256xf32>
    %88 = arith.truncf %87 : vector<4x256xf32> to vector<4x256xbf16>
    %c0_88 = arith.constant 0 : index
    %c768_89 = arith.constant 768 : index
    %89 = vector.load %arg18[%c0_88, %c768_89] : memref<16x1280xbf16, #tpu.memory_space<vmem>>, vector<4x256xbf16>
    tpu.vector_store %arg18[%c0_88, %c768_89], %88 {strides = array<i32>} : memref<16x1280xbf16, #tpu.memory_space<vmem>>, vector<4x256xbf16>,
    %c4_90 = arith.constant 4 : index
    %c0_91 = arith.constant 0 : index
    %c0_92 = arith.constant 0 : index
    %90 = vector.load %arg8[%c4_90, %c0_91, %c0_92] : memref<5x4x8xbf16, #tpu.memory_space<vmem>>, vector<1x4x8xbf16>
    %91 = vector.shape_cast %90 : vector<1x4x8xbf16> to vector<4x8xbf16>
    %cst_93 = arith.constant dense<0.000000e+00> : vector<4x256xf32>
    %92 = tpu.matmul %91, %69, %cst_93 {dimension_numbers = #tpu.dot_dimension_numbers<[1], [0], [0], [1], [0, 0, 1, 1], [], []>} : vector<4x8xbf16>, vector<8x256xbf16>, vector<4x256xf32> -> vector<4x256xf32>
    %93 = arith.truncf %92 : vector<4x256xf32> to vector<4x256xbf16>
    %c0_94 = arith.constant 0 : index
    %c1024_95 = arith.constant 1024 : index
    %94 = vector.load %arg18[%c0_94, %c1024_95] : memref<16x1280xbf16, #tpu.memory_space<vmem>>, vector<4x256xbf16>
    tpu.vector_store %arg18[%c0_94, %c1024_95], %93 {strides = array<i32>} : memref<16x1280xbf16, #tpu.memory_space<vmem>>, vector<4x256xbf16>,
    %c0_96 = arith.constant 0 : index
    %c0_97 = arith.constant 0 : index
    %95 = vector.load %arg18[%c0_96, %c0_97] : memref<16x1280xbf16, #tpu.memory_space<vmem>>, vector<4x1280xbf16>
    %c0_98 = arith.constant 0 : index
    %c0_99 = arith.constant 0 : index
    %96 = vector.load %arg9[%c0_98, %c0_99] : memref<1280x256xbf16, #tpu.memory_space<vmem>>, vector<1280x256xbf16>
    %cst_100 = arith.constant dense<0.000000e+00> : vector<4x256xf32>
    %97 = tpu.matmul %95, %96, %cst_100 {dimension_numbers = #tpu.dot_dimension_numbers<[1], [0], [0], [1], [0, 0, 1, 1], [], []>} : vector<4x1280xbf16>, vector<1280x256xbf16>, vector<4x256xf32> -> vector<4x256xf32>
    %c0_101 = arith.constant 0 : index
    %c0_102 = arith.constant 0 : index
    %98 = vector.load %arg10[%c0_101, %c0_102] : memref<1x256xf32, #tpu.memory_space<vmem>>, vector<1x256xf32>
    %99 = vector.broadcast %98 : vector<1x256xf32> to vector<4x256xf32>
    %100 = arith.addf %97, %99 : vector<4x256xf32>
    %cst_103 = arith.constant 0.000000e+00 : f32
    %101 = vector.broadcast %cst_103 : f32 to vector<4x256xf32>
    %102 = arith.maximumf %100, %101 : vector<4x256xf32>
    %103 = arith.truncf %102 : vector<4x256xf32> to vector<4x256xbf16>
    %c0_104 = arith.constant 0 : index
    %c0_105 = arith.constant 0 : index
    %c0_106 = arith.constant 0 : index
    %104 = vector.load %arg11[%c0_104, %c0_105, %c0_106] : memref<5x2x4xbf16, #tpu.memory_space<vmem>>, vector<1x2x4xbf16>
    %105 = vector.shape_cast %104 : vector<1x2x4xbf16> to vector<2x4xbf16>
    %cst_107 = arith.constant dense<0.000000e+00> : vector<2x256xf32>
    %106 = tpu.matmul %105, %103, %cst_107 {dimension_numbers = #tpu.dot_dimension_numbers<[1], [0], [0], [1], [0, 0, 1, 1], [], []>} : vector<2x4xbf16>, vector<4x256xbf16>, vector<2x256xf32> -> vector<2x256xf32>
    %107 = arith.truncf %106 : vector<2x256xf32> to vector<2x256xbf16>
    %c0_108 = arith.constant 0 : index
    %c0_109 = arith.constant 0 : index
    %108 = vector.load %arg18[%c0_108, %c0_109] : memref<16x1280xbf16, #tpu.memory_space<vmem>>, vector<2x256xbf16>
    tpu.vector_store %arg18[%c0_108, %c0_109], %107 {strides = array<i32>} : memref<16x1280xbf16, #tpu.memory_space<vmem>>, vector<2x256xbf16>,
    %c1_110 = arith.constant 1 : index
    %c0_111 = arith.constant 0 : index
    %c0_112 = arith.constant 0 : index
    %109 = vector.load %arg11[%c1_110, %c0_111, %c0_112] : memref<5x2x4xbf16, #tpu.memory_space<vmem>>, vector<1x2x4xbf16>
    %110 = vector.shape_cast %109 : vector<1x2x4xbf16> to vector<2x4xbf16>
    %cst_113 = arith.constant dense<0.000000e+00> : vector<2x256xf32>
    %111 = tpu.matmul %110, %103, %cst_113 {dimension_numbers = #tpu.dot_dimension_numbers<[1], [0], [0], [1], [0, 0, 1, 1], [], []>} : vector<2x4xbf16>, vector<4x256xbf16>, vector<2x256xf32> -> vector<2x256xf32>
    %112 = arith.truncf %111 : vector<2x256xf32> to vector<2x256xbf16>
    %c0_114 = arith.constant 0 : index
    %c256_115 = arith.constant 256 : index
    %113 = vector.load %arg18[%c0_114, %c256_115] : memref<16x1280xbf16, #tpu.memory_space<vmem>>, vector<2x256xbf16>
    tpu.vector_store %arg18[%c0_114, %c256_115], %112 {strides = array<i32>} : memref<16x1280xbf16, #tpu.memory_space<vmem>>, vector<2x256xbf16>,
    %c2_116 = arith.constant 2 : index
    %c0_117 = arith.constant 0 : index
    %c0_118 = arith.constant 0 : index
    %114 = vector.load %arg11[%c2_116, %c0_117, %c0_118] : memref<5x2x4xbf16, #tpu.memory_space<vmem>>, vector<1x2x4xbf16>
    %115 = vector.shape_cast %114 : vector<1x2x4xbf16> to vector<2x4xbf16>
    %cst_119 = arith.constant dense<0.000000e+00> : vector<2x256xf32>
    %116 = tpu.matmul %115, %103, %cst_119 {dimension_numbers = #tpu.dot_dimension_numbers<[1], [0], [0], [1], [0, 0, 1, 1], [], []>} : vector<2x4xbf16>, vector<4x256xbf16>, vector<2x256xf32> -> vector<2x256xf32>
    %117 = arith.truncf %116 : vector<2x256xf32> to vector<2x256xbf16>
    %c0_120 = arith.constant 0 : index
    %c512_121 = arith.constant 512 : index
    %118 = vector.load %arg18[%c0_120, %c512_121] : memref<16x1280xbf16, #tpu.memory_space<vmem>>, vector<2x256xbf16>
    tpu.vector_store %arg18[%c0_120, %c512_121], %117 {strides = array<i32>} : memref<16x1280xbf16, #tpu.memory_space<vmem>>, vector<2x256xbf16>,
    %c3_122 = arith.constant 3 : index
    %c0_123 = arith.constant 0 : index
    %c0_124 = arith.constant 0 : index
    %119 = vector.load %arg11[%c3_122, %c0_123, %c0_124] : memref<5x2x4xbf16, #tpu.memory_space<vmem>>, vector<1x2x4xbf16>
    %120 = vector.shape_cast %119 : vector<1x2x4xbf16> to vector<2x4xbf16>
    %cst_125 = arith.constant dense<0.000000e+00> : vector<2x256xf32>
    %121 = tpu.matmul %120, %103, %cst_125 {dimension_numbers = #tpu.dot_dimension_numbers<[1], [0], [0], [1], [0, 0, 1, 1], [], []>} : vector<2x4xbf16>, vector<4x256xbf16>, vector<2x256xf32> -> vector<2x256xf32>
    %122 = arith.truncf %121 : vector<2x256xf32> to vector<2x256xbf16>
    %c0_126 = arith.constant 0 : index
    %c768_127 = arith.constant 768 : index
    %123 = vector.load %arg18[%c0_126, %c768_127] : memref<16x1280xbf16, #tpu.memory_space<vmem>>, vector<2x256xbf16>
    tpu.vector_store %arg18[%c0_126, %c768_127], %122 {strides = array<i32>} : memref<16x1280xbf16, #tpu.memory_space<vmem>>, vector<2x256xbf16>,
    %c4_128 = arith.constant 4 : index
    %c0_129 = arith.constant 0 : index
    %c0_130 = arith.constant 0 : index
    %124 = vector.load %arg11[%c4_128, %c0_129, %c0_130] : memref<5x2x4xbf16, #tpu.memory_space<vmem>>, vector<1x2x4xbf16>
    %125 = vector.shape_cast %124 : vector<1x2x4xbf16> to vector<2x4xbf16>
    %cst_131 = arith.constant dense<0.000000e+00> : vector<2x256xf32>
    %126 = tpu.matmul %125, %103, %cst_131 {dimension_numbers = #tpu.dot_dimension_numbers<[1], [0], [0], [1], [0, 0, 1, 1], [], []>} : vector<2x4xbf16>, vector<4x256xbf16>, vector<2x256xf32> -> vector<2x256xf32>
    %127 = arith.truncf %126 : vector<2x256xf32> to vector<2x256xbf16>
    %c0_132 = arith.constant 0 : index
    %c1024_133 = arith.constant 1024 : index
    %128 = vector.load %arg18[%c0_132, %c1024_133] : memref<16x1280xbf16, #tpu.memory_space<vmem>>, vector<2x256xbf16>
    tpu.vector_store %arg18[%c0_132, %c1024_133], %127 {strides = array<i32>} : memref<16x1280xbf16, #tpu.memory_space<vmem>>, vector<2x256xbf16>,
    %c0_134 = arith.constant 0 : index
    %c0_135 = arith.constant 0 : index
    %129 = vector.load %arg18[%c0_134, %c0_135] : memref<16x1280xbf16, #tpu.memory_space<vmem>>, vector<2x1280xbf16>
    %c0_136 = arith.constant 0 : index
    %c0_137 = arith.constant 0 : index
    %130 = vector.load %arg12[%c0_136, %c0_137] : memref<1280x256xbf16, #tpu.memory_space<vmem>>, vector<1280x256xbf16>
    %cst_138 = arith.constant dense<0.000000e+00> : vector<2x256xf32>
    %131 = tpu.matmul %129, %130, %cst_138 {dimension_numbers = #tpu.dot_dimension_numbers<[1], [0], [0], [1], [0, 0, 1, 1], [], []>} : vector<2x1280xbf16>, vector<1280x256xbf16>, vector<2x256xf32> -> vector<2x256xf32>
    %c0_139 = arith.constant 0 : index
    %c0_140 = arith.constant 0 : index
    %132 = vector.load %arg13[%c0_139, %c0_140] : memref<1x256xf32, #tpu.memory_space<vmem>>, vector<1x256xf32>
    %133 = vector.broadcast %132 : vector<1x256xf32> to vector<2x256xf32>
    %134 = arith.addf %131, %133 : vector<2x256xf32>
    %cst_141 = arith.constant 0.000000e+00 : f32
    %135 = vector.broadcast %cst_141 : f32 to vector<2x256xf32>
    %136 = arith.maximumf %134, %135 : vector<2x256xf32>
    %c0_142 = arith.constant 0 : index
    %c0_143 = arith.constant 0 : index
    %137 = vector.load %arg14[%c0_142, %c0_143] : memref<2x2xf32, #tpu.memory_space<vmem>>, vector<2x2xf32>
    %cst_144 = arith.constant dense<0.000000e+00> : vector<2x256xf32>
    %138 = tpu.matmul %137, %136, %cst_144 {dimension_numbers = #tpu.dot_dimension_numbers<[1], [0], [0], [1], [0, 0, 1, 1], [], []>} : vector<2x2xf32>, vector<2x256xf32>, vector<2x256xf32> -> vector<2x256xf32>
    %139 = arith.truncf %138 : vector<2x256xf32> to vector<2x256xbf16>
    %c0_145 = arith.constant 0 : index
    %c0_146 = arith.constant 0 : index
    %140 = vector.load %arg15[%c0_145, %c0_146] : memref<256x128xbf16, #tpu.memory_space<vmem>>, vector<256x128xbf16>
    %cst_147 = arith.constant dense<0.000000e+00> : vector<2x128xf32>
    %141 = tpu.matmul %139, %140, %cst_147 {dimension_numbers = #tpu.dot_dimension_numbers<[1], [0], [0], [1], [0, 0, 1, 1], [], []>} : vector<2x256xbf16>, vector<256x128xbf16>, vector<2x128xf32> -> vector<2x128xf32>
    %c0_148 = arith.constant 0 : index
    %c0_149 = arith.constant 0 : index
    %142 = vector.load %arg16[%c0_148, %c0_149] : memref<1x128xf32, #tpu.memory_space<vmem>>, vector<1x128xf32>
    %143 = vector.broadcast %142 : vector<1x128xf32> to vector<2x128xf32>
    %144 = arith.addf %141, %143 : vector<2x128xf32>
    %c0_150 = arith.constant 0 : index
    %c0_151 = arith.constant 0 : index
    %145 = vector.load %arg17[%c0_150, %c0_151] : memref<2x128xf32, #tpu.memory_space<vmem>>, vector<2x128xf32>
    tpu.vector_store %arg17[%c0_150, %c0_151], %144 {strides = array<i32>} : memref<2x128xf32, #tpu.memory_space<vmem>>, vector<2x128xf32>,
    return
  }
  func.func @transform_0(%arg0: i32) -> (i32, i32) {
    %c0_i32 = arith.constant 0 : i32
    %c0_i32_0 = arith.constant 0 : i32
    %c0_i32_1 = arith.constant 0 : i32
    return %c0_i32, %c0_i32_0 : i32, i32
  }
  func.func @transform_1(%arg0: i32) -> (i32, i32, i32) {
    %c0_i32 = arith.constant 0 : i32
    %c0_i32_0 = arith.constant 0 : i32
    %c0_i32_1 = arith.constant 0 : i32
    %c0_i32_2 = arith.constant 0 : i32
    return %c0_i32, %c0_i32_0, %c0_i32_1 : i32, i32, i32
  }
  func.func @transform_2(%arg0: i32) -> (i32, i32) {
    %c0_i32 = arith.constant 0 : i32
    %c0_i32_0 = arith.constant 0 : i32
    %c0_i32_1 = arith.constant 0 : i32
    return %c0_i32, %c0_i32_0 : i32, i32
  }
  func.func @transform_3(%arg0: i32) -> (i32, i32) {
    %c0_i32 = arith.constant 0 : i32
    %c0_i32_0 = arith.constant 0 : i32
    %c0_i32_1 = arith.constant 0 : i32
    return %c0_i32, %c0_i32_0 : i32, i32
  }
  func.func @transform_4(%arg0: i32) -> (i32, i32, i32) {
    %c0_i32 = arith.constant 0 : i32
    %c0_i32_0 = arith.constant 0 : i32
    %c0_i32_1 = arith.constant 0 : i32
    %c0_i32_2 = arith.constant 0 : i32
    return %c0_i32, %c0_i32_0, %c0_i32_1 : i32, i32, i32
  }
  func.func @transform_5(%arg0: i32) -> (i32, i32) {
    %c0_i32 = arith.constant 0 : i32
    %c0_i32_0 = arith.constant 0 : i32
    %c0_i32_1 = arith.constant 0 : i32
    return %c0_i32, %c0_i32_0 : i32, i32
  }
  func.func @transform_6(%arg0: i32) -> (i32, i32) {
    %c0_i32 = arith.constant 0 : i32
    %c0_i32_0 = arith.constant 0 : i32
    %c0_i32_1 = arith.constant 0 : i32
    return %c0_i32, %c0_i32_0 : i32, i32
  }
  func.func @transform_7(%arg0: i32) -> (i32, i32, i32) {
    %c0_i32 = arith.constant 0 : i32
    %c0_i32_0 = arith.constant 0 : i32
    %c0_i32_1 = arith.constant 0 : i32
    %c0_i32_2 = arith.constant 0 : i32
    return %c0_i32, %c0_i32_0, %c0_i32_1 : i32, i32, i32
  }
  func.func @transform_8(%arg0: i32) -> (i32, i32) {
    %c0_i32 = arith.constant 0 : i32
    %c0_i32_0 = arith.constant 0 : i32
    %c0_i32_1 = arith.constant 0 : i32
    return %c0_i32, %c0_i32_0 : i32, i32
  }
  func.func @transform_9(%arg0: i32) -> (i32, i32) {
    %c0_i32 = arith.constant 0 : i32
    %c0_i32_0 = arith.constant 0 : i32
    %c0_i32_1 = arith.constant 0 : i32
    return %c0_i32, %c0_i32_0 : i32, i32
  }
  func.func @transform_10(%arg0: i32) -> (i32, i32, i32) {
    %c0_i32 = arith.constant 0 : i32
    %c0_i32_0 = arith.constant 0 : i32
    %c0_i32_1 = arith.constant 0 : i32
    %c0_i32_2 = arith.constant 0 : i32
    return %c0_i32, %c0_i32_0, %c0_i32_1 : i32, i32, i32
  }
  func.func @transform_11(%arg0: i32) -> (i32, i32) {
    %c0_i32 = arith.constant 0 : i32
    %c0_i32_0 = arith.constant 0 : i32
    %c0_i32_1 = arith.constant 0 : i32
    return %c0_i32, %c0_i32_0 : i32, i32
  }
  func.func @transform_12(%arg0: i32) -> (i32, i32) {
    %c0_i32 = arith.constant 0 : i32
    %c0_i32_0 = arith.constant 0 : i32
    %c0_i32_1 = arith.constant 0 : i32
    return %c0_i32, %c0_i32_0 : i32, i32
  }
  func.func @transform_13(%arg0: i32) -> (i32, i32) {
    %c0_i32 = arith.constant 0 : i32
    %c0_i32_0 = arith.constant 0 : i32
    %c0_i32_1 = arith.constant 0 : i32
    return %c0_i32, %c0_i32_0 : i32, i32
  }
  func.func @transform_14(%arg0: i32) -> (i32, i32) {
    %c0_i32 = arith.constant 0 : i32
    %c0_i32_0 = arith.constant 0 : i32
    %c0_i32_1 = arith.constant 0 : i32
    return %c0_i32, %c0_i32_0 : i32, i32
  }
  func.func @transform_15(%arg0: i32) -> (i32, i32) {
    %c0_i32 = arith.constant 0 : i32
    %c0_i32_0 = arith.constant 0 : i32
    %c0_i32_1 = arith.constant 0 : i32
    return %c0_i32, %c0_i32_0 : i32, i32
  }
  func.func @transform_16(%arg0: i32) -> (i32, i32) {
    %c0_i32 = arith.constant 0 : i32
    %c0_i32_0 = arith.constant 0 : i32
    %c0_i32_1 = arith.constant 0 : i32
    return %c0_i32, %c0_i32_0 : i32, i32
  }
}

</mosaic_0001>

<bundles_post_ra>
// kernel: _forward.1
= control target key start
LH: loop header
LB: loop body
LE: loop exit
PB: predicated region body
PF: predicated region fallthrough
CT: control target
= control target key end

     0   :  { %s7982_s0 = inlined_call_operand.vmem [shape: f32[32,128], index: 0, kind: input, shape index: {}]   ;;  %s7983_s1 = inlined_call_operand.vmem [shape: bf16[5,16,32], index: 1, kind: input, shape index: {}]   ;;  %s7984_s2 = inlined_call_operand.vmem [shape: bf16[640,256], index: 2, kind: input, shape index: {}]   ;;  %s7985_s3 = inlined_call_operand.vmem [shape: f32[1,256], index: 3, kind: input, shape index: {}]   ;;  %s7986_s4 = inlined_call_operand.vmem [shape: bf16[5,8,16], index: 4, kind: input, shape index: {}]   ;;  %s7987_s5 = inlined_call_operand.hbm [shape: bf16[1280,256], index: 5, kind: input, shape index: {}]   ;;  %s7988_s6 = inlined_call_operand.vmem [shape: f32[1,256], index: 6, kind: input, shape index: {}]   ;;  %s7989_s7 = inlined_call_operand.vmem [shape: bf16[5,4,8], index: 7, kind: input, shape index: {}]   ;;  %s7990_s8 = inlined_call_operand.hbm [shape: bf16[1280,256], index: 8, kind: input, shape index: {}]   ;;  %s7991_s9 = inlined_call_operand.vmem [shape: f32[1,256], index: 9, kind: input, shape index: {}]   ;;  %s7992_s10 = inlined_call_operand.vmem [shape: bf16[5,2,4], index: 10, kind: input, shape index: {}]   ;;  %s7993_s11 = inlined_call_operand.hbm [shape: bf16[1280,256], index: 11, kind: input, shape index: {}]   ;;  %s7994_s12 = inlined_call_operand.vmem [shape: f32[1,256], index: 12, kind: input, shape index: {}]   ;;  %s7995_s13 = inlined_call_operand.vmem [shape: f32[2,2], index: 13, kind: input, shape index: {}]   ;;  %s7996_s14 = inlined_call_operand.vmem [shape: bf16[256,128], index: 14, kind: input, shape index: {}]   ;;  %s7997_s15 = inlined_call_operand.vmem [shape: f32[1,128], index: 15, kind: input, shape index: {}]   ;;  %s7998_s16 = inlined_call_operand.hbm [shape: f32[2,128], index: 16, kind: output, shape index: {}]  }
   0x1   :  { %8000 = sst [smem:[#allocation13_spill]] %s7982_s0 }
   0x2   :  { %21 = vsyncpa [#allocation4], 0 }
   0x3   :  { %22 = vsyncpa [#allocation7], 0 }
   0x4   :  { %23 = vsyncpa [#allocation5], 0  ;;  %s7355_s21 = smov [#allocation6]   ;;  %s7356_s23 = smov [#allocation3]  }
   0x5   :  { %s55_s22 = sshll.u32 %s7355_s21, 4  ;;  %s39_s24 = sshll.u32 %s7356_s23, 4  ;;  %s56_s22 = int_to_ptr.vmem [resolvable:$true] %s55_s22  ;;  %s7449_s24 = int_to_ptr.vmem [resolvable:$true] %s39_s24 }
   0x6   :  { %s7261_s27 = scalar_lea.hbm %s7990_s8, 20480 }
   0x7   :  { %p7262_p0 = scmp.ne.s32.totalorder %s7990_s8, %s7261_s27  ;;  %p7265_p1 = scmp.lt.u32.totalorder %s7261_s27, %s7990_s8 }
   0x9   :  { %p7267_p2 = pnand %p7265_p1, %p7262_p0 }
   0xb   :  { %7270 = shalt.err (!%p7267_p2)
}
   0xc   :  { %s7271_s17 = scalar_lea.vmem %s56_s22, 20480  ;;  %p7276_p4 = scmp.lt.s32.totalorder %s56_s22, %s56_s22 }
   0xd   :  { %p7272_p3 = scmp.ne.s32.totalorder %s56_s22, %s7271_s17  ;;  %p7277_p5 = scmp.lt.s32.totalorder %s7271_s17, %s7271_s17 }
   0xf   :  { %p7278_p6 = por %p7277_p5, %p7276_p4 }
  0x11   :  { %p7279_p7 = pnand %p7278_p6, %p7272_p3 }
  0x13   :  { %7282 = shalt.err (!%p7279_p7)
}
  0x14   :  { %s7357_s18 = smov 128   ;;  %s7358_s19 = smov 8  }
  0x15   :  { %61 = dma.hbm_to_vmem [thread:$0]  %s7990_s8, 20480, %s56_s22, [#allocation7], %s7357_s18, %s7357_s18, %s7358_s19  }
  0x16   :  { %s7283_s26 = scalar_lea.hbm %s7987_s5, 20480 }
  0x17   :  { %p7284_p8 = scmp.ne.s32.totalorder %s7987_s5, %s7283_s26  ;;  %p7287_p9 = scmp.lt.u32.totalorder %s7283_s26, %s7987_s5 }
  0x19   :  { %p7289_p10 = pnand %p7287_p9, %p7284_p8 }
  0x1b   :  { %7292 = shalt.err (!%p7289_p10)
}
  0x1c   :  { %s7293_s0 = scalar_lea.vmem %s7449_s24, 20480  ;;  %p7298_p12 = scmp.lt.s32.totalorder %s7449_s24, %s7449_s24 }
  0x1d   :  { %p7294_p11 = scmp.ne.s32.totalorder %s7449_s24, %s7293_s0  ;;  %p7299_p13 = scmp.lt.s32.totalorder %s7293_s0, %s7293_s0 }
  0x1f   :  { %p7300_p0 = por %p7299_p13, %p7298_p12 }
  0x21   :  { %p7301_p1 = pnand %p7300_p0, %p7294_p11 }
  0x23   :  { %7304 = shalt.err (!%p7301_p1)
}
  0x24   :  { %45 = dma.hbm_to_vmem [thread:$0]  %s7987_s5, 20480, %s7449_s24, [#allocation4], %s7357_s18, %s7357_s18, %s7358_s19  }
  0x25   :  { %s7359_s17 = smov [#allocation8]   ;;  %s7305_s25 = scalar_lea.hbm %s7993_s11, 20480 }
  0x26   :  { %s71_s20 = sshll.u32 %s7359_s17, 4  ;;  %p7306_p2 = scmp.ne.s32.totalorder %s7993_s11, %s7305_s25  ;;  %s72_s20 = int_to_ptr.vmem [resolvable:$true] %s71_s20 }
  0x27   :  { %p7309_p3 = scmp.lt.u32.totalorder %s7305_s25, %s7993_s11 }
  0x29   :  { %p7311_p4 = pnand %p7309_p3, %p7306_p2 }
  0x2b   :  { %7314 = shalt.err (!%p7311_p4)
}
  0x2c   :  { %s7315_s30 = scalar_lea.vmem %s72_s20, 20480  ;;  %p7320_p6 = scmp.lt.s32.totalorder %s72_s20, %s72_s20 }
  0x2d   :  { %p7316_p5 = scmp.ne.s32.totalorder %s72_s20, %s7315_s30  ;;  %p7321_p7 = scmp.lt.s32.totalorder %s7315_s30, %s7315_s30 }
  0x2f   :  { %p7322_p8 = por %p7321_p7, %p7320_p6 }
  0x31   :  { %p7323_p9 = pnand %p7322_p8, %p7316_p5 }
  0x33   :  { %7326 = shalt.err (!%p7323_p9)
}
  0x34   :  { %77 = dma.hbm_to_vmem [thread:$0]  %s7993_s11, 20480, %s72_s20, [#allocation7], %s7357_s18, %s7357_s18, %s7358_s19  }
  0x35   :  { %7349 = dma.done.wait [#allocation4], 20480  }
  0x36   :  { %7350 = vsyncadd [#allocation4], 4294946816 }
  0x37   :  { %7351 = dma.done.wait [#allocation7], 40960  }
  0x38   :  { %7352 = vsyncadd [#allocation7], 4294926336  ;;  %v7360_v0 = vmov 0.0   ;;  %vm7361_vm0 = vmmov 0   ;;  %s8001_s22 = sld [smem:[#allocation13_spill]]  ;;  %v6400_v7 = vld [vmem:[%s7983_s1] sm:$0xff]  }
  0x39   :  { %6287 = vmatprep.subr.bf16.mxu1 %v7360_v0  ;;  %6291 = vmatprep.mubr.msk.bf16.mxu1 %vm7361_vm0, %v7360_v0  ;;  %v6404_v8 = vld [vmem:[%s7983_s1 + $0x20] sm:$0xff]   ;;  %vm109_vm1 = vcmask 261120   ;;  %v6401_v9 = vld [vmem:[%s7983_s1 + $0x8] sm:$0xff]   ;;  %v6402_v10 = vld [vmem:[%s7983_s1 + $0x10] sm:$0xff]   ;;  %v7362_v45 = vmov 0   ;;  %vm1005_vm2 = vcmask 130048  }
  0x3a   :  { %6319 = vmatprep.subr.bf16.mxu0 %v7360_v0  ;;  %6323 = vmatprep.mubr.msk.bf16.mxu0 %vm7361_vm0, %v7360_v0  ;;  %v6407_v11 = vld [vmem:[%s7984_s2 + $0x4] ss:$8 sps:$4 sm:$0xff]   ;;  %v6403_v12 = vld [vmem:[%s7983_s1 + $0x18] sm:$0xff]   ;;  %v6405_v13 = vld [vmem:[%s7984_s2] ss:$8 sps:$4 sm:$0xff]   ;;  %vm2450_vm3 = vcmask 1043456  }
  0x3b   :  { %v6410_v14 = vld [vmem:[%s7984_s2 + $0x14] ss:$8 sps:$4 sm:$0xff]   ;;  %v6408_v15 = vld [vmem:[%s7984_s2 + $0x10] ss:$8 sps:$4 sm:$0xff]   ;;  %v6413_v16 = vld [vmem:[%s7984_s2 + $0x24] ss:$8 sps:$4 sm:$0xff]  }
  0x3c   :  { %v6411_v17 = vld [vmem:[%s7984_s2 + $0x20] ss:$8 sps:$4 sm:$0xff]   ;;  %v6416_v18 = vld [vmem:[%s7984_s2 + $0x34] ss:$8 sps:$4 sm:$0xff]   ;;  %v6414_v19 = vld [vmem:[%s7984_s2 + $0x30] ss:$8 sps:$4 sm:$0xff]  }
  0x3d   :  { %v6419_v20 = vld [vmem:[%s7984_s2 + $0x44] ss:$8 sps:$4 sm:$0xff]   ;;  %v6417_v21 = vld [vmem:[%s7984_s2 + $0x40] ss:$8 sps:$4 sm:$0xff]   ;;  %v6422_v22 = vld [vmem:[%s7984_s2 + $0x54] ss:$8 sps:$4 sm:$0xff]  }
  0x3e   :  { %v96_v1 = vld [vmem:[%s8001_s22] sm:$0xff]  ;;  %v97_v2 = vld [vmem:[%s8001_s22 + $0x8] sm:$0xff]  ;;  %v98_v3 = vld [vmem:[%s8001_s22 + $0x10] sm:$0xff]  ;;  %vm2446_vm4 = vcmask 64512   ;;  %vm3898_vm5 = vcmask 1041408   ;;  %vm3894_vm6 = vcmask 31744  }
  0x3f   :  { %v100_v4 = vpack.c.bf16 %v97_v2, %v96_v1  ;;  %v99_v5 = vld [vmem:[%s8001_s22 + $0x18] sm:$0xff]  ;;  %v6425_v24 = vld [vmem:[%s7984_s2 + $0x64] ss:$8 sps:$4 sm:$0xff]   ;;  %v6423_v25 = vld [vmem:[%s7984_s2 + $0x60] ss:$8 sps:$4 sm:$0xff]   ;;  %vm5340_vm7 = vcmask 15360  }
  0x40   :  { %v101_v6 = vpack.c.bf16 %v99_v5, %v98_v3  ;;  %v6420_v23 = vld [vmem:[%s7984_s2 + $0x50] ss:$8 sps:$4 sm:$0xff]   ;;  %v6428_v26 = vld [vmem:[%s7984_s2 + $0x74] ss:$8 sps:$4 sm:$0xff]   ;;  %v6431_v28 = vld [vmem:[%s7984_s2 + $0x84] ss:$8 sps:$4 sm:$0xff]  }
  0x41   :  { %6288 = vmatpush3.bf16.msra.mxu1 %v100_v4  ;;  %6320 = vmatpush3.bf16.msra.mxu0 %v100_v4  ;;  %v6426_v27 = vld [vmem:[%s7984_s2 + $0x70] ss:$8 sps:$4 sm:$0xff]   ;;  %v6429_v29 = vld [vmem:[%s7984_s2 + $0x80] ss:$8 sps:$4 sm:$0xff]   ;;  %v6434_v30 = vld [vmem:[%s7984_s2 + $0x94] ss:$8 sps:$4 sm:$0xff]  }
  0x42   :  { %6289 = vmatprep.subr.bf16.mxu1 %v7360_v0  ;;  %6321 = vmatprep.subr.bf16.mxu0 %v7360_v0  ;;  %v6432_v31 = vld [vmem:[%s7984_s2 + $0x90] ss:$8 sps:$4 sm:$0xff]   ;;  %v6437_v32 = vld [vmem:[%s7984_s2 + $0xa4] ss:$8 sps:$4 sm:$0xff]   ;;  %v6435_v33 = vld [vmem:[%s7984_s2 + $0xa0] ss:$8 sps:$4 sm:$0xff]  }
  0x43   :  { %v6440_v34 = vld [vmem:[%s7984_s2 + $0xb4] ss:$8 sps:$4 sm:$0xff]   ;;  %v6438_v35 = vld [vmem:[%s7984_s2 + $0xb0] ss:$8 sps:$4 sm:$0xff]   ;;  %v6443_v36 = vld [vmem:[%s7984_s2 + $0xc4] ss:$8 sps:$4 sm:$0xff]  }
  0x44   :  { %v6441_v37 = vld [vmem:[%s7984_s2 + $0xc0] ss:$8 sps:$4 sm:$0xff]   ;;  %v6446_v38 = vld [vmem:[%s7984_s2 + $0xd4] ss:$8 sps:$4 sm:$0xff]   ;;  %v6444_v39 = vld [vmem:[%s7984_s2 + $0xd0] ss:$8 sps:$4 sm:$0xff]  }
  0x45   :  { %6290 = vmatpush3.bf16.msra.mxu1 %v101_v6  ;;  %6322 = vmatpush3.bf16.msra.mxu0 %v101_v6  ;;  %v6449_v40 = vld [vmem:[%s7984_s2 + $0xe4] ss:$8 sps:$4 sm:$0xff]   ;;  %v6447_v41 = vld [vmem:[%s7984_s2 + $0xe0] ss:$8 sps:$4 sm:$0xff]   ;;  %v6452_v42 = vld [vmem:[%s7984_s2 + $0xf4] ss:$8 sps:$4 sm:$0xff]  }
  0x46   :  { %6295 = vmatprep.subr.bf16.mxu1 %v7360_v0  ;;  %v6450_v43 = vld [vmem:[%s7984_s2 + $0xf0] ss:$8 sps:$4 sm:$0xff]   ;;  %v6455_v44 = vld [vmem:[%s7984_s2 + $0x104] ss:$8 sps:$4 sm:$0xff]   ;;  %v6453_v58 = vld [vmem:[%s7984_s2 + $0x100] ss:$8 sps:$4 sm:$0xff]  }
  0x47   :  { %v6458_v62 = vld [vmem:[%s7984_s2 + $0x114] ss:$8 sps:$4 sm:$0xff]   ;;  %v6456_v63 = vld [vmem:[%s7984_s2 + $0x110] ss:$8 sps:$4 sm:$0xff]   ;;  %v6461_v1 = vld [vmem:[%s7984_s2 + $0x124] ss:$8 sps:$4 sm:$0xff]  }
  0x48   :  { %6292 = vmatmul.mubr.msk.bf16.vlgmr.msra.gmra.mrb[0].mxu1 %vm109_vm1, %v6400_v7  ;;  %6324 = vmatmul.mubr.msk.bf16.vlgmr.msra.gmra.mrb[0].mxu0 %vm109_vm1, %v6404_v8  ;;  %v6459_v5 = vld [vmem:[%s7984_s2 + $0x120] ss:$8 sps:$4 sm:$0xff]   ;;  %v6464_v8 = vld [vmem:[%s7984_s2 + $0x134] ss:$8 sps:$4 sm:$0xff]   ;;  %s7363_s19 = smov [#allocation9]  }
  0x49   :  { %6296 = vmatpush3.bf16.msra.mxu1 %v100_v4  ;;  %6299 = vmatprep.mubr.msk.bf16.mxu1 %vm7361_vm0, %v7360_v0  ;;  %s5605_s17 = sshll.u32 %s7363_s19, 4  ;;  %s5606_s17 = int_to_ptr.vmem [resolvable:$true] %s5605_s17 }
  0x4a   :  { %6297 = vmatprep.subr.bf16.mxu1 %v7360_v0  ;;  %1041 = vmatprep.mubr.bf16.mxu0 %v7362_v45  ;;  %p7332_p11 = scmp.lt.s32.totalorder %s5606_s17, %s5606_s17 }
  0x4d   :  { %6298 = vmatpush3.bf16.msra.mxu1 %v101_v6 }
  0x4e   :  { %6303 = vmatprep.subr.bf16.mxu1 %v7360_v0 }
  0x50   :  { %6300 = vmatmul.mubr.msk.bf16.vlgmr.msra.gmra.mrb[4].mxu1 %vm109_vm1, %v6401_v9  ;;  %v6462_v9 = vld [vmem:[%s7984_s2 + $0x130] ss:$8 sps:$4 sm:$0xff]  }
  0x51   :  { %6304 = vmatpush3.bf16.msra.mxu1 %v100_v4  ;;  %6307 = vmatprep.mubr.msk.bf16.mxu1 %vm7361_vm0, %v7360_v0 }
  0x52   :  { %6305 = vmatprep.subr.bf16.mxu1 %v7360_v0 }
  0x55   :  { %6306 = vmatpush3.bf16.msra.mxu1 %v101_v6 }
  0x56   :  { %6311 = vmatprep.subr.bf16.mxu1 %v7360_v0 }
  0x58   :  { %6308 = vmatmul.mubr.msk.bf16.vlgmr.msra.gmra.mrb[8].mxu1 %vm109_vm1, %v6402_v10  ;;  %v6467_v10 = vld [vmem:[%s7984_s2 + $0x144] ss:$8 sps:$4 sm:$0xff]  }
  0x59   :  { %6312 = vmatpush3.bf16.msra.mxu1 %v100_v4  ;;  %6315 = vmatprep.mubr.msk.bf16.mxu1 %vm7361_vm0, %v7360_v0 }
  0x5a   :  { %6313 = vmatprep.subr.bf16.mxu1 %v7360_v0 }
  0x5d   :  { %6314 = vmatpush3.bf16.msra.mxu1 %v101_v6 }
  0x5e   :  { %869 = vmatprep.subr.bf16.mxu1 %v6407_v11 }
  0x60   :  { %6316 = vmatmul.mubr.msk.bf16.vlgmr.msra.gmra.mrb[12].mxu1 %vm109_vm1, %v6403_v12 }
  0x61   :  { %870 = vmatpush1.bf16.msra.mxu1 %v6405_v13 }
  0x62   :  { %871 = vmatprep.subr.bf16.mxu1 %v6410_v14  ;;  %v6465_v14 = vld [vmem:[%s7984_s2 + $0x140] ss:$8 sps:$4 sm:$0xff]  }
  0x65   :  { %872 = vmatpush1.bf16.msra.mxu1 %v6408_v15 }
  0x66   :  { %873 = vmatprep.subr.bf16.mxu1 %v6413_v16 }
  0x69   :  { %874 = vmatpush1.bf16.msra.mxu1 %v6411_v17  ;;  %v6470_v17 = vld [vmem:[%s7984_s2 + $0x154] ss:$8 sps:$4 sm:$0xff]  }
  0x6a   :  { %875 = vmatprep.subr.bf16.mxu1 %v6416_v18  ;;  %v6468_v18 = vld [vmem:[%s7984_s2 + $0x150] ss:$8 sps:$4 sm:$0xff]  }
  0x6d   :  { %876 = vmatpush1.bf16.msra.mxu1 %v6414_v19  ;;  %v6473_v19 = vld [vmem:[%s7984_s2 + $0x164] ss:$8 sps:$4 sm:$0xff]  }
  0x6e   :  { %877 = vmatprep.subr.bf16.mxu1 %v6419_v20  ;;  %v6471_v20 = vld [vmem:[%s7984_s2 + $0x160] ss:$8 sps:$4 sm:$0xff]  }
  0x71   :  { %878 = vmatpush1.bf16.msra.mxu1 %v6417_v21  ;;  %v6476_v21 = vld [vmem:[%s7984_s2 + $0x174] ss:$8 sps:$4 sm:$0xff]  }
  0x72   :  { %879 = vmatprep.subr.bf16.mxu1 %v6422_v22  ;;  %v6474_v22 = vld [vmem:[%s7984_s2 + $0x170] ss:$8 sps:$4 sm:$0xff]  }
  0x75   :  { %880 = vmatpush1.bf16.msra.mxu1 %v6420_v23  ;;  %v6479_v23 = vld [vmem:[%s7984_s2 + $0x184] ss:$8 sps:$4 sm:$0xff]  }
  0x76   :  { %881 = vmatprep.subr.bf16.mxu1 %v6425_v24  ;;  %v6477_v24 = vld [vmem:[%s7984_s2 + $0x180] ss:$8 sps:$4 sm:$0xff]  }
  0x79   :  { %882 = vmatpush1.bf16.msra.mxu1 %v6423_v25  ;;  %v6482_v25 = vld [vmem:[%s7984_s2 + $0x194] ss:$8 sps:$4 sm:$0xff]  }
  0x7a   :  { %883 = vmatprep.subr.bf16.mxu1 %v6428_v26  ;;  %v6480_v26 = vld [vmem:[%s7984_s2 + $0x190] ss:$8 sps:$4 sm:$0xff]  }
  0x7d   :  { %884 = vmatpush1.bf16.msra.mxu1 %v6426_v27  ;;  %v6485_v27 = vld [vmem:[%s7984_s2 + $0x1a4] ss:$8 sps:$4 sm:$0xff]  }
  0x7e   :  { %885 = vmatprep.subr.bf16.mxu1 %v6431_v28  ;;  %v6483_v28 = vld [vmem:[%s7984_s2 + $0x1a0] ss:$8 sps:$4 sm:$0xff]  }
  0x81   :  { %886 = vmatpush1.bf16.msra.mxu1 %v6429_v29  ;;  %v6488_v29 = vld [vmem:[%s7984_s2 + $0x1b4] ss:$8 sps:$4 sm:$0xff]  }
  0x82   :  { %887 = vmatprep.subr.bf16.mxu1 %v6434_v30  ;;  %v6486_v30 = vld [vmem:[%s7984_s2 + $0x1b0] ss:$8 sps:$4 sm:$0xff]  }
  0x85   :  { %888 = vmatpush1.bf16.msra.mxu1 %v6432_v31  ;;  %v6491_v31 = vld [vmem:[%s7984_s2 + $0x1c4] ss:$8 sps:$4 sm:$0xff]  }
  0x86   :  { %889 = vmatprep.subr.bf16.mxu1 %v6437_v32  ;;  %v6489_v32 = vld [vmem:[%s7984_s2 + $0x1c0] ss:$8 sps:$4 sm:$0xff]  }
  0x89   :  { %890 = vmatpush1.bf16.msra.mxu1 %v6435_v33  ;;  %v6494_v33 = vld [vmem:[%s7984_s2 + $0x1d4] ss:$8 sps:$4 sm:$0xff]  }
  0x8a   :  { %891 = vmatprep.subr.bf16.mxu1 %v6440_v34  ;;  %v6492_v34 = vld [vmem:[%s7984_s2 + $0x1d0] ss:$8 sps:$4 sm:$0xff]  }
  0x8d   :  { %892 = vmatpush1.bf16.msra.mxu1 %v6438_v35  ;;  %v6497_v35 = vld [vmem:[%s7984_s2 + $0x1e4] ss:$8 sps:$4 sm:$0xff]  }
  0x8e   :  { %893 = vmatprep.subr.bf16.mxu1 %v6443_v36  ;;  %v6495_v36 = vld [vmem:[%s7984_s2 + $0x1e0] ss:$8 sps:$4 sm:$0xff]  }
  0x91   :  { %894 = vmatpush1.bf16.msra.mxu1 %v6441_v37  ;;  %v6500_v37 = vld [vmem:[%s7984_s2 + $0x1f4] ss:$8 sps:$4 sm:$0xff]  }
  0x92   :  { %895 = vmatprep.subr.bf16.mxu1 %v6446_v38  ;;  %v6498_v38 = vld [vmem:[%s7984_s2 + $0x1f0] ss:$8 sps:$4 sm:$0xff]  }
  0x95   :  { %896 = vmatpush1.bf16.msra.mxu1 %v6444_v39  ;;  %v6503_v39 = vld [vmem:[%s7984_s2 + $0x204] ss:$8 sps:$4 sm:$0xff]  }
  0x96   :  { %897 = vmatprep.subr.bf16.mxu1 %v6449_v40  ;;  %v6501_v40 = vld [vmem:[%s7984_s2 + $0x200] ss:$8 sps:$4 sm:$0xff]  }
  0x99   :  { %898 = vmatpush1.bf16.msra.mxu1 %v6447_v41  ;;  %v6506_v41 = vld [vmem:[%s7984_s2 + $0x214] ss:$8 sps:$4 sm:$0xff]  }
  0x9a   :  { %899 = vmatprep.subr.bf16.mxu1 %v6452_v42  ;;  %v6504_v42 = vld [vmem:[%s7984_s2 + $0x210] ss:$8 sps:$4 sm:$0xff]  }
  0x9d   :  { %900 = vmatpush1.bf16.msra.mxu1 %v6450_v43  ;;  %v6509_v43 = vld [vmem:[%s7984_s2 + $0x224] ss:$8 sps:$4 sm:$0xff]  }
  0x9e   :  { %912 = vmatprep.subr.bf16.mxu1 %v6455_v44  ;;  %v6507_v44 = vld [vmem:[%s7984_s2 + $0x220] ss:$8 sps:$4 sm:$0xff]  }
 0x11b   :  { %v147_v46 = vpop.f32.mrb[0].mxu1  ;;  %v363_v47 = vpop.f32.mrb[0].mxu0 }
 0x11c   :  { %v6293_v48 = vpop.f32.mrb[1].mxu1  ;;  %v6325_v49 = vpop.f32.mrb[1].mxu0 }
 0x11d   :  { %v150_v50 = vpop.f32.mrb[2].mxu1  ;;  %v366_v51 = vpop.f32.mrb[2].mxu0  ;;  %v6515_v48 = vld [vmem:[%s7984_s2 + $0x244] ss:$8 sps:$4 sm:$0xff]   ;;  %v6513_v49 = vld [vmem:[%s7984_s2 + $0x240] ss:$8 sps:$4 sm:$0xff]  }
 0x11e   :  { %v154_v52 = vpack.c.bf16 %v150_v50, %v147_v46  ;;  %v6294_v53 = vpop.f32.mrb[3].mxu1  ;;  %v7653_v54 = vpack.c.bf16 %v366_v51, %v363_v47  ;;  %v6326_v55 = vpop.f32.mrb[3].mxu0  ;;  %v6512_v46 = vld [vmem:[%s7984_s2 + $0x234] ss:$8 sps:$4 sm:$0xff]   ;;  %v6510_v47 = vld [vmem:[%s7984_s2 + $0x230] ss:$8 sps:$4 sm:$0xff]  }
 0x11f   :  { %v6518_v50 = vld [vmem:[%s7984_s2 + $0x254] ss:$8 sps:$4 sm:$0xff]   ;;  %v6516_v51 = vld [vmem:[%s7984_s2 + $0x250] ss:$8 sps:$4 sm:$0xff]   ;;  %v6519_v53 = vld [vmem:[%s7984_s2 + $0x260] ss:$8 sps:$4 sm:$0xff]  }
 0x120   :  { %155 = vst [vmem:[#allocation2] sm:$0xff] %v154_v52  ;;  %371 = vst [vmem:[#allocation2 + $0x20] sm:$0xff] %v7653_v54  ;;  %v6524_v55 = vld [vmem:[%s7984_s2 + $0x274] ss:$8 sps:$4 sm:$0xff]  }
 0x123   :  { %v201_v56 = vpop.f32.mrb[4].mxu1 }
 0x124   :  { %v6301_v57 = vpop.f32.mrb[5].mxu1 }
 0x125   :  { %v204_v59 = vpop.f32.mrb[6].mxu1  ;;  %v6525_v57 = vld [vmem:[#allocation3] ss:$8 sps:$4 sm:$0xff]  }
 0x126   :  { %v208_v60 = vpack.c.bf16 %v204_v59, %v201_v56  ;;  %v6302_v61 = vpop.f32.mrb[7].mxu1  ;;  %v6522_v56 = vld [vmem:[%s7984_s2 + $0x270] ss:$8 sps:$4 sm:$0xff]   ;;  %v6530_v59 = vld [vmem:[#allocation3 + $0x14] ss:$8 sps:$4 sm:$0xff]  }
 0x127   :  { %v6534_v61 = vld [vmem:[#allocation3 + $0x20] ss:$8 sps:$4 sm:$0xff]  }
 0x128   :  { %209 = vst [vmem:[#allocation2 + $0x8] sm:$0xff] %v208_v60  ;;  %901 = vmatprep.mubr.bf16.mxu1 %v208_v60  ;;  %v6528_v60 = vld [vmem:[#allocation3 + $0x10] ss:$8 sps:$4 sm:$0xff]  }
 0x129   :  { %902 = vmatmul.mubr.bf16.vlgmr.msra.gmra.mrb[16].mxu1 %v154_v52  ;;  %v6521_v52 = vld [vmem:[%s7984_s2 + $0x264] ss:$8 sps:$4 sm:$0xff]  }
 0x12a   :  { %913 = vmatpush1.bf16.msra.mxu1 %v6453_v58  ;;  %v6527_v58 = vld [vmem:[#allocation3 + $0x4] ss:$8 sps:$4 sm:$0xff]  }
 0x12b   :  { %914 = vmatprep.subr.bf16.mxu1 %v6458_v62  ;;  %v255_v2 = vpop.f32.mrb[8].mxu1  ;;  %v6536_v62 = vld [vmem:[#allocation3 + $0x24] ss:$8 sps:$4 sm:$0xff]  }
 0x12c   :  { %v6309_v3 = vpop.f32.mrb[9].mxu1 }
 0x12d   :  { %v258_v4 = vpop.f32.mrb[10].mxu1  ;;  %v6546_v3 = vld [vmem:[#allocation3 + $0x40] ss:$8 sps:$4 sm:$0xff]  }
 0x12e   :  { %915 = vmatpush1.bf16.msra.mxu1 %v6456_v63  ;;  %v7671_v6 = vpack.c.bf16 %v258_v4, %v255_v2  ;;  %v6310_v7 = vpop.f32.mrb[11].mxu1  ;;  %v6542_v63 = vld [vmem:[#allocation3 + $0x34] ss:$8 sps:$4 sm:$0xff]   ;;  %v6548_v2 = vld [vmem:[#allocation3 + $0x44] ss:$8 sps:$4 sm:$0xff]  }
 0x12f   :  { %916 = vmatprep.subr.bf16.mxu1 %v6461_v1  ;;  %v6540_v1 = vld [vmem:[#allocation3 + $0x30] ss:$8 sps:$4 sm:$0xff]   ;;  %v6566_v7 = vld [vmem:[#allocation3 + $0x74] ss:$8 sps:$4 sm:$0xff]  }
 0x130   :  { %263 = vst [vmem:[#allocation2 + $0x10] sm:$0xff] %v7671_v6  ;;  %v6552_v4 = vld [vmem:[#allocation3 + $0x50] ss:$8 sps:$4 sm:$0xff]  }
 0x132   :  { %917 = vmatpush1.bf16.msra.mxu1 %v6459_v5  ;;  %v6560_v5 = vld [vmem:[#allocation3 + $0x64] ss:$8 sps:$4 sm:$0xff]  }
 0x133   :  { %918 = vmatprep.subr.bf16.mxu1 %v6464_v8  ;;  %v309_v11 = vpop.f32.mrb[12].mxu1  ;;  %v6564_v8 = vld [vmem:[#allocation3 + $0x70] ss:$8 sps:$4 sm:$0xff]  }
 0x134   :  { %v6317_v12 = vpop.f32.mrb[13].mxu1 }
 0x135   :  { %v312_v13 = vpop.f32.mrb[14].mxu1  ;;  %v6576_v12 = vld [vmem:[#allocation3 + $0x90] ss:$8 sps:$4 sm:$0xff]  }
 0x136   :  { %919 = vmatpush1.bf16.msra.mxu1 %v6462_v9  ;;  %v316_v15 = vpack.c.bf16 %v312_v13, %v309_v11  ;;  %v6318_v16 = vpop.f32.mrb[15].mxu1  ;;  %v6572_v9 = vld [vmem:[#allocation3 + $0x84] ss:$8 sps:$4 sm:$0xff]   ;;  %v6578_v11 = vld [vmem:[#allocation3 + $0x94] ss:$8 sps:$4 sm:$0xff]  }
 0x137   :  { %920 = vmatprep.subr.bf16.mxu1 %v6467_v10  ;;  %v6570_v10 = vld [vmem:[#allocation3 + $0x80] ss:$8 sps:$4 sm:$0xff]   ;;  %v6584_v13 = vld [vmem:[#allocation3 + $0xa4] ss:$8 sps:$4 sm:$0xff]   ;;  %v6588_v16 = vld [vmem:[#allocation3 + $0xb0] ss:$8 sps:$4 sm:$0xff]  }
 0x138   :  { %317 = vst [vmem:[#allocation2 + $0x18] sm:$0xff] %v316_v15  ;;  %944 = vmatprep.mubr.bf16.mxu1 %v316_v15  ;;  %v6590_v15 = vld [vmem:[#allocation3 + $0xb4] ss:$8 sps:$4 sm:$0xff]  }
 0x13a   :  { %921 = vmatpush1.bf16.msra.mxu1 %v6465_v14  ;;  %v6582_v14 = vld [vmem:[#allocation3 + $0xa0] ss:$8 sps:$4 sm:$0xff]  }
 0x13b   :  { %922 = vmatprep.subr.bf16.mxu1 %v6470_v17  ;;  %v6596_v17 = vld [vmem:[#allocation3 + $0xc4] ss:$8 sps:$4 sm:$0xff]  }
 0x13e   :  { %923 = vmatpush1.bf16.msra.mxu1 %v6468_v18  ;;  %v6594_v18 = vld [vmem:[#allocation3 + $0xc0] ss:$8 sps:$4 sm:$0xff]  }
 0x13f   :  { %924 = vmatprep.subr.bf16.mxu1 %v6473_v19  ;;  %v459_v19 = vlaneseq }
 0x142   :  { %925 = vmatpush1.bf16.msra.mxu1 %v6471_v20  ;;  %v460_v20 = vshrl.u32 %v459_v19, 7  ;;  %v6620_v19 = vld [vmem:[#allocation3 + $0x1f4] ss:$8 sps:$4 sm:$0xff]  }
 0x143   :  { %926 = vmatprep.subr.bf16.mxu1 %v6476_v21 }
 0x144   :  { %v7803_v21 = vsub.s32 0, %v460_v20 }
 0x146   :  { %927 = vmatpush1.bf16.msra.mxu1 %v6474_v22  ;;  %v457_v22 = vld [vmem:[%s7985_s3] sm:$0x3] }
 0x147   :  { %928 = vmatprep.subr.bf16.mxu1 %v6479_v23  ;;  %v7808_v23 = vsub.s32 1, %v460_v20  ;;  %v6618_v20 = vld [vmem:[#allocation3 + $0x1f0] ss:$8 sps:$4 sm:$0xff]  }
 0x14a   :  { %929 = vmatpush1.bf16.msra.mxu1 %v6477_v24  ;;  %v462_v24 = vrot.slane %v457_v22, %v7803_v21 }
 0x14b   :  { %930 = vmatprep.subr.bf16.mxu1 %v6482_v25  ;;  %v466_v25 = vrot.slane %v457_v22, %v7808_v23  ;;  %v6623_v22 = vld [vmem:[#allocation3 + $0x204] ss:$8 sps:$4 sm:$0xff]  }
 0x14e   :  { %931 = vmatpush1.bf16.msra.mxu1 %v6480_v26 }
 0x14f   :  { %932 = vmatprep.subr.bf16.mxu1 %v6485_v27 }
 0x152   :  { %933 = vmatpush1.bf16.msra.mxu1 %v6483_v28 }
 0x153   :  { %934 = vmatprep.subr.bf16.mxu1 %v6488_v29 }
 0x156   :  { %935 = vmatpush1.bf16.msra.mxu1 %v6486_v30 }
 0x157   :  { %936 = vmatprep.subr.bf16.mxu1 %v6491_v31 }
 0x15a   :  { %937 = vmatpush1.bf16.msra.mxu1 %v6489_v32 }
 0x15b   :  { %938 = vmatprep.subr.bf16.mxu1 %v6494_v33 }
 0x15e   :  { %939 = vmatpush1.bf16.msra.mxu1 %v6492_v34 }
 0x15f   :  { %940 = vmatprep.subr.bf16.mxu1 %v6497_v35 }
 0x162   :  { %941 = vmatpush1.bf16.msra.mxu1 %v6495_v36 }
 0x163   :  { %942 = vmatprep.subr.bf16.mxu1 %v6500_v37 }
 0x166   :  { %943 = vmatpush1.bf16.msra.mxu1 %v6498_v38 }
 0x167   :  { %955 = vmatprep.subr.bf16.mxu1 %v6503_v39 }
 0x169   :  { %945 = vmatmul.mubr.bf16.vlgmr.msra.gmra.mrb[16].mxu1 %v7671_v6  ;;  %v6558_v6 = vld [vmem:[#allocation3 + $0x60] ss:$8 sps:$4 sm:$0xff]  }
 0x16a   :  { %956 = vmatpush1.bf16.msra.mxu1 %v6501_v40  ;;  %987 = vmatprep.mubr.bf16.mxu1 %v7362_v45  ;;  %v1004_v40 = vld [vmem:[%s7986_s4] sm:$0xf] }
 0x16b   :  { %957 = vmatprep.subr.bf16.mxu1 %v6506_v41  ;;  %v5714_v41 = vld [vmem:[%s7986_s4 + $0x4] sm:$0xf] }
 0x16e   :  { %958 = vmatpush1.bf16.msra.mxu1 %v6504_v42  ;;  %v5716_v42 = vld [vmem:[%s7986_s4 + $0x8] sm:$0xf] }
 0x16f   :  { %959 = vmatprep.subr.bf16.mxu1 %v6509_v43  ;;  %v5718_v43 = vld [vmem:[%s7986_s4 + $0xc] sm:$0xf] }
 0x172   :  { %960 = vmatpush1.bf16.msra.mxu1 %v6507_v44  ;;  %v6533_v44 = vld [vmem:[#allocation3 + $0x104] ss:$8 sps:$4 sm:$0xff]  }
 0x173   :  { %961 = vmatprep.subr.bf16.mxu1 %v6512_v46  ;;  %v5720_v46 = vld [vmem:[%s7986_s4 + $0x10] sm:$0xf] }
 0x176   :  { %962 = vmatpush1.bf16.msra.mxu1 %v6510_v47  ;;  %v6531_v47 = vld [vmem:[#allocation3 + $0x100] ss:$8 sps:$4 sm:$0xff]  }
 0x177   :  { %963 = vmatprep.subr.bf16.mxu1 %v6515_v48  ;;  %v6539_v48 = vld [vmem:[#allocation3 + $0x114] ss:$8 sps:$4 sm:$0xff]  }
 0x17a   :  { %964 = vmatpush1.bf16.msra.mxu1 %v6513_v49  ;;  %v6537_v49 = vld [vmem:[#allocation3 + $0x110] ss:$8 sps:$4 sm:$0xff]  }
 0x17b   :  { %965 = vmatprep.subr.bf16.mxu1 %v6518_v50  ;;  %v6545_v50 = vld [vmem:[#allocation3 + $0x124] ss:$8 sps:$4 sm:$0xff]  }
 0x17e   :  { %966 = vmatpush1.bf16.msra.mxu1 %v6516_v51  ;;  %v6543_v51 = vld [vmem:[#allocation3 + $0x120] ss:$8 sps:$4 sm:$0xff]  }
 0x17f   :  { %967 = vmatprep.subr.bf16.mxu1 %v6521_v52  ;;  %v6551_v52 = vld [vmem:[#allocation3 + $0x134] ss:$8 sps:$4 sm:$0xff]  }
 0x182   :  { %968 = vmatpush1.bf16.msra.mxu1 %v6519_v53  ;;  %v6549_v53 = vld [vmem:[#allocation3 + $0x130] ss:$8 sps:$4 sm:$0xff]  }
 0x183   :  { %969 = vmatprep.subr.bf16.mxu1 %v6524_v55  ;;  %v6557_v55 = vld [vmem:[#allocation3 + $0x144] ss:$8 sps:$4 sm:$0xff]  }
 0x186   :  { %970 = vmatpush1.bf16.msra.mxu1 %v6522_v56  ;;  %v6555_v56 = vld [vmem:[#allocation3 + $0x140] ss:$8 sps:$4 sm:$0xff]  }
 0x187   :  { %2236 = vmatprep.subr.bf16.mxu1 %v6527_v58  ;;  %v6561_v58 = vld [vmem:[#allocation3 + $0x150] ss:$8 sps:$4 sm:$0xff]  }
 0x189   :  { %988 = vmatmul.mubr.bf16.vlgmr.msra.gmra.mrb[16].mxu1 %v7653_v54  ;;  %v6554_v54 = vld [vmem:[#allocation3 + $0x54] ss:$8 sps:$4 sm:$0xff]  }
 0x18a   :  { %2237 = vmatpush1.bf16.msra.mxu1 %v6525_v57  ;;  %v6563_v57 = vld [vmem:[#allocation3 + $0x154] ss:$8 sps:$4 sm:$0xff]  }
 0x18b   :  { %2238 = vmatprep.subr.bf16.mxu1 %v6530_v59  ;;  %v6569_v59 = vld [vmem:[#allocation3 + $0x164] ss:$8 sps:$4 sm:$0xff]  }
 0x18e   :  { %2239 = vmatpush1.bf16.msra.mxu1 %v6528_v60  ;;  %v6567_v60 = vld [vmem:[#allocation3 + $0x160] ss:$8 sps:$4 sm:$0xff]  }
 0x18f   :  { %2240 = vmatprep.subr.bf16.mxu1 %v6536_v62  ;;  %v6573_v62 = vld [vmem:[#allocation3 + $0x170] ss:$8 sps:$4 sm:$0xff]  }
 0x192   :  { %2241 = vmatpush1.bf16.msra.mxu1 %v6534_v61  ;;  %v6575_v61 = vld [vmem:[#allocation3 + $0x174] ss:$8 sps:$4 sm:$0xff]  }
 0x193   :  { %2242 = vmatprep.subr.bf16.mxu1 %v6542_v63  ;;  %v6581_v63 = vld [vmem:[#allocation3 + $0x184] ss:$8 sps:$4 sm:$0xff]  }
 0x196   :  { %2243 = vmatpush1.bf16.msra.mxu1 %v6540_v1  ;;  %v6579_v1 = vld [vmem:[#allocation3 + $0x180] ss:$8 sps:$4 sm:$0xff]  }
 0x197   :  { %2244 = vmatprep.subr.bf16.mxu1 %v6548_v2  ;;  %v6587_v2 = vld [vmem:[#allocation3 + $0x194] ss:$8 sps:$4 sm:$0xff]  }
 0x19a   :  { %2245 = vmatpush1.bf16.msra.mxu1 %v6546_v3  ;;  %v6585_v3 = vld [vmem:[#allocation3 + $0x190] ss:$8 sps:$4 sm:$0xff]  }
 0x19b   :  { %2246 = vmatprep.subr.bf16.mxu1 %v6554_v54  ;;  %v6593_v54 = vld [vmem:[#allocation3 + $0x1a4] ss:$8 sps:$4 sm:$0xff]  }
 0x19e   :  { %2247 = vmatpush1.bf16.msra.mxu1 %v6552_v4  ;;  %v6591_v4 = vld [vmem:[#allocation3 + $0x1a0] ss:$8 sps:$4 sm:$0xff]  }
 0x19f   :  { %2248 = vmatprep.subr.bf16.mxu1 %v6560_v5  ;;  %v6599_v5 = vld [vmem:[#allocation3 + $0x1b4] ss:$8 sps:$4 sm:$0xff]  }
 0x1a2   :  { %2249 = vmatpush1.bf16.msra.mxu1 %v6558_v6  ;;  %v6597_v6 = vld [vmem:[#allocation3 + $0x1b0] ss:$8 sps:$4 sm:$0xff]  }
 0x1a3   :  { %2250 = vmatprep.subr.bf16.mxu1 %v6566_v7  ;;  %v6602_v7 = vld [vmem:[#allocation3 + $0xd4] ss:$8 sps:$4 sm:$0xff]  }
 0x1a6   :  { %2251 = vmatpush1.bf16.msra.mxu1 %v6564_v8  ;;  %v6600_v8 = vld [vmem:[#allocation3 + $0xd0] ss:$8 sps:$4 sm:$0xff]  }
 0x1a7   :  { %2252 = vmatprep.subr.bf16.mxu1 %v6572_v9  ;;  %v6605_v9 = vld [vmem:[#allocation3 + $0x1c4] ss:$8 sps:$4 sm:$0xff]  }
 0x1aa   :  { %2253 = vmatpush1.bf16.msra.mxu1 %v6570_v10  ;;  %v6603_v10 = vld [vmem:[#allocation3 + $0x1c0] ss:$8 sps:$4 sm:$0xff]  }
 0x1ab   :  { %2254 = vmatprep.subr.bf16.mxu1 %v6578_v11  ;;  %v6606_v11 = vld [vmem:[#allocation3 + $0xe0] ss:$8 sps:$4 sm:$0xff]  }
 0x1ae   :  { %2255 = vmatpush1.bf16.msra.mxu1 %v6576_v12  ;;  %v6608_v12 = vld [vmem:[#allocation3 + $0xe4] ss:$8 sps:$4 sm:$0xff]  }
 0x1af   :  { %2256 = vmatprep.subr.bf16.mxu1 %v6584_v13  ;;  %v6611_v13 = vld [vmem:[#allocation3 + $0x1d4] ss:$8 sps:$4 sm:$0xff]  }
 0x1b2   :  { %2257 = vmatpush1.bf16.msra.mxu1 %v6582_v14  ;;  %v6609_v14 = vld [vmem:[#allocation3 + $0x1d0] ss:$8 sps:$4 sm:$0xff]  }
 0x1b3   :  { %2258 = vmatprep.subr.bf16.mxu1 %v6590_v15  ;;  %v6614_v15 = vld [vmem:[#allocation3 + $0xf4] ss:$8 sps:$4 sm:$0xff]  }
 0x1b6   :  { %2259 = vmatpush1.bf16.msra.mxu1 %v6588_v16  ;;  %v6612_v16 = vld [vmem:[#allocation3 + $0xf0] ss:$8 sps:$4 sm:$0xff]  }
 0x1b7   :  { %2260 = vmatprep.subr.bf16.mxu1 %v6596_v17  ;;  %v6617_v17 = vld [vmem:[#allocation3 + $0x1e4] ss:$8 sps:$4 sm:$0xff]  }
 0x1ba   :  { %2261 = vmatpush1.bf16.msra.mxu1 %v6594_v18  ;;  %v6615_v18 = vld [vmem:[#allocation3 + $0x1e0] ss:$8 sps:$4 sm:$0xff]  }
 0x1bb   :  { %2262 = vmatprep.subr.bf16.mxu1 %v6602_v7 }
 0x1be   :  { %2263 = vmatpush1.bf16.msra.mxu1 %v6600_v8 }
 0x1bf   :  { %2264 = vmatprep.subr.bf16.mxu1 %v6608_v12  ;;  %v6647_v12 = vld [vmem:[#allocation3 + $0x284] ss:$8 sps:$4 sm:$0xff]  }
 0x1c2   :  { %2265 = vmatpush1.bf16.msra.mxu1 %v6606_v11  ;;  %v6642_v11 = vld [vmem:[#allocation3 + $0x270] ss:$8 sps:$4 sm:$0xff]  }
 0x1c3   :  { %2266 = vmatprep.subr.bf16.mxu1 %v6614_v15  ;;  %v6648_v15 = vld [vmem:[#allocation3 + $0x290] ss:$8 sps:$4 sm:$0xff]  }
 0x1c6   :  { %2267 = vmatpush1.bf16.msra.mxu1 %v6612_v16  ;;  %v6653_v16 = vld [vmem:[#allocation3 + $0x2a4] ss:$8 sps:$4 sm:$0xff]  }
 0x25c   :  { %v989_v26 = vpop.f32.mrb[16].mxu1 }
 0x25d   :  { %v6327_v27 = vadd.f32 %v989_v26, %v462_v24  ;;  %v991_v28 = vpop.f32.mrb[17].mxu1 }
 0x25e   :  { %v6328_v29 = vadd.f32 %v991_v28, %v466_v25  ;;  %v993_v30 = vpop.f32.mrb[18].mxu1 }
 0x25f   :  { %v6329_v31 = vadd.f32 %v993_v30, %v462_v24  ;;  %v995_v32 = vpop.f32.mrb[19].mxu1  ;;  %v998_v34 = vmax.f32 %v6327_v27, 0.0 }
 0x260   :  { %v6330_v33 = vadd.f32 %v995_v32, %v466_v25  ;;  %v999_v36 = vmax.f32 %v6328_v29, 0.0 }
 0x261   :  { %v1000_v35 = vmax.f32 %v6329_v31, 0.0 }
 0x262   :  { %v1001_v37 = vmax.f32 %v6330_v33, 0.0 }
 0x263   :  { %v1002_v38 = vpack.c.bf16 %v1000_v35, %v998_v34 }
 0x264   :  { %v1003_v39 = vpack.c.bf16 %v1001_v37, %v999_v36 }
 0x266   :  { %1009 = vmatprep.subr.bf16.mxu0 %v1003_v39 }
 0x267   :  { %1010 = vmatpush1.bf16.msra.mxu0 %v1002_v38 }
 0x268   :  { %1059 = vmatprep.subr.bf16.mxu0 %v1003_v39 }
 0x26a   :  { %5713 = vmatmul.mubr.msk.bf16.vlgmr.msra.gmra.mrb[4].mxu0 %vm1005_vm2, %v1004_v40 }
 0x26b   :  { %1060 = vmatpush1.bf16.msra.mxu0 %v1002_v38  ;;  %1091 = vmatprep.mubr.bf16.mxu0 %v7362_v45 }
 0x26c   :  { %1109 = vmatprep.subr.bf16.mxu0 %v1003_v39 }
 0x272   :  { %5715 = vmatmul.mubr.msk.bf16.vlgmr.msra.gmra.mrb[8].mxu0 %vm1005_vm2, %v5714_v41  ;;  %v6621_v41 = vld [vmem:[#allocation3 + $0x200] ss:$8 sps:$4 sm:$0xff]  }
 0x273   :  { %1110 = vmatpush1.bf16.msra.mxu0 %v1002_v38  ;;  %1141 = vmatprep.mubr.bf16.mxu0 %v7362_v45 }
 0x274   :  { %1159 = vmatprep.subr.bf16.mxu0 %v1003_v39 }
 0x27a   :  { %5717 = vmatmul.mubr.msk.bf16.vlgmr.msra.gmra.mrb[12].mxu0 %vm1005_vm2, %v5716_v42 }
 0x27b   :  { %1160 = vmatpush1.bf16.msra.mxu0 %v1002_v38  ;;  %1191 = vmatprep.mubr.bf16.mxu0 %v7362_v45 }
 0x27c   :  { %1209 = vmatprep.subr.bf16.mxu0 %v1003_v39 }
 0x282   :  { %5719 = vmatmul.mubr.msk.bf16.vlgmr.msra.gmra.mrb[16].mxu0 %vm1005_vm2, %v5718_v43 }
 0x283   :  { %1210 = vmatpush1.bf16.msra.mxu0 %v1002_v38  ;;  %1241 = vmatprep.mubr.bf16.mxu0 %v7362_v45 }
 0x284   :  { %2277 = vmatprep.subr.bf16.mxu0 %v6533_v44 }
 0x28a   :  { %5721 = vmatmul.mubr.msk.bf16.vlgmr.msra.gmra.mrb[20].mxu0 %vm1005_vm2, %v5720_v46  ;;  %v6626_v46 = vld [vmem:[#allocation3 + $0x214] ss:$8 sps:$4 sm:$0xff]  }
 0x28b   :  { %2278 = vmatpush1.bf16.msra.mxu0 %v6531_v47 }
 0x28c   :  { %2279 = vmatprep.subr.bf16.mxu0 %v6539_v48 }
 0x28f   :  { %2280 = vmatpush1.bf16.msra.mxu0 %v6537_v49  ;;  %v6624_v49 = vld [vmem:[#allocation3 + $0x210] ss:$8 sps:$4 sm:$0xff]  }
 0x290   :  { %2281 = vmatprep.subr.bf16.mxu0 %v6545_v50  ;;  %v6629_v50 = vld [vmem:[#allocation3 + $0x224] ss:$8 sps:$4 sm:$0xff]  }
 0x293   :  { %2282 = vmatpush1.bf16.msra.mxu0 %v6543_v51 }
 0x294   :  { %2283 = vmatprep.subr.bf16.mxu0 %v6551_v52 }
 0x297   :  { %2284 = vmatpush1.bf16.msra.mxu0 %v6549_v53 }
 0x298   :  { %2285 = vmatprep.subr.bf16.mxu0 %v6557_v55  ;;  %v6627_v55 = vld [vmem:[#allocation3 + $0x220] ss:$8 sps:$4 sm:$0xff]  }
 0x29b   :  { %2286 = vmatpush1.bf16.msra.mxu0 %v6555_v56 }
 0x29c   :  { %2287 = vmatprep.subr.bf16.mxu0 %v6563_v57 }
 0x29f   :  { %2288 = vmatpush1.bf16.msra.mxu0 %v6561_v58  ;;  %v6632_v58 = vld [vmem:[#allocation3 + $0x234] ss:$8 sps:$4 sm:$0xff]  }
 0x2a0   :  { %2289 = vmatprep.subr.bf16.mxu0 %v6569_v59 }
 0x2a3   :  { %2290 = vmatpush1.bf16.msra.mxu0 %v6567_v60 }
 0x2a4   :  { %2291 = vmatprep.subr.bf16.mxu0 %v6575_v61  ;;  %v6630_v61 = vld [vmem:[#allocation3 + $0x230] ss:$8 sps:$4 sm:$0xff]  }
 0x2a7   :  { %2292 = vmatpush1.bf16.msra.mxu0 %v6573_v62  ;;  %v6635_v62 = vld [vmem:[#allocation3 + $0x244] ss:$8 sps:$4 sm:$0xff]  }
 0x2a8   :  { %2293 = vmatprep.subr.bf16.mxu0 %v6581_v63  ;;  %v6633_v63 = vld [vmem:[#allocation3 + $0x240] ss:$8 sps:$4 sm:$0xff]  }
 0x2ab   :  { %2294 = vmatpush1.bf16.msra.mxu0 %v6579_v1  ;;  %v6638_v1 = vld [vmem:[#allocation3 + $0x254] ss:$8 sps:$4 sm:$0xff]  }
 0x2ac   :  { %2295 = vmatprep.subr.bf16.mxu0 %v6587_v2 }
 0x2af   :  { %2296 = vmatpush1.bf16.msra.mxu0 %v6585_v3 }
 0x2b0   :  { %2297 = vmatprep.subr.bf16.mxu0 %v6593_v54  ;;  %v6636_v54 = vld [vmem:[#allocation3 + $0x250] ss:$8 sps:$4 sm:$0xff]  }
 0x2b3   :  { %2298 = vmatpush1.bf16.msra.mxu0 %v6591_v4 }
 0x2b4   :  { %2299 = vmatprep.subr.bf16.mxu0 %v6599_v5  ;;  %v6641_v5 = vld [vmem:[#allocation3 + $0x264] ss:$8 sps:$4 sm:$0xff]  }
 0x2b7   :  { %2300 = vmatpush1.bf16.msra.mxu0 %v6597_v6 }
 0x2b8   :  { %2301 = vmatprep.subr.bf16.mxu0 %v6605_v9  ;;  %v6639_v9 = vld [vmem:[#allocation3 + $0x260] ss:$8 sps:$4 sm:$0xff]  }
 0x2bb   :  { %2302 = vmatpush1.bf16.msra.mxu0 %v6603_v10  ;;  %v6644_v10 = vld [vmem:[#allocation3 + $0x274] ss:$8 sps:$4 sm:$0xff]  }
 0x2bc   :  { %2303 = vmatprep.subr.bf16.mxu0 %v6611_v13  ;;  %v6645_v13 = vld [vmem:[#allocation3 + $0x280] ss:$8 sps:$4 sm:$0xff]  }
 0x2bf   :  { %2304 = vmatpush1.bf16.msra.mxu0 %v6609_v14  ;;  %v6650_v14 = vld [vmem:[#allocation3 + $0x294] ss:$8 sps:$4 sm:$0xff]  }
 0x2c0   :  { %2305 = vmatprep.subr.bf16.mxu0 %v6617_v17  ;;  %v6651_v17 = vld [vmem:[#allocation3 + $0x2a0] ss:$8 sps:$4 sm:$0xff]  }
 0x2c3   :  { %2306 = vmatpush1.bf16.msra.mxu0 %v6615_v18  ;;  %v6656_v18 = vld [vmem:[#allocation3 + $0x2b4] ss:$8 sps:$4 sm:$0xff]  }
 0x2c4   :  { %2307 = vmatprep.subr.bf16.mxu0 %v6620_v19  ;;  %v6654_v19 = vld [vmem:[#allocation3 + $0x2b0] ss:$8 sps:$4 sm:$0xff]  }
 0x2c7   :  { %2308 = vmatpush1.bf16.msra.mxu0 %v6618_v20  ;;  %v6659_v20 = vld [vmem:[#allocation3 + $0x2c4] ss:$8 sps:$4 sm:$0xff]  }
 0x2c8   :  { %2318 = vmatprep.subr.bf16.mxu0 %v6623_v22  ;;  %v6657_v22 = vld [vmem:[#allocation3 + $0x2c0] ss:$8 sps:$4 sm:$0xff]  }
 0x33d   :  { %v1043_v24 = vpop.f32.mrb[4].mxu0 }
 0x33e   :  { %v1050_v25 = vpack.c.bf16 %v1043_v24, %v1043_v24  ;;  %v1045_v26 = vpop.f32.mrb[5].mxu0  ;;  %v6662_v24 = vld [vmem:[#allocation3 + $0x2d4] ss:$8 sps:$4 sm:$0xff]  }
 0x33f   :  { %v1051_v27 = vpack.c.bf16 %v1045_v26, %v1045_v26  ;;  %v1047_v28 = vpop.f32.mrb[6].mxu0  ;;  %v6665_v26 = vld [vmem:[#allocation3 + $0x2e4] ss:$8 sps:$4 sm:$0xff]  }
 0x340   :  { %1052 = vst [vmem:[#allocation2] sm:$0xf] %v1050_v25  ;;  %v1048_v29 = vpop.f32.mrb[7].mxu0  ;;  %v6660_v25 = vld [vmem:[#allocation3 + $0x2d0] ss:$8 sps:$4 sm:$0xff]  }
 0x341   :  { %1053 = vst [vmem:[#allocation2 + $0x8] sm:$0xf] %v1051_v27  ;;  %v6663_v27 = vld [vmem:[#allocation3 + $0x2e0] ss:$8 sps:$4 sm:$0xff]   ;;  %v6668_v28 = vld [vmem:[#allocation3 + $0x2f4] ss:$8 sps:$4 sm:$0xff]  }
 0x342   :  { %v6666_v29 = vld [vmem:[#allocation3 + $0x2f0] ss:$8 sps:$4 sm:$0xff]  }
 0x345   :  { %v1093_v30 = vpop.f32.mrb[8].mxu0 }
 0x346   :  { %v1100_v31 = vpack.c.bf16 %v1093_v30, %v1093_v30  ;;  %v1095_v32 = vpop.f32.mrb[9].mxu0  ;;  %v6671_v30 = vld [vmem:[#allocation3 + $0x304] ss:$8 sps:$4 sm:$0xff]  }
 0x347   :  { %v1101_v33 = vpack.c.bf16 %v1095_v32, %v1095_v32  ;;  %v1097_v34 = vpop.f32.mrb[10].mxu0  ;;  %v1254_v37 = vld [vmem:[#allocation2] sm:$0xf]  ;;  %v6669_v32 = vld [vmem:[#allocation3 + $0x300] ss:$8 sps:$4 sm:$0xff]  }
 0x348   :  { %1102 = vst [vmem:[#allocation2 + $0x10] sm:$0xf] %v1100_v31  ;;  %v1098_v35 = vpop.f32.mrb[11].mxu0  ;;  %v1255_v36 = vld [vmem:[#allocation2 + $0x8] sm:$0xf] }
 0x349   :  { %1103 = vst [vmem:[#allocation2 + $0x18] sm:$0xf] %v1101_v33  ;;  %2268 = vmatprep.mubr.bf16.mxu1 %v1255_v36  ;;  %v6674_v33 = vld [vmem:[#allocation3 + $0x314] ss:$8 sps:$4 sm:$0xff]   ;;  %v6672_v35 = vld [vmem:[#allocation3 + $0x310] ss:$8 sps:$4 sm:$0xff]  }
 0x34a   :  { %2269 = vmatmul.mubr.bf16.vlgmr.msra.gmra.mrb[20].mxu1 %v1254_v37  ;;  %v6677_v36 = vld [vmem:[#allocation3 + $0x324] ss:$8 sps:$4 sm:$0xff]   ;;  %v6675_v37 = vld [vmem:[#allocation3 + $0x320] ss:$8 sps:$4 sm:$0xff]  }
 0x34b   :  { %2489 = vmatprep.mubr.bf16.mxu1 %v7362_v45 }
 0x34d   :  { %v1143_v38 = vpop.f32.mrb[12].mxu0 }
 0x34e   :  { %v1150_v39 = vpack.c.bf16 %v1143_v38, %v1143_v38  ;;  %v1145_v40 = vpop.f32.mrb[13].mxu0  ;;  %v6680_v38 = vld [vmem:[#allocation3 + $0x334] ss:$8 sps:$4 sm:$0xff]  }
 0x34f   :  { %v1151_v42 = vpack.c.bf16 %v1145_v40, %v1145_v40  ;;  %v1147_v43 = vpop.f32.mrb[14].mxu0  ;;  %v1256_v48 = vld [vmem:[#allocation2 + $0x10] sm:$0xf]  ;;  %v6683_v40 = vld [vmem:[#allocation3 + $0x344] ss:$8 sps:$4 sm:$0xff]  }
 0x350   :  { %v1257_v44 = vld [vmem:[#allocation2 + $0x18] sm:$0xf]  ;;  %1152 = vst [vmem:[#allocation2 + $0x20] sm:$0xf] %v1150_v39  ;;  %v1148_v47 = vpop.f32.mrb[15].mxu0 }
 0x351   :  { %2309 = vmatprep.mubr.bf16.mxu0 %v1257_v44  ;;  %1153 = vst [vmem:[#allocation2 + $0x28] sm:$0xf] %v1151_v42  ;;  %v6678_v39 = vld [vmem:[#allocation3 + $0x330] ss:$8 sps:$4 sm:$0xff]   ;;  %v6686_v42 = vld [vmem:[#allocation3 + $0x354] ss:$8 sps:$4 sm:$0xff]  }
 0x352   :  { %2310 = vmatmul.mubr.bf16.vlgmr.msra.gmra.mrb[24].mxu0 %v1256_v48  ;;  %v6684_v43 = vld [vmem:[#allocation3 + $0x350] ss:$8 sps:$4 sm:$0xff]   ;;  %v6689_v44 = vld [vmem:[#allocation3 + $0x364] ss:$8 sps:$4 sm:$0xff]   ;;  %v6692_v47 = vld [vmem:[#allocation3 + $0x374] ss:$8 sps:$4 sm:$0xff]  }
 0x353   :  { %2319 = vmatpush1.bf16.msra.mxu0 %v6621_v41  ;;  %v6681_v41 = vld [vmem:[#allocation3 + $0x340] ss:$8 sps:$4 sm:$0xff]   ;;  %v6690_v48 = vld [vmem:[#allocation3 + $0x370] ss:$8 sps:$4 sm:$0xff]  }
 0x354   :  { %2320 = vmatprep.subr.bf16.mxu0 %v6626_v46  ;;  %v6687_v46 = vld [vmem:[#allocation3 + $0x360] ss:$8 sps:$4 sm:$0xff]  }
 0x355   :  { %v1193_v51 = vpop.f32.mrb[16].mxu0 }
 0x356   :  { %v1200_v52 = vpack.c.bf16 %v1193_v51, %v1193_v51  ;;  %v1195_v53 = vpop.f32.mrb[17].mxu0  ;;  %v6698_v51 = vld [vmem:[#allocation3 + $0x394] ss:$8 sps:$4 sm:$0xff]  }
 0x357   :  { %2321 = vmatpush1.bf16.msra.mxu0 %v6624_v49  ;;  %v1201_v56 = vpack.c.bf16 %v1195_v53, %v1195_v53  ;;  %v1197_v57 = vpop.f32.mrb[18].mxu0  ;;  %v1258_v31 = vld [vmem:[#allocation2 + $0x20] sm:$0xf]  ;;  %v6695_v49 = vld [vmem:[#allocation3 + $0x384] ss:$8 sps:$4 sm:$0xff]  }
 0x358   :  { %2322 = vmatprep.subr.bf16.mxu0 %v6629_v50  ;;  %v1259_v59 = vld [vmem:[#allocation2 + $0x28] sm:$0xf]  ;;  %1202 = vst [vmem:[#allocation2 + $0x30] sm:$0xf] %v1200_v52  ;;  %v1198_v60 = vpop.f32.mrb[19].mxu0 }
 0x359   :  { %2350 = vmatprep.mubr.bf16.mxu0 %v1259_v59  ;;  %1203 = vst [vmem:[#allocation2 + $0x38] sm:$0xf] %v1201_v56  ;;  %v6693_v50 = vld [vmem:[#allocation3 + $0x380] ss:$8 sps:$4 sm:$0xff]   ;;  %v6696_v52 = vld [vmem:[#allocation3 + $0x390] ss:$8 sps:$4 sm:$0xff]  }
 0x35a   :  { %v6701_v53 = vld [vmem:[#allocation3 + $0x3a4] ss:$8 sps:$4 sm:$0xff]   ;;  %v6704_v56 = vld [vmem:[#allocation3 + $0x3b4] ss:$8 sps:$4 sm:$0xff]   ;;  %v6702_v57 = vld [vmem:[#allocation3 + $0x3b0] ss:$8 sps:$4 sm:$0xff]  }
 0x35b   :  { %2323 = vmatpush1.bf16.msra.mxu0 %v6627_v55  ;;  %v6699_v55 = vld [vmem:[#allocation3 + $0x3a0] ss:$8 sps:$4 sm:$0xff]   ;;  %v6710_v60 = vld [vmem:[#allocation3 + $0x3d4] ss:$8 sps:$4 sm:$0xff]  }
 0x35c   :  { %2324 = vmatprep.subr.bf16.mxu0 %v6632_v58  ;;  %v6707_v58 = vld [vmem:[#allocation3 + $0x3c4] ss:$8 sps:$4 sm:$0xff]   ;;  %v6705_v59 = vld [vmem:[#allocation3 + $0x3c0] ss:$8 sps:$4 sm:$0xff]  }
 0x35d   :  { %v1243_v2 = vpop.f32.mrb[20].mxu0 }
 0x35e   :  { %v1250_v3 = vpack.c.bf16 %v1243_v2, %v1243_v2  ;;  %v1245_v4 = vpop.f32.mrb[21].mxu0  ;;  %v6714_v2 = vld [vmem:[#allocation3 + $0x3f0] ss:$8 sps:$4 sm:$0xff]  }
 0x35f   :  { %2325 = vmatpush1.bf16.msra.mxu0 %v6630_v61  ;;  %v1251_v6 = vpack.c.bf16 %v1245_v4, %v1245_v4  ;;  %v1247_v7 = vpop.f32.mrb[22].mxu0  ;;  %v6708_v61 = vld [vmem:[#allocation3 + $0x3d0] ss:$8 sps:$4 sm:$0xff]   ;;  %v6717_v4 = vld [vmem:[#allocation3 + $0x400] ss:$8 sps:$4 sm:$0xff]  }
 0x360   :  { %2326 = vmatprep.subr.bf16.mxu0 %v6635_v62  ;;  %1252 = vst [vmem:[#allocation2 + $0x40] sm:$0xf] %v1250_v3  ;;  %v1248_v8 = vpop.f32.mrb[23].mxu0  ;;  %v1261_v34 = vld [vmem:[#allocation2 + $0x38] sm:$0xf] }
 0x361   :  { %1253 = vst [vmem:[#allocation2 + $0x48] sm:$0xf] %v1251_v6  ;;  %v6713_v62 = vld [vmem:[#allocation3 + $0x3e4] ss:$8 sps:$4 sm:$0xff]   ;;  %v6720_v7 = vld [vmem:[#allocation3 + $0x410] ss:$8 sps:$4 sm:$0xff]  }
 0x362   :  { %v6719_v3 = vld [vmem:[#allocation3 + $0x404] ss:$8 sps:$4 sm:$0xff]  }
 0x363   :  { %2327 = vmatpush1.bf16.msra.mxu0 %v6633_v63  ;;  %v6711_v63 = vld [vmem:[#allocation3 + $0x3e0] ss:$8 sps:$4 sm:$0xff]   ;;  %v6725_v8 = vld [vmem:[#allocation3 + $0x424] ss:$8 sps:$4 sm:$0xff]  }
 0x364   :  { %2328 = vmatprep.subr.bf16.mxu0 %v6638_v1  ;;  %v6716_v1 = vld [vmem:[#allocation3 + $0x3f4] ss:$8 sps:$4 sm:$0xff]  }
 0x367   :  { %2329 = vmatpush1.bf16.msra.mxu0 %v6636_v54  ;;  %v1260_v54 = vld [vmem:[#allocation2 + $0x30] sm:$0xf] }
 0x368   :  { %2330 = vmatprep.subr.bf16.mxu0 %v6641_v5  ;;  %v6722_v5 = vld [vmem:[#allocation3 + $0x414] ss:$8 sps:$4 sm:$0xff]   ;;  %v1263_v6 = vld [vmem:[#allocation2 + $0x48] sm:$0xf] }
 0x36b   :  { %2331 = vmatpush1.bf16.msra.mxu0 %v6639_v9  ;;  %v6723_v9 = vld [vmem:[#allocation3 + $0x420] ss:$8 sps:$4 sm:$0xff]  }
 0x36c   :  { %2332 = vmatprep.subr.bf16.mxu0 %v6644_v10  ;;  %v6728_v10 = vld [vmem:[#allocation3 + $0x434] ss:$8 sps:$4 sm:$0xff]  }
 0x36f   :  { %2333 = vmatpush1.bf16.msra.mxu0 %v6642_v11  ;;  %v6726_v11 = vld [vmem:[#allocation3 + $0x430] ss:$8 sps:$4 sm:$0xff]  }
 0x370   :  { %2334 = vmatprep.subr.bf16.mxu0 %v6647_v12  ;;  %v6731_v12 = vld [vmem:[#allocation3 + $0x444] ss:$8 sps:$4 sm:$0xff]  }
 0x373   :  { %2335 = vmatpush1.bf16.msra.mxu0 %v6645_v13  ;;  %v6729_v13 = vld [vmem:[#allocation3 + $0x440] ss:$8 sps:$4 sm:$0xff]  }
 0x374   :  { %2336 = vmatprep.subr.bf16.mxu0 %v6650_v14  ;;  %v6734_v14 = vld [vmem:[#allocation3 + $0x454] ss:$8 sps:$4 sm:$0xff]  }
 0x377   :  { %2337 = vmatpush1.bf16.msra.mxu0 %v6648_v15  ;;  %v6732_v15 = vld [vmem:[#allocation3 + $0x450] ss:$8 sps:$4 sm:$0xff]  }
 0x378   :  { %2338 = vmatprep.subr.bf16.mxu0 %v6653_v16  ;;  %v6737_v16 = vld [vmem:[#allocation3 + $0x464] ss:$8 sps:$4 sm:$0xff]  }
 0x37b   :  { %2339 = vmatpush1.bf16.msra.mxu0 %v6651_v17  ;;  %v6735_v17 = vld [vmem:[#allocation3 + $0x460] ss:$8 sps:$4 sm:$0xff]  }
 0x37c   :  { %2340 = vmatprep.subr.bf16.mxu0 %v6656_v18  ;;  %v6740_v18 = vld [vmem:[#allocation3 + $0x474] ss:$8 sps:$4 sm:$0xff]  }
 0x37f   :  { %2341 = vmatpush1.bf16.msra.mxu0 %v6654_v19  ;;  %v6738_v19 = vld [vmem:[#allocation3 + $0x470] ss:$8 sps:$4 sm:$0xff]  }
 0x380   :  { %2342 = vmatprep.subr.bf16.mxu0 %v6659_v20  ;;  %v6743_v20 = vld [vmem:[#allocation3 + $0x484] ss:$8 sps:$4 sm:$0xff]  }
 0x383   :  { %2343 = vmatpush1.bf16.msra.mxu0 %v6657_v22  ;;  %v6741_v22 = vld [vmem:[#allocation3 + $0x480] ss:$8 sps:$4 sm:$0xff]  }
 0x384   :  { %2344 = vmatprep.subr.bf16.mxu0 %v6662_v24  ;;  %v6746_v24 = vld [vmem:[#allocation3 + $0x494] ss:$8 sps:$4 sm:$0xff]  }
 0x387   :  { %2345 = vmatpush1.bf16.msra.mxu0 %v6660_v25  ;;  %v6744_v25 = vld [vmem:[#allocation3 + $0x490] ss:$8 sps:$4 sm:$0xff]  }
 0x388   :  { %2346 = vmatprep.subr.bf16.mxu0 %v6665_v26  ;;  %v6749_v26 = vld [vmem:[#allocation3 + $0x4a4] ss:$8 sps:$4 sm:$0xff]  }
 0x38b   :  { %2347 = vmatpush1.bf16.msra.mxu0 %v6663_v27  ;;  %v6747_v27 = vld [vmem:[#allocation3 + $0x4a0] ss:$8 sps:$4 sm:$0xff]  }
 0x38c   :  { %2348 = vmatprep.subr.bf16.mxu0 %v6668_v28  ;;  %v6752_v28 = vld [vmem:[#allocation3 + $0x4b4] ss:$8 sps:$4 sm:$0xff]  }
 0x38f   :  { %2349 = vmatpush1.bf16.msra.mxu0 %v6666_v29  ;;  %v6750_v29 = vld [vmem:[#allocation3 + $0x4b0] ss:$8 sps:$4 sm:$0xff]  }
 0x390   :  { %2359 = vmatprep.subr.bf16.mxu0 %v6671_v30  ;;  %v6755_v30 = vld [vmem:[#allocation3 + $0x4c4] ss:$8 sps:$4 sm:$0xff]  }
 0x392   :  { %2351 = vmatmul.mubr.bf16.vlgmr.msra.gmra.mrb[24].mxu0 %v1258_v31  ;;  %v6753_v31 = vld [vmem:[#allocation3 + $0x4c0] ss:$8 sps:$4 sm:$0xff]  }
 0x393   :  { %2360 = vmatpush1.bf16.msra.mxu0 %v6669_v32  ;;  %2391 = vmatprep.mubr.bf16.mxu0 %v1261_v34  ;;  %v6758_v32 = vld [vmem:[#allocation3 + $0x4d4] ss:$8 sps:$4 sm:$0xff]   ;;  %v6761_v34 = vld [vmem:[#allocation3 + $0x4e4] ss:$8 sps:$4 sm:$0xff]  }
 0x394   :  { %2361 = vmatprep.subr.bf16.mxu0 %v6674_v33  ;;  %v6756_v33 = vld [vmem:[#allocation3 + $0x4d0] ss:$8 sps:$4 sm:$0xff]  }
 0x397   :  { %2362 = vmatpush1.bf16.msra.mxu0 %v6672_v35  ;;  %v6759_v35 = vld [vmem:[#allocation3 + $0x4e0] ss:$8 sps:$4 sm:$0xff]  }
 0x398   :  { %2363 = vmatprep.subr.bf16.mxu0 %v6677_v36  ;;  %v6764_v36 = vld [vmem:[#allocation3 + $0x4f4] ss:$8 sps:$4 sm:$0xff]  }
 0x39b   :  { %2364 = vmatpush1.bf16.msra.mxu0 %v6675_v37  ;;  %v6762_v37 = vld [vmem:[#allocation3 + $0x4f0] ss:$8 sps:$4 sm:$0xff]  }
 0x39c   :  { %2365 = vmatprep.subr.bf16.mxu0 %v6680_v38  ;;  %v1262_v38 = vld [vmem:[#allocation2 + $0x40] sm:$0xf] }
 0x39f   :  { %2366 = vmatpush1.bf16.msra.mxu0 %v6678_v39 }
 0x3a0   :  { %2367 = vmatprep.subr.bf16.mxu0 %v6683_v40 }
 0x3a3   :  { %2368 = vmatpush1.bf16.msra.mxu0 %v6681_v41 }
 0x3a4   :  { %2369 = vmatprep.subr.bf16.mxu0 %v6686_v42 }
 0x3a7   :  { %2370 = vmatpush1.bf16.msra.mxu0 %v6684_v43  ;;  %v1424_v43 = vld [vmem:[%s7988_s6] sm:$0x3] }
 0x3a8   :  { %2371 = vmatprep.subr.bf16.mxu0 %v6689_v44  ;;  %v1429_v44 = vrot.slane %v1424_v43, %v7803_v21 }
 0x3ab   :  { %2372 = vmatpush1.bf16.msra.mxu0 %v6687_v46  ;;  %v1433_v46 = vrot.slane %v1424_v43, %v7808_v23 }
 0x3ac   :  { %2373 = vmatprep.subr.bf16.mxu0 %v6692_v47 }
 0x3af   :  { %2374 = vmatpush1.bf16.msra.mxu0 %v6690_v48 }
 0x3b0   :  { %2375 = vmatprep.subr.bf16.mxu0 %v6695_v49 }
 0x3b3   :  { %2376 = vmatpush1.bf16.msra.mxu0 %v6693_v50 }
 0x3b4   :  { %2377 = vmatprep.subr.bf16.mxu0 %v6698_v51 }
 0x3b7   :  { %2378 = vmatpush1.bf16.msra.mxu0 %v6696_v52 }
 0x3b8   :  { %2379 = vmatprep.subr.bf16.mxu0 %v6701_v53 }
 0x3bb   :  { %2380 = vmatpush1.bf16.msra.mxu0 %v6699_v55 }
 0x3bc   :  { %2381 = vmatprep.subr.bf16.mxu0 %v6704_v56 }
 0x3bf   :  { %2382 = vmatpush1.bf16.msra.mxu0 %v6702_v57 }
 0x3c0   :  { %2383 = vmatprep.subr.bf16.mxu0 %v6707_v58 }
 0x3c3   :  { %2384 = vmatpush1.bf16.msra.mxu0 %v6705_v59 }
 0x3c4   :  { %2385 = vmatprep.subr.bf16.mxu0 %v6710_v60 }
 0x3c7   :  { %2386 = vmatpush1.bf16.msra.mxu0 %v6708_v61  ;;  %v2445_v61 = vld [vmem:[%s7989_s7] sm:$0x3] }
 0x3c8   :  { %2387 = vmatprep.subr.bf16.mxu0 %v6713_v62  ;;  %v5884_v62 = vld [vmem:[%s7989_s7 + $0x2] sm:$0x3] }
 0x3cb   :  { %2388 = vmatpush1.bf16.msra.mxu0 %v6711_v63  ;;  %v5887_v63 = vld [vmem:[%s7989_s7 + $0x4] sm:$0x3] }
 0x3cc   :  { %2389 = vmatprep.subr.bf16.mxu0 %v6716_v1  ;;  %v5890_v1 = vld [vmem:[%s7989_s7 + $0x6] sm:$0x3] }
 0x3cf   :  { %2390 = vmatpush1.bf16.msra.mxu0 %v6714_v2  ;;  %v6767_v2 = vld [vmem:[#allocation6 + $0x4] ss:$8 sps:$4 sm:$0xff]  }
 0x3d0   :  { %2400 = vmatprep.subr.bf16.mxu0 %v6719_v3  ;;  %v5893_v3 = vld [vmem:[%s7989_s7 + $0x8] sm:$0x3] }
 0x3d2   :  { %2392 = vmatmul.mubr.bf16.vlgmr.msra.gmra.mrb[24].mxu0 %v1260_v54  ;;  %v6765_v54 = vld [vmem:[#allocation6] ss:$8 sps:$4 sm:$0xff]  }
 0x3d3   :  { %2401 = vmatpush1.bf16.msra.mxu0 %v6717_v4  ;;  %2432 = vmatprep.mubr.bf16.mxu0 %v1263_v6  ;;  %v6770_v4 = vld [vmem:[#allocation6 + $0x14] ss:$8 sps:$4 sm:$0xff]   ;;  %v6773_v6 = vld [vmem:[#allocation6 + $0x24] ss:$8 sps:$4 sm:$0xff]  }
 0x3d4   :  { %2402 = vmatprep.subr.bf16.mxu0 %v6722_v5  ;;  %v6768_v5 = vld [vmem:[#allocation6 + $0x10] ss:$8 sps:$4 sm:$0xff]  }
 0x3d7   :  { %2403 = vmatpush1.bf16.msra.mxu0 %v6720_v7  ;;  %v6771_v7 = vld [vmem:[#allocation6 + $0x20] ss:$8 sps:$4 sm:$0xff]  }
 0x3d8   :  { %2404 = vmatprep.subr.bf16.mxu0 %v6725_v8  ;;  %v6776_v8 = vld [vmem:[#allocation6 + $0x34] ss:$8 sps:$4 sm:$0xff]  }
 0x3db   :  { %2405 = vmatpush1.bf16.msra.mxu0 %v6723_v9  ;;  %v6774_v9 = vld [vmem:[#allocation6 + $0x30] ss:$8 sps:$4 sm:$0xff]  }
 0x3dc   :  { %2406 = vmatprep.subr.bf16.mxu0 %v6728_v10  ;;  %v6779_v10 = vld [vmem:[#allocation6 + $0x44] ss:$8 sps:$4 sm:$0xff]  }
 0x3df   :  { %2407 = vmatpush1.bf16.msra.mxu0 %v6726_v11  ;;  %v6777_v11 = vld [vmem:[#allocation6 + $0x40] ss:$8 sps:$4 sm:$0xff]  }
 0x3e0   :  { %2408 = vmatprep.subr.bf16.mxu0 %v6731_v12  ;;  %v6782_v12 = vld [vmem:[#allocation6 + $0x54] ss:$8 sps:$4 sm:$0xff]  }
 0x3e3   :  { %2409 = vmatpush1.bf16.msra.mxu0 %v6729_v13  ;;  %v6780_v13 = vld [vmem:[#allocation6 + $0x50] ss:$8 sps:$4 sm:$0xff]  }
 0x3e4   :  { %2410 = vmatprep.subr.bf16.mxu0 %v6734_v14  ;;  %v6785_v14 = vld [vmem:[#allocation6 + $0x64] ss:$8 sps:$4 sm:$0xff]  }
 0x3e7   :  { %2411 = vmatpush1.bf16.msra.mxu0 %v6732_v15  ;;  %v6783_v15 = vld [vmem:[#allocation6 + $0x60] ss:$8 sps:$4 sm:$0xff]  }
 0x3e8   :  { %2412 = vmatprep.subr.bf16.mxu0 %v6737_v16  ;;  %v6788_v16 = vld [vmem:[#allocation6 + $0x74] ss:$8 sps:$4 sm:$0xff]  }
 0x3eb   :  { %2413 = vmatpush1.bf16.msra.mxu0 %v6735_v17  ;;  %v6786_v17 = vld [vmem:[#allocation6 + $0x70] ss:$8 sps:$4 sm:$0xff]  }
 0x3ec   :  { %2414 = vmatprep.subr.bf16.mxu0 %v6740_v18  ;;  %v6791_v18 = vld [vmem:[#allocation6 + $0x84] ss:$8 sps:$4 sm:$0xff]  }
 0x3ef   :  { %2415 = vmatpush1.bf16.msra.mxu0 %v6738_v19  ;;  %v6789_v19 = vld [vmem:[#allocation6 + $0x80] ss:$8 sps:$4 sm:$0xff]  }
 0x3f0   :  { %2416 = vmatprep.subr.bf16.mxu0 %v6743_v20  ;;  %v6794_v20 = vld [vmem:[#allocation6 + $0x94] ss:$8 sps:$4 sm:$0xff]  }
 0x3f3   :  { %2417 = vmatpush1.bf16.msra.mxu0 %v6741_v22  ;;  %v6792_v22 = vld [vmem:[#allocation6 + $0x90] ss:$8 sps:$4 sm:$0xff]  }
 0x3f4   :  { %2418 = vmatprep.subr.bf16.mxu0 %v6746_v24  ;;  %v6797_v24 = vld [vmem:[#allocation6 + $0xa4] ss:$8 sps:$4 sm:$0xff]  }
 0x3f7   :  { %2419 = vmatpush1.bf16.msra.mxu0 %v6744_v25  ;;  %v6795_v25 = vld [vmem:[#allocation6 + $0xa0] ss:$8 sps:$4 sm:$0xff]  }
 0x3f8   :  { %2420 = vmatprep.subr.bf16.mxu0 %v6749_v26  ;;  %v6800_v26 = vld [vmem:[#allocation6 + $0xb4] ss:$8 sps:$4 sm:$0xff]  }
 0x3fb   :  { %2421 = vmatpush1.bf16.msra.mxu0 %v6747_v27  ;;  %v6798_v27 = vld [vmem:[#allocation6 + $0xb0] ss:$8 sps:$4 sm:$0xff]  }
 0x3fc   :  { %2422 = vmatprep.subr.bf16.mxu0 %v6752_v28  ;;  %v6803_v28 = vld [vmem:[#allocation6 + $0xc4] ss:$8 sps:$4 sm:$0xff]  }
 0x3ff   :  { %2423 = vmatpush1.bf16.msra.mxu0 %v6750_v29  ;;  %v6801_v29 = vld [vmem:[#allocation6 + $0xc0] ss:$8 sps:$4 sm:$0xff]  }
 0x400   :  { %2424 = vmatprep.subr.bf16.mxu0 %v6755_v30  ;;  %v6806_v30 = vld [vmem:[#allocation6 + $0xd4] ss:$8 sps:$4 sm:$0xff]  }
 0x403   :  { %2425 = vmatpush1.bf16.msra.mxu0 %v6753_v31  ;;  %v6804_v31 = vld [vmem:[#allocation6 + $0xd0] ss:$8 sps:$4 sm:$0xff]  }
 0x404   :  { %2426 = vmatprep.subr.bf16.mxu0 %v6758_v32  ;;  %v6809_v32 = vld [vmem:[#allocation6 + $0xe4] ss:$8 sps:$4 sm:$0xff]  }
 0x407   :  { %2427 = vmatpush1.bf16.msra.mxu0 %v6756_v33  ;;  %v6807_v33 = vld [vmem:[#allocation6 + $0xe0] ss:$8 sps:$4 sm:$0xff]  }
 0x408   :  { %2428 = vmatprep.subr.bf16.mxu0 %v6761_v34  ;;  %v6812_v34 = vld [vmem:[#allocation6 + $0xf4] ss:$8 sps:$4 sm:$0xff]  }
 0x40b   :  { %2429 = vmatpush1.bf16.msra.mxu0 %v6759_v35  ;;  %v6810_v35 = vld [vmem:[#allocation6 + $0xf0] ss:$8 sps:$4 sm:$0xff]  }
 0x40c   :  { %2430 = vmatprep.subr.bf16.mxu0 %v6764_v36  ;;  %v6815_v36 = vld [vmem:[#allocation6 + $0x104] ss:$8 sps:$4 sm:$0xff]  }
 0x40f   :  { %2431 = vmatpush1.bf16.msra.mxu0 %v6762_v37 }
 0x412   :  { %2433 = vmatmul.mubr.bf16.vlgmr.msra.gmra.mrb[24].mxu0 %v1262_v38 }
 0x413   :  { %3937 = vmatprep.mubr.bf16.mxu0 %v7362_v45 }
 0x41d   :  { %v2270_v39 = vpop.f32.mrb[20].mxu1 }
 0x41e   :  { %v2272_v40 = vpop.f32.mrb[21].mxu1  ;;  %v2271_v47 = vadd.f32 %v2270_v39, %v1429_v44 }
 0x41f   :  { %v2274_v41 = vpop.f32.mrb[22].mxu1  ;;  %v2273_v48 = vadd.f32 %v2272_v40, %v1433_v46 }
 0x420   :  { %v2275_v42 = vpop.f32.mrb[23].mxu1 }
 0x4e5   :  { %v2434_v49 = vpop.f32.mrb[24].mxu0 }
 0x4e6   :  { %v6332_v50 = vadd.f32 %v2434_v49, %v2271_v47  ;;  %v2436_v51 = vpop.f32.mrb[25].mxu0  ;;  %v6813_v47 = vld [vmem:[#allocation6 + $0x100] ss:$8 sps:$4 sm:$0xff]  }
 0x4e7   :  { %v6334_v52 = vadd.f32 %v2436_v51, %v2273_v48  ;;  %v2438_v53 = vpop.f32.mrb[26].mxu0  ;;  %v6818_v51 = vld [vmem:[#allocation6 + $0x114] ss:$8 sps:$4 sm:$0xff]  }
 0x4e8   :  { %v2441_v55 = vmax.f32 %v6332_v50, 0.0  ;;  %v2439_v56 = vpop.f32.mrb[27].mxu0 }
 0x4e9   :  { %v2442_v57 = vmax.f32 %v6334_v52, 0.0  ;;  %v6821_v56 = vld [vmem:[#allocation6 + $0x124] ss:$8 sps:$4 sm:$0xff]  }
 0x4ea   :  { %v2443_v58 = vpack.c.bf16 %v2441_v55, %v2441_v55  ;;  %v6816_v55 = vld [vmem:[#allocation6 + $0x110] ss:$8 sps:$4 sm:$0xff]  }
 0x4eb   :  { %v2444_v59 = vpack.c.bf16 %v2442_v57, %v2442_v57 }
 0x4ec   :  { %v2452_v60 = vsel %vm2450_vm3, %v2443_v58, 0 }
 0x4ed   :  { %5882 = vmatprep.subr.msk.bf16.mxu1 %vm2450_vm3, %v2444_v59 }
 0x4ee   :  { %2458 = vmatpush1.bf16.msra.mxu1 %v2452_v60 }
 0x4ef   :  { %5885 = vmatprep.subr.msk.bf16.mxu1 %vm2450_vm3, %v2444_v59 }
 0x4f1   :  { %5883 = vmatmul.mubr.msk.bf16.vlgmr.msra.gmra.mrb[24].mxu1 %vm2446_vm4, %v2445_v61 }
 0x4f2   :  { %2508 = vmatpush1.bf16.msra.mxu1 %v2452_v60  ;;  %2539 = vmatprep.mubr.bf16.mxu1 %v7362_v45 }
 0x4f3   :  { %5888 = vmatprep.subr.msk.bf16.mxu1 %vm2450_vm3, %v2444_v59 }
 0x4f9   :  { %5886 = vmatmul.mubr.msk.bf16.vlgmr.msra.gmra.mrb[28].mxu1 %vm2446_vm4, %v5884_v62 }
 0x4fa   :  { %2558 = vmatpush1.bf16.msra.mxu1 %v2452_v60  ;;  %2589 = vmatprep.mubr.bf16.mxu1 %v7362_v45 }
 0x4fb   :  { %5891 = vmatprep.subr.msk.bf16.mxu1 %vm2450_vm3, %v2444_v59 }
 0x501   :  { %5889 = vmatmul.mubr.msk.bf16.vlgmr.msra.gmra.mrb[32].mxu1 %vm2446_vm4, %v5887_v63  ;;  %v6824_v63 = vld [vmem:[#allocation6 + $0x134] ss:$8 sps:$4 sm:$0xff]  }
 0x502   :  { %2608 = vmatpush1.bf16.msra.mxu1 %v2452_v60  ;;  %2639 = vmatprep.mubr.bf16.mxu1 %v7362_v45 }
 0x503   :  { %5894 = vmatprep.subr.msk.bf16.mxu1 %vm2450_vm3, %v2444_v59 }
 0x509   :  { %5892 = vmatmul.mubr.msk.bf16.vlgmr.msra.gmra.mrb[36].mxu1 %vm2446_vm4, %v5890_v1 }
 0x50a   :  { %2658 = vmatpush1.bf16.msra.mxu1 %v2452_v60  ;;  %2689 = vmatprep.mubr.bf16.mxu1 %v7362_v45  ;;  %v6819_v60 = vld [vmem:[#allocation6 + $0x120] ss:$8 sps:$4 sm:$0xff]  }
 0x50b   :  { %3684 = vmatprep.subr.bf16.mxu1 %v6767_v2 }
 0x511   :  { %5895 = vmatmul.mubr.msk.bf16.vlgmr.msra.gmra.mrb[40].mxu1 %vm2446_vm4, %v5893_v3  ;;  %v6822_v3 = vld [vmem:[#allocation6 + $0x130] ss:$8 sps:$4 sm:$0xff]  }
 0x512   :  { %3685 = vmatpush1.bf16.msra.mxu1 %v6765_v54  ;;  %v6827_v54 = vld [vmem:[#allocation6 + $0x144] ss:$8 sps:$4 sm:$0xff]  }
 0x513   :  { %3686 = vmatprep.subr.bf16.mxu1 %v6770_v4 }
 0x516   :  { %3687 = vmatpush1.bf16.msra.mxu1 %v6768_v5 }
 0x517   :  { %3688 = vmatprep.subr.bf16.mxu1 %v6773_v6 }
 0x51a   :  { %3689 = vmatpush1.bf16.msra.mxu1 %v6771_v7  ;;  %v6825_v7 = vld [vmem:[#allocation6 + $0x140] ss:$8 sps:$4 sm:$0xff]  }
 0x51b   :  { %3690 = vmatprep.subr.bf16.mxu1 %v6776_v8 }
 0x51e   :  { %3691 = vmatpush1.bf16.msra.mxu1 %v6774_v9 }
 0x51f   :  { %3692 = vmatprep.subr.bf16.mxu1 %v6779_v10  ;;  %v6830_v10 = vld [vmem:[#allocation6 + $0x154] ss:$8 sps:$4 sm:$0xff]  }
 0x522   :  { %3693 = vmatpush1.bf16.msra.mxu1 %v6777_v11 }
 0x523   :  { %3694 = vmatprep.subr.bf16.mxu1 %v6782_v12  ;;  %v6828_v12 = vld [vmem:[#allocation6 + $0x150] ss:$8 sps:$4 sm:$0xff]  }
 0x526   :  { %3695 = vmatpush1.bf16.msra.mxu1 %v6780_v13  ;;  %v6833_v13 = vld [vmem:[#allocation6 + $0x164] ss:$8 sps:$4 sm:$0xff]  }
 0x527   :  { %3696 = vmatprep.subr.bf16.mxu1 %v6785_v14 }
 0x52a   :  { %3697 = vmatpush1.bf16.msra.mxu1 %v6783_v15 }
 0x52b   :  { %3698 = vmatprep.subr.bf16.mxu1 %v6788_v16 }
 0x52e   :  { %3699 = vmatpush1.bf16.msra.mxu1 %v6786_v17  ;;  %v6831_v17 = vld [vmem:[#allocation6 + $0x160] ss:$8 sps:$4 sm:$0xff]  }
 0x52f   :  { %3700 = vmatprep.subr.bf16.mxu1 %v6791_v18 }
 0x532   :  { %3701 = vmatpush1.bf16.msra.mxu1 %v6789_v19 }
 0x533   :  { %3702 = vmatprep.subr.bf16.mxu1 %v6794_v20  ;;  %v6836_v20 = vld [vmem:[#allocation6 + $0x174] ss:$8 sps:$4 sm:$0xff]  }
 0x536   :  { %3703 = vmatpush1.bf16.msra.mxu1 %v6792_v22 }
 0x537   :  { %3704 = vmatprep.subr.bf16.mxu1 %v6797_v24  ;;  %v6834_v24 = vld [vmem:[#allocation6 + $0x170] ss:$8 sps:$4 sm:$0xff]  }
 0x53a   :  { %3705 = vmatpush1.bf16.msra.mxu1 %v6795_v25  ;;  %v6839_v25 = vld [vmem:[#allocation6 + $0x184] ss:$8 sps:$4 sm:$0xff]  }
 0x53b   :  { %3706 = vmatprep.subr.bf16.mxu1 %v6800_v26  ;;  %v6837_v26 = vld [vmem:[#allocation6 + $0x180] ss:$8 sps:$4 sm:$0xff]  }
 0x53e   :  { %3707 = vmatpush1.bf16.msra.mxu1 %v6798_v27  ;;  %v6842_v27 = vld [vmem:[#allocation6 + $0x194] ss:$8 sps:$4 sm:$0xff]  }
 0x53f   :  { %3708 = vmatprep.subr.bf16.mxu1 %v6803_v28  ;;  %v6840_v28 = vld [vmem:[#allocation6 + $0x190] ss:$8 sps:$4 sm:$0xff]  }
 0x542   :  { %3709 = vmatpush1.bf16.msra.mxu1 %v6801_v29  ;;  %v6845_v29 = vld [vmem:[#allocation6 + $0x1a4] ss:$8 sps:$4 sm:$0xff]  }
 0x543   :  { %3710 = vmatprep.subr.bf16.mxu1 %v6806_v30  ;;  %v6843_v30 = vld [vmem:[#allocation6 + $0x1a0] ss:$8 sps:$4 sm:$0xff]  }
 0x546   :  { %3711 = vmatpush1.bf16.msra.mxu1 %v6804_v31  ;;  %v6848_v31 = vld [vmem:[#allocation6 + $0x1b4] ss:$8 sps:$4 sm:$0xff]  }
 0x547   :  { %3712 = vmatprep.subr.bf16.mxu1 %v6809_v32  ;;  %v6846_v32 = vld [vmem:[#allocation6 + $0x1b0] ss:$8 sps:$4 sm:$0xff]  }
 0x54a   :  { %3713 = vmatpush1.bf16.msra.mxu1 %v6807_v33  ;;  %v6851_v33 = vld [vmem:[#allocation6 + $0x1c4] ss:$8 sps:$4 sm:$0xff]  }
 0x54b   :  { %3714 = vmatprep.subr.bf16.mxu1 %v6812_v34  ;;  %v6849_v34 = vld [vmem:[#allocation6 + $0x1c0] ss:$8 sps:$4 sm:$0xff]  }
 0x54e   :  { %3715 = vmatpush1.bf16.msra.mxu1 %v6810_v35  ;;  %v6854_v35 = vld [vmem:[#allocation6 + $0x1d4] ss:$8 sps:$4 sm:$0xff]  }
 0x54f   :  { %3725 = vmatprep.subr.bf16.mxu1 %v6815_v36  ;;  %v6852_v36 = vld [vmem:[#allocation6 + $0x1d0] ss:$8 sps:$4 sm:$0xff]  }
 0x5c4   :  { %v2491_v37 = vpop.f32.mrb[24].mxu1 }
 0x5c5   :  { %v2498_v38 = vpack.c.bf16 %v2491_v37, %v2491_v37  ;;  %v2493_v39 = vpop.f32.mrb[25].mxu1  ;;  %v6857_v37 = vld [vmem:[#allocation6 + $0x1e4] ss:$8 sps:$4 sm:$0xff]  }
 0x5c6   :  { %v2499_v40 = vpack.c.bf16 %v2493_v39, %v2493_v39  ;;  %v2495_v41 = vpop.f32.mrb[26].mxu1  ;;  %v6860_v39 = vld [vmem:[#allocation6 + $0x1f4] ss:$8 sps:$4 sm:$0xff]  }
 0x5c7   :  { %2500 = vst [vmem:[#allocation2] sm:$0x3] %v2498_v38  ;;  %v2496_v42 = vpop.f32.mrb[27].mxu1  ;;  %v6855_v38 = vld [vmem:[#allocation6 + $0x1e0] ss:$8 sps:$4 sm:$0xff]  }
 0x5c8   :  { %2501 = vst [vmem:[#allocation2 + $0x8] sm:$0x3] %v2499_v40  ;;  %v6858_v40 = vld [vmem:[#allocation6 + $0x1f0] ss:$8 sps:$4 sm:$0xff]   ;;  %v6863_v41 = vld [vmem:[#allocation6 + $0x204] ss:$8 sps:$4 sm:$0xff]  }
 0x5cc   :  { %v2541_v43 = vpop.f32.mrb[28].mxu1 }
 0x5cd   :  { %v2548_v44 = vpack.c.bf16 %v2541_v43, %v2541_v43  ;;  %v2543_v46 = vpop.f32.mrb[29].mxu1  ;;  %v6861_v43 = vld [vmem:[#allocation6 + $0x200] ss:$8 sps:$4 sm:$0xff]  }
 0x5ce   :  { %v2549_v48 = vpack.c.bf16 %v2543_v46, %v2543_v46  ;;  %v2545_v49 = vpop.f32.mrb[30].mxu1  ;;  %v2702_v53 = vld [vmem:[#allocation2] sm:$0x3] }
 0x5cf   :  { %v2703_v50 = vld [vmem:[#allocation2 + $0x8] sm:$0x3]  ;;  %2550 = vst [vmem:[#allocation2 + $0x10] sm:$0x3] %v2548_v44  ;;  %v2546_v52 = vpop.f32.mrb[31].mxu1 }
 0x5d0   :  { %3716 = vmatprep.mubr.bf16.mxu1 %v2703_v50  ;;  %2551 = vst [vmem:[#allocation2 + $0x18] sm:$0x3] %v2549_v48  ;;  %v6866_v44 = vld [vmem:[#allocation6 + $0x214] ss:$8 sps:$4 sm:$0xff]   ;;  %v6869_v48 = vld [vmem:[#allocation6 + $0x224] ss:$8 sps:$4 sm:$0xff]  }
 0x5d1   :  { %3717 = vmatmul.mubr.bf16.vlgmr.msra.gmra.mrb[44].mxu1 %v2702_v53  ;;  %v6867_v49 = vld [vmem:[#allocation6 + $0x220] ss:$8 sps:$4 sm:$0xff]   ;;  %v6872_v50 = vld [vmem:[#allocation6 + $0x234] ss:$8 sps:$4 sm:$0xff]   ;;  %v6875_v52 = vld [vmem:[#allocation6 + $0x244] ss:$8 sps:$4 sm:$0xff]  }
 0x5d2   :  { %3726 = vmatpush1.bf16.msra.mxu1 %v6813_v47  ;;  %v6864_v47 = vld [vmem:[#allocation6 + $0x210] ss:$8 sps:$4 sm:$0xff]   ;;  %v6873_v53 = vld [vmem:[#allocation6 + $0x240] ss:$8 sps:$4 sm:$0xff]  }
 0x5d3   :  { %3727 = vmatprep.subr.bf16.mxu1 %v6818_v51  ;;  %v6870_v51 = vld [vmem:[#allocation6 + $0x230] ss:$8 sps:$4 sm:$0xff]  }
 0x5d4   :  { %v2591_v57 = vpop.f32.mrb[32].mxu1 }
 0x5d5   :  { %v2598_v58 = vpack.c.bf16 %v2591_v57, %v2591_v57  ;;  %v2593_v59 = vpop.f32.mrb[33].mxu1  ;;  %v6881_v57 = vld [vmem:[#allocation6 + $0x264] ss:$8 sps:$4 sm:$0xff]  }
 0x5d6   :  { %3728 = vmatpush1.bf16.msra.mxu1 %v6816_v55  ;;  %v2599_v61 = vpack.c.bf16 %v2593_v59, %v2593_v59  ;;  %v2595_v62 = vpop.f32.mrb[34].mxu1  ;;  %v2704_v42 = vld [vmem:[#allocation2 + $0x10] sm:$0x3]  ;;  %v6878_v55 = vld [vmem:[#allocation6 + $0x254] ss:$8 sps:$4 sm:$0xff]  }
 0x5d7   :  { %3729 = vmatprep.subr.bf16.mxu1 %v6821_v56  ;;  %v2705_v1 = vld [vmem:[#allocation2 + $0x18] sm:$0x3]  ;;  %2600 = vst [vmem:[#allocation2 + $0x20] sm:$0x3] %v2598_v58  ;;  %v2596_v2 = vpop.f32.mrb[35].mxu1 }
 0x5d8   :  { %3757 = vmatprep.mubr.bf16.mxu1 %v2705_v1  ;;  %2601 = vst [vmem:[#allocation2 + $0x28] sm:$0x3] %v2599_v61  ;;  %v6876_v56 = vld [vmem:[#allocation6 + $0x250] ss:$8 sps:$4 sm:$0xff]   ;;  %v6879_v58 = vld [vmem:[#allocation6 + $0x260] ss:$8 sps:$4 sm:$0xff]  }
 0x5d9   :  { %v6884_v59 = vld [vmem:[#allocation6 + $0x274] ss:$8 sps:$4 sm:$0xff]   ;;  %v6887_v61 = vld [vmem:[#allocation6 + $0x284] ss:$8 sps:$4 sm:$0xff]   ;;  %v6885_v62 = vld [vmem:[#allocation6 + $0x280] ss:$8 sps:$4 sm:$0xff]  }
 0x5da   :  { %3730 = vmatpush1.bf16.msra.mxu1 %v6819_v60  ;;  %v6882_v60 = vld [vmem:[#allocation6 + $0x270] ss:$8 sps:$4 sm:$0xff]   ;;  %v6893_v2 = vld [vmem:[#allocation6 + $0x2a4] ss:$8 sps:$4 sm:$0xff]  }
 0x5db   :  { %3731 = vmatprep.subr.bf16.mxu1 %v6824_v63  ;;  %v6890_v63 = vld [vmem:[#allocation6 + $0x294] ss:$8 sps:$4 sm:$0xff]   ;;  %v6888_v1 = vld [vmem:[#allocation6 + $0x290] ss:$8 sps:$4 sm:$0xff]  }
 0x5dc   :  { %v2641_v4 = vpop.f32.mrb[36].mxu1 }
 0x5dd   :  { %v2648_v5 = vpack.c.bf16 %v2641_v4, %v2641_v4  ;;  %v2643_v6 = vpop.f32.mrb[37].mxu1  ;;  %v6894_v4 = vld [vmem:[#allocation6 + $0x2b0] ss:$8 sps:$4 sm:$0xff]  }
 0x5de   :  { %3732 = vmatpush1.bf16.msra.mxu1 %v6822_v3  ;;  %v2649_v8 = vpack.c.bf16 %v2643_v6, %v2643_v6  ;;  %v2645_v9 = vpop.f32.mrb[38].mxu1  ;;  %v6891_v3 = vld [vmem:[#allocation6 + $0x2a0] ss:$8 sps:$4 sm:$0xff]  }
 0x5df   :  { %3733 = vmatprep.subr.bf16.mxu1 %v6827_v54  ;;  %2650 = vst [vmem:[#allocation2 + $0x30] sm:$0x3] %v2648_v5  ;;  %v2646_v11 = vpop.f32.mrb[39].mxu1  ;;  %v2707_v46 = vld [vmem:[#allocation2 + $0x28] sm:$0x3] }
 0x5e0   :  { %2651 = vst [vmem:[#allocation2 + $0x38] sm:$0x3] %v2649_v8  ;;  %v6896_v54 = vld [vmem:[#allocation6 + $0x2b4] ss:$8 sps:$4 sm:$0xff]   ;;  %v6899_v5 = vld [vmem:[#allocation6 + $0x2c4] ss:$8 sps:$4 sm:$0xff]  }
 0x5e1   :  { %v6897_v6 = vld [vmem:[#allocation6 + $0x2c0] ss:$8 sps:$4 sm:$0xff]   ;;  %v6900_v8 = vld [vmem:[#allocation6 + $0x2d0] ss:$8 sps:$4 sm:$0xff]   ;;  %v6905_v9 = vld [vmem:[#allocation6 + $0x2e4] ss:$8 sps:$4 sm:$0xff]  }
 0x5e2   :  { %3734 = vmatpush1.bf16.msra.mxu1 %v6825_v7  ;;  %v6902_v7 = vld [vmem:[#allocation6 + $0x2d4] ss:$8 sps:$4 sm:$0xff]  }
 0x5e3   :  { %3735 = vmatprep.subr.bf16.mxu1 %v6830_v10  ;;  %v6903_v10 = vld [vmem:[#allocation6 + $0x2e0] ss:$8 sps:$4 sm:$0xff]   ;;  %v6908_v11 = vld [vmem:[#allocation6 + $0x2f4] ss:$8 sps:$4 sm:$0xff]  }
 0x5e4   :  { %v2691_v14 = vpop.f32.mrb[40].mxu1 }
 0x5e5   :  { %v2698_v15 = vpack.c.bf16 %v2691_v14, %v2691_v14  ;;  %v2693_v16 = vpop.f32.mrb[41].mxu1  ;;  %v2706_v14 = vld [vmem:[#allocation2 + $0x20] sm:$0x3] }
 0x5e6   :  { %3736 = vmatpush1.bf16.msra.mxu1 %v6828_v12  ;;  %v2699_v18 = vpack.c.bf16 %v2693_v16, %v2693_v16  ;;  %v2695_v19 = vpop.f32.mrb[42].mxu1  ;;  %v6906_v12 = vld [vmem:[#allocation6 + $0x2f0] ss:$8 sps:$4 sm:$0xff]   ;;  %v6914_v16 = vld [vmem:[#allocation6 + $0x314] ss:$8 sps:$4 sm:$0xff]  }
 0x5e7   :  { %3737 = vmatprep.subr.bf16.mxu1 %v6833_v13  ;;  %2700 = vst [vmem:[#allocation2 + $0x40] sm:$0x3] %v2698_v15  ;;  %v2696_v22 = vpop.f32.mrb[43].mxu1  ;;  %v6911_v13 = vld [vmem:[#allocation6 + $0x304] ss:$8 sps:$4 sm:$0xff]  }
 0x5e8   :  { %2701 = vst [vmem:[#allocation2 + $0x48] sm:$0x3] %v2699_v18  ;;  %v6909_v15 = vld [vmem:[#allocation6 + $0x300] ss:$8 sps:$4 sm:$0xff]   ;;  %v6912_v18 = vld [vmem:[#allocation6 + $0x310] ss:$8 sps:$4 sm:$0xff]  }
 0x5e9   :  { %v6917_v19 = vld [vmem:[#allocation6 + $0x324] ss:$8 sps:$4 sm:$0xff]   ;;  %v6920_v22 = vld [vmem:[#allocation6 + $0x334] ss:$8 sps:$4 sm:$0xff]  }
 0x5ea   :  { %3738 = vmatpush1.bf16.msra.mxu1 %v6831_v17  ;;  %v2709_v17 = vld [vmem:[#allocation2 + $0x38] sm:$0x3] }
 0x5eb   :  { %3739 = vmatprep.subr.bf16.mxu1 %v6836_v20  ;;  %v6915_v20 = vld [vmem:[#allocation6 + $0x320] ss:$8 sps:$4 sm:$0xff]  }
 0x5ee   :  { %3740 = vmatpush1.bf16.msra.mxu1 %v6834_v24  ;;  %v6918_v24 = vld [vmem:[#allocation6 + $0x330] ss:$8 sps:$4 sm:$0xff]  }
 0x5ef   :  { %3741 = vmatprep.subr.bf16.mxu1 %v6839_v25  ;;  %v6923_v25 = vld [vmem:[#allocation6 + $0x344] ss:$8 sps:$4 sm:$0xff]  }
 0x5f2   :  { %3742 = vmatpush1.bf16.msra.mxu1 %v6837_v26  ;;  %v6921_v26 = vld [vmem:[#allocation6 + $0x340] ss:$8 sps:$4 sm:$0xff]  }
 0x5f3   :  { %3743 = vmatprep.subr.bf16.mxu1 %v6842_v27  ;;  %v6926_v27 = vld [vmem:[#allocation6 + $0x354] ss:$8 sps:$4 sm:$0xff]  }
 0x5f6   :  { %3744 = vmatpush1.bf16.msra.mxu1 %v6840_v28  ;;  %v6924_v28 = vld [vmem:[#allocation6 + $0x350] ss:$8 sps:$4 sm:$0xff]  }
 0x5f7   :  { %3745 = vmatprep.subr.bf16.mxu1 %v6845_v29  ;;  %v6929_v29 = vld [vmem:[#allocation6 + $0x364] ss:$8 sps:$4 sm:$0xff]  }
 0x5fa   :  { %3746 = vmatpush1.bf16.msra.mxu1 %v6843_v30  ;;  %v6927_v30 = vld [vmem:[#allocation6 + $0x360] ss:$8 sps:$4 sm:$0xff]  }
 0x5fb   :  { %3747 = vmatprep.subr.bf16.mxu1 %v6848_v31  ;;  %v6932_v31 = vld [vmem:[#allocation6 + $0x374] ss:$8 sps:$4 sm:$0xff]  }
 0x5fe   :  { %3748 = vmatpush1.bf16.msra.mxu1 %v6846_v32  ;;  %v6930_v32 = vld [vmem:[#allocation6 + $0x370] ss:$8 sps:$4 sm:$0xff]  }
 0x5ff   :  { %3749 = vmatprep.subr.bf16.mxu1 %v6851_v33  ;;  %v6935_v33 = vld [vmem:[#allocation6 + $0x384] ss:$8 sps:$4 sm:$0xff]  }
 0x602   :  { %3750 = vmatpush1.bf16.msra.mxu1 %v6849_v34  ;;  %v6933_v34 = vld [vmem:[#allocation6 + $0x380] ss:$8 sps:$4 sm:$0xff]  }
 0x603   :  { %3751 = vmatprep.subr.bf16.mxu1 %v6854_v35  ;;  %v6938_v35 = vld [vmem:[#allocation6 + $0x394] ss:$8 sps:$4 sm:$0xff]  }
 0x606   :  { %3752 = vmatpush1.bf16.msra.mxu1 %v6852_v36  ;;  %v6936_v36 = vld [vmem:[#allocation6 + $0x390] ss:$8 sps:$4 sm:$0xff]  }
 0x607   :  { %3753 = vmatprep.subr.bf16.mxu1 %v6857_v37  ;;  %v6941_v37 = vld [vmem:[#allocation6 + $0x3a4] ss:$8 sps:$4 sm:$0xff]  }
 0x60a   :  { %3754 = vmatpush1.bf16.msra.mxu1 %v6855_v38  ;;  %v6939_v38 = vld [vmem:[#allocation6 + $0x3a0] ss:$8 sps:$4 sm:$0xff]  }
 0x60b   :  { %3755 = vmatprep.subr.bf16.mxu1 %v6860_v39  ;;  %v6944_v39 = vld [vmem:[#allocation6 + $0x3b4] ss:$8 sps:$4 sm:$0xff]  }
 0x60e   :  { %3756 = vmatpush1.bf16.msra.mxu1 %v6858_v40  ;;  %v6942_v40 = vld [vmem:[#allocation6 + $0x3b0] ss:$8 sps:$4 sm:$0xff]  }
 0x60f   :  { %3766 = vmatprep.subr.bf16.mxu1 %v6863_v41  ;;  %v6947_v41 = vld [vmem:[#allocation6 + $0x3c4] ss:$8 sps:$4 sm:$0xff]  }
 0x611   :  { %3758 = vmatmul.mubr.bf16.vlgmr.msra.gmra.mrb[44].mxu1 %v2704_v42  ;;  %v6945_v42 = vld [vmem:[#allocation6 + $0x3c0] ss:$8 sps:$4 sm:$0xff]  }
 0x612   :  { %3767 = vmatpush1.bf16.msra.mxu1 %v6861_v43  ;;  %3798 = vmatprep.mubr.bf16.mxu1 %v2707_v46  ;;  %v6950_v43 = vld [vmem:[#allocation6 + $0x3d4] ss:$8 sps:$4 sm:$0xff]   ;;  %v6953_v46 = vld [vmem:[#allocation6 + $0x3e4] ss:$8 sps:$4 sm:$0xff]  }
 0x613   :  { %3768 = vmatprep.subr.bf16.mxu1 %v6866_v44  ;;  %v6948_v44 = vld [vmem:[#allocation6 + $0x3d0] ss:$8 sps:$4 sm:$0xff]  }
 0x616   :  { %3769 = vmatpush1.bf16.msra.mxu1 %v6864_v47  ;;  %v6951_v47 = vld [vmem:[#allocation6 + $0x3e0] ss:$8 sps:$4 sm:$0xff]  }
 0x617   :  { %3770 = vmatprep.subr.bf16.mxu1 %v6869_v48  ;;  %v6956_v48 = vld [vmem:[#allocation6 + $0x3f4] ss:$8 sps:$4 sm:$0xff]  }
 0x61a   :  { %3771 = vmatpush1.bf16.msra.mxu1 %v6867_v49  ;;  %v6954_v49 = vld [vmem:[#allocation6 + $0x3f0] ss:$8 sps:$4 sm:$0xff]  }
 0x61b   :  { %3772 = vmatprep.subr.bf16.mxu1 %v6872_v50  ;;  %v6959_v50 = vld [vmem:[#allocation6 + $0x404] ss:$8 sps:$4 sm:$0xff]  }
 0x61e   :  { %3773 = vmatpush1.bf16.msra.mxu1 %v6870_v51  ;;  %v6957_v51 = vld [vmem:[#allocation6 + $0x400] ss:$8 sps:$4 sm:$0xff]  }
 0x61f   :  { %3774 = vmatprep.subr.bf16.mxu1 %v6875_v52  ;;  %v6962_v52 = vld [vmem:[#allocation6 + $0x414] ss:$8 sps:$4 sm:$0xff]  }
 0x622   :  { %3775 = vmatpush1.bf16.msra.mxu1 %v6873_v53  ;;  %v2708_v53 = vld [vmem:[#allocation2 + $0x30] sm:$0x3] }
 0x623   :  { %3776 = vmatprep.subr.bf16.mxu1 %v6878_v55  ;;  %v2711_v55 = vld [vmem:[#allocation2 + $0x48] sm:$0x3] }
 0x626   :  { %3777 = vmatpush1.bf16.msra.mxu1 %v6876_v56  ;;  %v6960_v56 = vld [vmem:[#allocation6 + $0x410] ss:$8 sps:$4 sm:$0xff]  }
 0x627   :  { %3778 = vmatprep.subr.bf16.mxu1 %v6881_v57  ;;  %v6965_v57 = vld [vmem:[#allocation6 + $0x424] ss:$8 sps:$4 sm:$0xff]  }
 0x62a   :  { %3779 = vmatpush1.bf16.msra.mxu1 %v6879_v58  ;;  %v6963_v58 = vld [vmem:[#allocation6 + $0x420] ss:$8 sps:$4 sm:$0xff]  }
 0x62b   :  { %3780 = vmatprep.subr.bf16.mxu1 %v6884_v59  ;;  %v6968_v59 = vld [vmem:[#allocation6 + $0x434] ss:$8 sps:$4 sm:$0xff]  }
 0x62e   :  { %3781 = vmatpush1.bf16.msra.mxu1 %v6882_v60  ;;  %v6966_v60 = vld [vmem:[#allocation6 + $0x430] ss:$8 sps:$4 sm:$0xff]  }
 0x62f   :  { %3782 = vmatprep.subr.bf16.mxu1 %v6887_v61  ;;  %v6971_v61 = vld [vmem:[#allocation6 + $0x444] ss:$8 sps:$4 sm:$0xff]  }
 0x632   :  { %3783 = vmatpush1.bf16.msra.mxu1 %v6885_v62  ;;  %v6969_v62 = vld [vmem:[#allocation6 + $0x440] ss:$8 sps:$4 sm:$0xff]  }
 0x633   :  { %3784 = vmatprep.subr.bf16.mxu1 %v6890_v63  ;;  %v6974_v63 = vld [vmem:[#allocation6 + $0x454] ss:$8 sps:$4 sm:$0xff]  }
 0x636   :  { %3785 = vmatpush1.bf16.msra.mxu1 %v6888_v1  ;;  %v6972_v1 = vld [vmem:[#allocation6 + $0x450] ss:$8 sps:$4 sm:$0xff]  }
 0x637   :  { %3786 = vmatprep.subr.bf16.mxu1 %v6893_v2  ;;  %v6977_v2 = vld [vmem:[#allocation6 + $0x464] ss:$8 sps:$4 sm:$0xff]  }
 0x63a   :  { %3787 = vmatpush1.bf16.msra.mxu1 %v6891_v3  ;;  %v6975_v3 = vld [vmem:[#allocation6 + $0x460] ss:$8 sps:$4 sm:$0xff]  }
 0x63b   :  { %3788 = vmatprep.subr.bf16.mxu1 %v6896_v54  ;;  %v6980_v54 = vld [vmem:[#allocation6 + $0x474] ss:$8 sps:$4 sm:$0xff]  }
 0x63e   :  { %3789 = vmatpush1.bf16.msra.mxu1 %v6894_v4  ;;  %v6978_v4 = vld [vmem:[#allocation6 + $0x470] ss:$8 sps:$4 sm:$0xff]  }
 0x63f   :  { %3790 = vmatprep.subr.bf16.mxu1 %v6899_v5  ;;  %v6983_v5 = vld [vmem:[#allocation6 + $0x484] ss:$8 sps:$4 sm:$0xff]  }
 0x642   :  { %3791 = vmatpush1.bf16.msra.mxu1 %v6897_v6  ;;  %v6981_v6 = vld [vmem:[#allocation6 + $0x480] ss:$8 sps:$4 sm:$0xff]  }
 0x643   :  { %3792 = vmatprep.subr.bf16.mxu1 %v6902_v7  ;;  %v6986_v7 = vld [vmem:[#allocation6 + $0x494] ss:$8 sps:$4 sm:$0xff]  }
 0x646   :  { %3793 = vmatpush1.bf16.msra.mxu1 %v6900_v8  ;;  %v6984_v8 = vld [vmem:[#allocation6 + $0x490] ss:$8 sps:$4 sm:$0xff]  }
 0x647   :  { %3794 = vmatprep.subr.bf16.mxu1 %v6905_v9  ;;  %v6989_v9 = vld [vmem:[#allocation6 + $0x4a4] ss:$8 sps:$4 sm:$0xff]  }
 0x64a   :  { %3795 = vmatpush1.bf16.msra.mxu1 %v6903_v10  ;;  %v6987_v10 = vld [vmem:[#allocation6 + $0x4a0] ss:$8 sps:$4 sm:$0xff]  }
 0x64b   :  { %3796 = vmatprep.subr.bf16.mxu1 %v6908_v11  ;;  %v6992_v11 = vld [vmem:[#allocation6 + $0x4b4] ss:$8 sps:$4 sm:$0xff]  }
 0x64e   :  { %3797 = vmatpush1.bf16.msra.mxu1 %v6906_v12  ;;  %v6990_v12 = vld [vmem:[#allocation6 + $0x4b0] ss:$8 sps:$4 sm:$0xff]  }
 0x64f   :  { %3807 = vmatprep.subr.bf16.mxu1 %v6911_v13  ;;  %v6995_v13 = vld [vmem:[#allocation6 + $0x4c4] ss:$8 sps:$4 sm:$0xff]  }
 0x651   :  { %3799 = vmatmul.mubr.bf16.vlgmr.msra.gmra.mrb[44].mxu1 %v2706_v14  ;;  %v6993_v14 = vld [vmem:[#allocation6 + $0x4c0] ss:$8 sps:$4 sm:$0xff]  }
 0x652   :  { %3808 = vmatpush1.bf16.msra.mxu1 %v6909_v15  ;;  %3839 = vmatprep.mubr.bf16.mxu1 %v2709_v17  ;;  %v6998_v15 = vld [vmem:[#allocation6 + $0x4d4] ss:$8 sps:$4 sm:$0xff]   ;;  %v7001_v17 = vld [vmem:[#allocation6 + $0x4e4] ss:$8 sps:$4 sm:$0xff]  }
 0x653   :  { %3809 = vmatprep.subr.bf16.mxu1 %v6914_v16  ;;  %v6996_v16 = vld [vmem:[#allocation6 + $0x4d0] ss:$8 sps:$4 sm:$0xff]  }
 0x656   :  { %3810 = vmatpush1.bf16.msra.mxu1 %v6912_v18  ;;  %v6999_v18 = vld [vmem:[#allocation6 + $0x4e0] ss:$8 sps:$4 sm:$0xff]  }
 0x657   :  { %3811 = vmatprep.subr.bf16.mxu1 %v6917_v19  ;;  %v7004_v19 = vld [vmem:[#allocation6 + $0x4f4] ss:$8 sps:$4 sm:$0xff]  }
 0x65a   :  { %3812 = vmatpush1.bf16.msra.mxu1 %v6915_v20  ;;  %v7002_v20 = vld [vmem:[#allocation6 + $0x4f0] ss:$8 sps:$4 sm:$0xff]  }
 0x65b   :  { %3813 = vmatprep.subr.bf16.mxu1 %v6920_v22  ;;  %v2710_v22 = vld [vmem:[#allocation2 + $0x40] sm:$0x3] }
 0x65e   :  { %3814 = vmatpush1.bf16.msra.mxu1 %v6918_v24  ;;  %v2872_v24 = vld [vmem:[%s7991_s9] sm:$0x3] }
 0x65f   :  { %3815 = vmatprep.subr.bf16.mxu1 %v6923_v25  ;;  %v2877_v25 = vrot.slane %v2872_v24, %v7803_v21 }
 0x662   :  { %3816 = vmatpush1.bf16.msra.mxu1 %v6921_v26  ;;  %v2881_v26 = vrot.slane %v2872_v24, %v7808_v23 }
 0x663   :  { %3817 = vmatprep.subr.bf16.mxu1 %v6926_v27 }
 0x666   :  { %3818 = vmatpush1.bf16.msra.mxu1 %v6924_v28 }
 0x667   :  { %3819 = vmatprep.subr.bf16.mxu1 %v6929_v29 }
 0x66a   :  { %3820 = vmatpush1.bf16.msra.mxu1 %v6927_v30 }
 0x66b   :  { %3821 = vmatprep.subr.bf16.mxu1 %v6932_v31 }
 0x66e   :  { %3822 = vmatpush1.bf16.msra.mxu1 %v6930_v32 }
 0x66f   :  { %3823 = vmatprep.subr.bf16.mxu1 %v6935_v33 }
 0x672   :  { %3824 = vmatpush1.bf16.msra.mxu1 %v6933_v34 }
 0x673   :  { %3825 = vmatprep.subr.bf16.mxu1 %v6938_v35 }
 0x676   :  { %3826 = vmatpush1.bf16.msra.mxu1 %v6936_v36 }
 0x677   :  { %3827 = vmatprep.subr.bf16.mxu1 %v6941_v37  ;;  %v3893_v37 = vld [vmem:[%s7992_s10] sm:$0x1] }
 0x67a   :  { %3828 = vmatpush1.bf16.msra.mxu1 %v6939_v38  ;;  %v6058_v38 = vld [vmem:[%s7992_s10 + $0x1] sm:$0x1] }
 0x67b   :  { %3829 = vmatprep.subr.bf16.mxu1 %v6944_v39  ;;  %v6061_v39 = vld [vmem:[%s7992_s10 + $0x2] sm:$0x1] }
 0x67e   :  { %3830 = vmatpush1.bf16.msra.mxu1 %v6942_v40  ;;  %v6064_v40 = vld [vmem:[%s7992_s10 + $0x3] sm:$0x1] }
 0x67f   :  { %3831 = vmatprep.subr.bf16.mxu1 %v6947_v41  ;;  %v7007_v41 = vld [vmem:[#allocation8 + $0x4] ss:$8 sps:$4 sm:$0xff]  }
 0x682   :  { %3832 = vmatpush1.bf16.msra.mxu1 %v6945_v42  ;;  %v6067_v42 = vld [vmem:[%s7992_s10 + $0x4] sm:$0x1] }
 0x683   :  { %3833 = vmatprep.subr.bf16.mxu1 %v6950_v43  ;;  %v7005_v43 = vld [vmem:[#allocation8] ss:$8 sps:$4 sm:$0xff]  }
 0x686   :  { %3834 = vmatpush1.bf16.msra.mxu1 %v6948_v44  ;;  %v7010_v44 = vld [vmem:[#allocation8 + $0x14] ss:$8 sps:$4 sm:$0xff]  }
 0x687   :  { %3835 = vmatprep.subr.bf16.mxu1 %v6953_v46  ;;  %v7008_v46 = vld [vmem:[#allocation8 + $0x10] ss:$8 sps:$4 sm:$0xff]  }
 0x68a   :  { %3836 = vmatpush1.bf16.msra.mxu1 %v6951_v47  ;;  %v7013_v47 = vld [vmem:[#allocation8 + $0x24] ss:$8 sps:$4 sm:$0xff]  }
 0x68b   :  { %3837 = vmatprep.subr.bf16.mxu1 %v6956_v48  ;;  %v7011_v48 = vld [vmem:[#allocation8 + $0x20] ss:$8 sps:$4 sm:$0xff]  }
 0x68e   :  { %3838 = vmatpush1.bf16.msra.mxu1 %v6954_v49  ;;  %v7016_v49 = vld [vmem:[#allocation8 + $0x34] ss:$8 sps:$4 sm:$0xff]  }
 0x68f   :  { %3848 = vmatprep.subr.bf16.mxu1 %v6959_v50  ;;  %v7014_v50 = vld [vmem:[#allocation8 + $0x30] ss:$8 sps:$4 sm:$0xff]  }
 0x691   :  { %3840 = vmatmul.mubr.bf16.vlgmr.msra.gmra.mrb[44].mxu1 %v2708_v53  ;;  %v7020_v53 = vld [vmem:[#allocation8 + $0x50] ss:$8 sps:$4 sm:$0xff]  }
 0x692   :  { %3849 = vmatpush1.bf16.msra.mxu1 %v6957_v51  ;;  %3880 = vmatprep.mubr.bf16.mxu1 %v2711_v55  ;;  %v7017_v51 = vld [vmem:[#allocation8 + $0x40] ss:$8 sps:$4 sm:$0xff]   ;;  %v7025_v55 = vld [vmem:[#allocation8 + $0x64] ss:$8 sps:$4 sm:$0xff]  }
 0x693   :  { %3850 = vmatprep.subr.bf16.mxu1 %v6962_v52  ;;  %v7022_v52 = vld [vmem:[#allocation8 + $0x54] ss:$8 sps:$4 sm:$0xff]  }
 0x696   :  { %3851 = vmatpush1.bf16.msra.mxu1 %v6960_v56  ;;  %v7023_v56 = vld [vmem:[#allocation8 + $0x60] ss:$8 sps:$4 sm:$0xff]  }
 0x697   :  { %3852 = vmatprep.subr.bf16.mxu1 %v6965_v57  ;;  %v7028_v57 = vld [vmem:[#allocation8 + $0x74] ss:$8 sps:$4 sm:$0xff]  }
 0x69a   :  { %3853 = vmatpush1.bf16.msra.mxu1 %v6963_v58  ;;  %v7026_v58 = vld [vmem:[#allocation8 + $0x70] ss:$8 sps:$4 sm:$0xff]  }
 0x69b   :  { %3854 = vmatprep.subr.bf16.mxu1 %v6968_v59  ;;  %v7031_v59 = vld [vmem:[#allocation8 + $0x84] ss:$8 sps:$4 sm:$0xff]  }
 0x69e   :  { %3855 = vmatpush1.bf16.msra.mxu1 %v6966_v60  ;;  %v7029_v60 = vld [vmem:[#allocation8 + $0x80] ss:$8 sps:$4 sm:$0xff]  }
 0x69f   :  { %3856 = vmatprep.subr.bf16.mxu1 %v6971_v61  ;;  %v7034_v61 = vld [vmem:[#allocation8 + $0x94] ss:$8 sps:$4 sm:$0xff]  }
 0x6a2   :  { %3857 = vmatpush1.bf16.msra.mxu1 %v6969_v62  ;;  %v7032_v62 = vld [vmem:[#allocation8 + $0x90] ss:$8 sps:$4 sm:$0xff]  }
 0x6a3   :  { %3858 = vmatprep.subr.bf16.mxu1 %v6974_v63  ;;  %v7037_v63 = vld [vmem:[#allocation8 + $0xa4] ss:$8 sps:$4 sm:$0xff]  }
 0x6a6   :  { %3859 = vmatpush1.bf16.msra.mxu1 %v6972_v1  ;;  %v7035_v1 = vld [vmem:[#allocation8 + $0xa0] ss:$8 sps:$4 sm:$0xff]  }
 0x6a7   :  { %3860 = vmatprep.subr.bf16.mxu1 %v6977_v2  ;;  %v7040_v2 = vld [vmem:[#allocation8 + $0xb4] ss:$8 sps:$4 sm:$0xff]  }
 0x6aa   :  { %3861 = vmatpush1.bf16.msra.mxu1 %v6975_v3  ;;  %v7038_v3 = vld [vmem:[#allocation8 + $0xb0] ss:$8 sps:$4 sm:$0xff]  }
 0x6ab   :  { %3862 = vmatprep.subr.bf16.mxu1 %v6980_v54  ;;  %v7043_v54 = vld [vmem:[#allocation8 + $0xc4] ss:$8 sps:$4 sm:$0xff]  }
 0x6ae   :  { %3863 = vmatpush1.bf16.msra.mxu1 %v6978_v4  ;;  %v7041_v4 = vld [vmem:[#allocation8 + $0xc0] ss:$8 sps:$4 sm:$0xff]  }
 0x6af   :  { %3864 = vmatprep.subr.bf16.mxu1 %v6983_v5  ;;  %v7046_v5 = vld [vmem:[#allocation8 + $0xd4] ss:$8 sps:$4 sm:$0xff]  }
 0x6b2   :  { %3865 = vmatpush1.bf16.msra.mxu1 %v6981_v6  ;;  %v7044_v6 = vld [vmem:[#allocation8 + $0xd0] ss:$8 sps:$4 sm:$0xff]  }
 0x6b3   :  { %3866 = vmatprep.subr.bf16.mxu1 %v6986_v7  ;;  %v7049_v7 = vld [vmem:[#allocation8 + $0xe4] ss:$8 sps:$4 sm:$0xff]  }
 0x6b6   :  { %3867 = vmatpush1.bf16.msra.mxu1 %v6984_v8  ;;  %v7047_v8 = vld [vmem:[#allocation8 + $0xe0] ss:$8 sps:$4 sm:$0xff]  }
 0x6b7   :  { %3868 = vmatprep.subr.bf16.mxu1 %v6989_v9  ;;  %v7052_v9 = vld [vmem:[#allocation8 + $0xf4] ss:$8 sps:$4 sm:$0xff]  }
 0x6ba   :  { %3869 = vmatpush1.bf16.msra.mxu1 %v6987_v10  ;;  %v7050_v10 = vld [vmem:[#allocation8 + $0xf0] ss:$8 sps:$4 sm:$0xff]  }
 0x6bb   :  { %3870 = vmatprep.subr.bf16.mxu1 %v6992_v11  ;;  %v7055_v11 = vld [vmem:[#allocation8 + $0x104] ss:$8 sps:$4 sm:$0xff]  }
 0x6be   :  { %3871 = vmatpush1.bf16.msra.mxu1 %v6990_v12 }
 0x6bf   :  { %3872 = vmatprep.subr.bf16.mxu1 %v6995_v13 }
 0x6c2   :  { %3873 = vmatpush1.bf16.msra.mxu1 %v6993_v14 }
 0x6c3   :  { %3874 = vmatprep.subr.bf16.mxu1 %v6998_v15 }
 0x6c6   :  { %3875 = vmatpush1.bf16.msra.mxu1 %v6996_v16 }
 0x6c7   :  { %3876 = vmatprep.subr.bf16.mxu1 %v7001_v17 }
 0x6ca   :  { %3877 = vmatpush1.bf16.msra.mxu1 %v6999_v18 }
 0x6cb   :  { %3878 = vmatprep.subr.bf16.mxu1 %v7004_v19 }
 0x6ce   :  { %3879 = vmatpush1.bf16.msra.mxu1 %v7002_v20 }
 0x6d1   :  { %3881 = vmatmul.mubr.bf16.vlgmr.msra.gmra.mrb[44].mxu1 %v2710_v22  ;;  %v7053_v22 = vld [vmem:[#allocation8 + $0x100] ss:$8 sps:$4 sm:$0xff]  }
 0x6d2   :  { %5414 = vmatprep.mubr.f32.mxu1 %v7360_v0 }
 0x7a4   :  { %v3882_v27 = vpop.f32.mrb[44].mxu1 }
 0x7a5   :  { %v6335_v28 = vadd.f32 %v3882_v27, %v2877_v25  ;;  %v3884_v29 = vpop.f32.mrb[45].mxu1  ;;  %v7058_v27 = vld [vmem:[#allocation8 + $0x114] ss:$8 sps:$4 sm:$0xff]  }
 0x7a6   :  { %v6336_v30 = vadd.f32 %v3884_v29, %v2881_v26  ;;  %v3886_v31 = vpop.f32.mrb[46].mxu1 }
 0x7a7   :  { %v3889_v32 = vmax.f32 %v6335_v28, 0.0  ;;  %v3887_v33 = vpop.f32.mrb[47].mxu1  ;;  %v7061_v31 = vld [vmem:[#allocation8 + $0x124] ss:$8 sps:$4 sm:$0xff]  }
 0x7a8   :  { %v3890_v34 = vmax.f32 %v6336_v30, 0.0  ;;  %v7056_v30 = vld [vmem:[#allocation8 + $0x110] ss:$8 sps:$4 sm:$0xff]  }
 0x7a9   :  { %v3891_v35 = vpack.c.bf16 %v3889_v32, %v3889_v32 }
 0x7aa   :  { %v3892_v36 = vpack.c.bf16 %v3890_v34, %v3890_v34 }
 0x7ab   :  { %v3900_v0 = vsel %vm3898_vm5, %v3891_v35, 0  ;;  %v7059_v35 = vld [vmem:[#allocation8 + $0x120] ss:$8 sps:$4 sm:$0xff]  }
 0x7ac   :  { %6056 = vmatprep.subr.msk.bf16.mxu0 %vm3898_vm5, %v3892_v36 }
 0x7ad   :  { %3906 = vmatpush1.bf16.msra.mxu0 %v3900_v0 }
 0x7ae   :  { %6059 = vmatprep.subr.msk.bf16.mxu0 %vm3898_vm5, %v3892_v36 }
 0x7b0   :  { %6057 = vmatmul.mubr.msk.bf16.vlgmr.msra.gmra.mrb[28].mxu0 %vm3894_vm6, %v3893_v37  ;;  %v7064_v37 = vld [vmem:[#allocation8 + $0x134] ss:$8 sps:$4 sm:$0xff]  }
 0x7b1   :  { %3956 = vmatpush1.bf16.msra.mxu0 %v3900_v0  ;;  %3987 = vmatprep.mubr.bf16.mxu0 %v7362_v45 }
 0x7b2   :  { %6062 = vmatprep.subr.msk.bf16.mxu0 %vm3898_vm5, %v3892_v36 }
 0x7b8   :  { %6060 = vmatmul.mubr.msk.bf16.vlgmr.msra.gmra.mrb[32].mxu0 %vm3894_vm6, %v6058_v38 }
 0x7b9   :  { %4006 = vmatpush1.bf16.msra.mxu0 %v3900_v0  ;;  %4037 = vmatprep.mubr.bf16.mxu0 %v7362_v45 }
 0x7ba   :  { %6065 = vmatprep.subr.msk.bf16.mxu0 %vm3898_vm5, %v3892_v36 }
 0x7c0   :  { %6063 = vmatmul.mubr.msk.bf16.vlgmr.msra.gmra.mrb[36].mxu0 %vm3894_vm6, %v6061_v39 }
 0x7c1   :  { %4056 = vmatpush1.bf16.msra.mxu0 %v3900_v0  ;;  %4087 = vmatprep.mubr.bf16.mxu0 %v7362_v45 }
 0x7c2   :  { %6068 = vmatprep.subr.msk.bf16.mxu0 %vm3898_vm5, %v3892_v36 }
 0x7c8   :  { %6066 = vmatmul.mubr.msk.bf16.vlgmr.msra.gmra.mrb[40].mxu0 %vm3894_vm6, %v6064_v40  ;;  %v7062_v40 = vld [vmem:[#allocation8 + $0x130] ss:$8 sps:$4 sm:$0xff]  }
 0x7c9   :  { %4106 = vmatpush1.bf16.msra.mxu0 %v3900_v0  ;;  %4137 = vmatprep.mubr.bf16.mxu0 %v7362_v45  ;;  %v7019_v45 = vld [vmem:[#allocation8 + $0x44] ss:$8 sps:$4 sm:$0xff]  }
 0x7ca   :  { %5132 = vmatprep.subr.bf16.mxu0 %v7007_v41  ;;  %v7067_v41 = vld [vmem:[#allocation8 + $0x144] ss:$8 sps:$4 sm:$0xff]  }
 0x7d0   :  { %6069 = vmatmul.mubr.msk.bf16.vlgmr.msra.gmra.mrb[44].mxu0 %vm3894_vm6, %v6067_v42 }
 0x7d1   :  { %5133 = vmatpush1.bf16.msra.mxu0 %v7005_v43 }
 0x7d2   :  { %5134 = vmatprep.subr.bf16.mxu0 %v7010_v44 }
 0x7d5   :  { %5135 = vmatpush1.bf16.msra.mxu0 %v7008_v46  ;;  %v7065_v46 = vld [vmem:[#allocation8 + $0x140] ss:$8 sps:$4 sm:$0xff]  }
 0x7d6   :  { %5136 = vmatprep.subr.bf16.mxu0 %v7013_v47 }
 0x7d9   :  { %5137 = vmatpush1.bf16.msra.mxu0 %v7011_v48 }
 0x7da   :  { %5138 = vmatprep.subr.bf16.mxu0 %v7016_v49  ;;  %v7070_v49 = vld [vmem:[#allocation8 + $0x154] ss:$8 sps:$4 sm:$0xff]  }
 0x7dd   :  { %5139 = vmatpush1.bf16.msra.mxu0 %v7014_v50 }
 0x7de   :  { %5140 = vmatprep.subr.bf16.mxu0 %v7019_v45  ;;  %v7068_v45 = vld [vmem:[#allocation8 + $0x150] ss:$8 sps:$4 sm:$0xff]  }
 0x7e1   :  { %5141 = vmatpush1.bf16.msra.mxu0 %v7017_v51  ;;  %v7073_v51 = vld [vmem:[#allocation8 + $0x164] ss:$8 sps:$4 sm:$0xff]  }
 0x7e2   :  { %5142 = vmatprep.subr.bf16.mxu0 %v7022_v52 }
 0x7e5   :  { %5143 = vmatpush1.bf16.msra.mxu0 %v7020_v53 }
 0x7e6   :  { %5144 = vmatprep.subr.bf16.mxu0 %v7025_v55 }
 0x7e9   :  { %5145 = vmatpush1.bf16.msra.mxu0 %v7023_v56  ;;  %v7071_v56 = vld [vmem:[#allocation8 + $0x160] ss:$8 sps:$4 sm:$0xff]  }
 0x7ea   :  { %5146 = vmatprep.subr.bf16.mxu0 %v7028_v57 }
 0x7ed   :  { %5147 = vmatpush1.bf16.msra.mxu0 %v7026_v58 }
 0x7ee   :  { %5148 = vmatprep.subr.bf16.mxu0 %v7031_v59  ;;  %v7076_v59 = vld [vmem:[#allocation8 + $0x174] ss:$8 sps:$4 sm:$0xff]  }
 0x7f1   :  { %5149 = vmatpush1.bf16.msra.mxu0 %v7029_v60 }
 0x7f2   :  { %5150 = vmatprep.subr.bf16.mxu0 %v7034_v61  ;;  %v7074_v61 = vld [vmem:[#allocation8 + $0x170] ss:$8 sps:$4 sm:$0xff]  }
 0x7f5   :  { %5151 = vmatpush1.bf16.msra.mxu0 %v7032_v62  ;;  %v7079_v62 = vld [vmem:[#allocation8 + $0x184] ss:$8 sps:$4 sm:$0xff]  }
 0x7f6   :  { %5152 = vmatprep.subr.bf16.mxu0 %v7037_v63  ;;  %v7077_v63 = vld [vmem:[#allocation8 + $0x180] ss:$8 sps:$4 sm:$0xff]  }
 0x7f9   :  { %5153 = vmatpush1.bf16.msra.mxu0 %v7035_v1  ;;  %v7082_v1 = vld [vmem:[#allocation8 + $0x194] ss:$8 sps:$4 sm:$0xff]  }
 0x7fa   :  { %5154 = vmatprep.subr.bf16.mxu0 %v7040_v2  ;;  %v7080_v2 = vld [vmem:[#allocation8 + $0x190] ss:$8 sps:$4 sm:$0xff]  }
 0x7fd   :  { %5155 = vmatpush1.bf16.msra.mxu0 %v7038_v3  ;;  %v7085_v3 = vld [vmem:[#allocation8 + $0x1a4] ss:$8 sps:$4 sm:$0xff]  }
 0x7fe   :  { %5156 = vmatprep.subr.bf16.mxu0 %v7043_v54  ;;  %v7083_v54 = vld [vmem:[#allocation8 + $0x1a0] ss:$8 sps:$4 sm:$0xff]  }
 0x801   :  { %5157 = vmatpush1.bf16.msra.mxu0 %v7041_v4  ;;  %v7088_v4 = vld [vmem:[#allocation8 + $0x1b4] ss:$8 sps:$4 sm:$0xff]  }
 0x802   :  { %5158 = vmatprep.subr.bf16.mxu0 %v7046_v5  ;;  %v7086_v5 = vld [vmem:[#allocation8 + $0x1b0] ss:$8 sps:$4 sm:$0xff]  }
 0x805   :  { %5159 = vmatpush1.bf16.msra.mxu0 %v7044_v6  ;;  %v7091_v6 = vld [vmem:[#allocation8 + $0x1c4] ss:$8 sps:$4 sm:$0xff]  }
 0x806   :  { %5160 = vmatprep.subr.bf16.mxu0 %v7049_v7  ;;  %v7089_v7 = vld [vmem:[#allocation8 + $0x1c0] ss:$8 sps:$4 sm:$0xff]  }
 0x809   :  { %5161 = vmatpush1.bf16.msra.mxu0 %v7047_v8  ;;  %v7094_v8 = vld [vmem:[#allocation8 + $0x1d4] ss:$8 sps:$4 sm:$0xff]  }
 0x80a   :  { %5162 = vmatprep.subr.bf16.mxu0 %v7052_v9  ;;  %v7092_v9 = vld [vmem:[#allocation8 + $0x1d0] ss:$8 sps:$4 sm:$0xff]  }
 0x80d   :  { %5163 = vmatpush1.bf16.msra.mxu0 %v7050_v10  ;;  %v7097_v10 = vld [vmem:[#allocation8 + $0x1e4] ss:$8 sps:$4 sm:$0xff]  }
 0x80e   :  { %5173 = vmatprep.subr.bf16.mxu0 %v7055_v11  ;;  %v7095_v11 = vld [vmem:[#allocation8 + $0x1e0] ss:$8 sps:$4 sm:$0xff]  }
 0x883   :  { %v3939_v12 = vpop.f32.mrb[28].mxu0 }
 0x884   :  { %v3946_v13 = vpack.c.bf16 %v3939_v12, %v3939_v12  ;;  %v3941_v14 = vpop.f32.mrb[29].mxu0  ;;  %v7100_v12 = vld [vmem:[#allocation8 + $0x1f4] ss:$8 sps:$4 sm:$0xff]  }
 0x885   :  { %v3947_v15 = vpack.c.bf16 %v3941_v14, %v3941_v14  ;;  %v3943_v16 = vpop.f32.mrb[30].mxu0  ;;  %v7103_v14 = vld [vmem:[#allocation8 + $0x204] ss:$8 sps:$4 sm:$0xff]  }
 0x886   :  { %3948 = vst [vmem:[#allocation2] sm:$0x1] %v3946_v13  ;;  %v3944_v17 = vpop.f32.mrb[31].mxu0  ;;  %v7098_v13 = vld [vmem:[#allocation8 + $0x1f0] ss:$8 sps:$4 sm:$0xff]  }
 0x887   :  { %3949 = vst [vmem:[#allocation2 + $0x8] sm:$0x1] %v3947_v15  ;;  %v7101_v16 = vld [vmem:[#allocation8 + $0x200] ss:$8 sps:$4 sm:$0xff]   ;;  %v7106_v17 = vld [vmem:[#allocation8 + $0x214] ss:$8 sps:$4 sm:$0xff]  }
 0x88b   :  { %v3989_v18 = vpop.f32.mrb[32].mxu0 }
 0x88c   :  { %v3996_v19 = vpack.c.bf16 %v3989_v18, %v3989_v18  ;;  %v3991_v20 = vpop.f32.mrb[33].mxu0 }
 0x88d   :  { %v3997_v24 = vpack.c.bf16 %v3991_v20, %v3991_v20  ;;  %v3993_v25 = vpop.f32.mrb[34].mxu0  ;;  %v4150_v29 = vld [vmem:[#allocation2] sm:$0x1]  ;;  %v7109_v20 = vld [vmem:[#allocation8 + $0x224] ss:$8 sps:$4 sm:$0xff]  }
 0x88e   :  { %v4151_v26 = vld [vmem:[#allocation2 + $0x8] sm:$0x1]  ;;  %3998 = vst [vmem:[#allocation2 + $0x10] sm:$0x1] %v3996_v19  ;;  %v3994_v28 = vpop.f32.mrb[35].mxu0 }
 0x88f   :  { %5164 = vmatprep.mubr.bf16.mxu0 %v4151_v26  ;;  %3999 = vst [vmem:[#allocation2 + $0x18] sm:$0x1] %v3997_v24  ;;  %v7104_v19 = vld [vmem:[#allocation8 + $0x210] ss:$8 sps:$4 sm:$0xff]   ;;  %v7112_v24 = vld [vmem:[#allocation8 + $0x234] ss:$8 sps:$4 sm:$0xff]  }
 0x890   :  { %5165 = vmatmul.mubr.bf16.vlgmr.msra.gmra.mrb[48].mxu0 %v4150_v29  ;;  %v7110_v25 = vld [vmem:[#allocation8 + $0x230] ss:$8 sps:$4 sm:$0xff]   ;;  %v7115_v26 = vld [vmem:[#allocation8 + $0x244] ss:$8 sps:$4 sm:$0xff]   ;;  %v7118_v28 = vld [vmem:[#allocation8 + $0x254] ss:$8 sps:$4 sm:$0xff]  }
 0x891   :  { %5174 = vmatpush1.bf16.msra.mxu0 %v7053_v22  ;;  %v7107_v22 = vld [vmem:[#allocation8 + $0x220] ss:$8 sps:$4 sm:$0xff]   ;;  %v7116_v29 = vld [vmem:[#allocation8 + $0x250] ss:$8 sps:$4 sm:$0xff]  }
 0x892   :  { %5175 = vmatprep.subr.bf16.mxu0 %v7058_v27  ;;  %v7113_v27 = vld [vmem:[#allocation8 + $0x240] ss:$8 sps:$4 sm:$0xff]  }
 0x893   :  { %v4039_v32 = vpop.f32.mrb[36].mxu0 }
 0x894   :  { %v4046_v33 = vpack.c.bf16 %v4039_v32, %v4039_v32  ;;  %v4041_v34 = vpop.f32.mrb[37].mxu0  ;;  %v7124_v32 = vld [vmem:[#allocation8 + $0x274] ss:$8 sps:$4 sm:$0xff]  }
 0x895   :  { %5176 = vmatpush1.bf16.msra.mxu0 %v7056_v30  ;;  %v4047_v36 = vpack.c.bf16 %v4041_v34, %v4041_v34  ;;  %v4043_v0 = vpop.f32.mrb[38].mxu0  ;;  %v4152_v15 = vld [vmem:[#allocation2 + $0x10] sm:$0x1]  ;;  %v7121_v30 = vld [vmem:[#allocation8 + $0x264] ss:$8 sps:$4 sm:$0xff]  }
 0x896   :  { %5177 = vmatprep.subr.bf16.mxu0 %v7061_v31  ;;  %v4153_v38 = vld [vmem:[#allocation2 + $0x18] sm:$0x1]  ;;  %4048 = vst [vmem:[#allocation2 + $0x20] sm:$0x1] %v4046_v33  ;;  %v4044_v39 = vpop.f32.mrb[39].mxu0 }
 0x897   :  { %5205 = vmatprep.mubr.bf16.mxu0 %v4153_v38  ;;  %4049 = vst [vmem:[#allocation2 + $0x28] sm:$0x1] %v4047_v36  ;;  %v7119_v31 = vld [vmem:[#allocation8 + $0x260] ss:$8 sps:$4 sm:$0xff]   ;;  %v7122_v33 = vld [vmem:[#allocation8 + $0x270] ss:$8 sps:$4 sm:$0xff]  }
 0x898   :  { %v7127_v34 = vld [vmem:[#allocation8 + $0x284] ss:$8 sps:$4 sm:$0xff]   ;;  %v7130_v36 = vld [vmem:[#allocation8 + $0x294] ss:$8 sps:$4 sm:$0xff]   ;;  %v7128_v0 = vld [vmem:[#allocation8 + $0x290] ss:$8 sps:$4 sm:$0xff]  }
 0x899   :  { %5178 = vmatpush1.bf16.msra.mxu0 %v7059_v35  ;;  %v7125_v35 = vld [vmem:[#allocation8 + $0x280] ss:$8 sps:$4 sm:$0xff]   ;;  %v7136_v39 = vld [vmem:[#allocation8 + $0x2b4] ss:$8 sps:$4 sm:$0xff]  }
 0x89a   :  { %5179 = vmatprep.subr.bf16.mxu0 %v7064_v37  ;;  %v7133_v37 = vld [vmem:[#allocation8 + $0x2a4] ss:$8 sps:$4 sm:$0xff]   ;;  %v7131_v38 = vld [vmem:[#allocation8 + $0x2a0] ss:$8 sps:$4 sm:$0xff]  }
 0x89b   :  { %v4089_v42 = vpop.f32.mrb[40].mxu0 }
 0x89c   :  { %v4096_v43 = vpack.c.bf16 %v4089_v42, %v4089_v42  ;;  %v4091_v44 = vpop.f32.mrb[41].mxu0  ;;  %v7137_v42 = vld [vmem:[#allocation8 + $0x2c0] ss:$8 sps:$4 sm:$0xff]  }
 0x89d   :  { %5180 = vmatpush1.bf16.msra.mxu0 %v7062_v40  ;;  %v4097_v47 = vpack.c.bf16 %v4091_v44, %v4091_v44  ;;  %v4093_v48 = vpop.f32.mrb[42].mxu0  ;;  %v7134_v40 = vld [vmem:[#allocation8 + $0x2b0] ss:$8 sps:$4 sm:$0xff]  }
 0x89e   :  { %5181 = vmatprep.subr.bf16.mxu0 %v7067_v41  ;;  %4098 = vst [vmem:[#allocation2 + $0x30] sm:$0x1] %v4096_v43  ;;  %v4094_v50 = vpop.f32.mrb[43].mxu0  ;;  %v4155_v18 = vld [vmem:[#allocation2 + $0x28] sm:$0x1] }
 0x89f   :  { %4099 = vst [vmem:[#allocation2 + $0x38] sm:$0x1] %v4097_v47  ;;  %v7139_v41 = vld [vmem:[#allocation8 + $0x2c4] ss:$8 sps:$4 sm:$0xff]   ;;  %v7142_v43 = vld [vmem:[#allocation8 + $0x2d4] ss:$8 sps:$4 sm:$0xff]  }
 0x8a0   :  { %v7140_v44 = vld [vmem:[#allocation8 + $0x2d0] ss:$8 sps:$4 sm:$0xff]   ;;  %v7143_v47 = vld [vmem:[#allocation8 + $0x2e0] ss:$8 sps:$4 sm:$0xff]   ;;  %v7148_v48 = vld [vmem:[#allocation8 + $0x2f4] ss:$8 sps:$4 sm:$0xff]  }
 0x8a1   :  { %5182 = vmatpush1.bf16.msra.mxu0 %v7065_v46  ;;  %v7145_v46 = vld [vmem:[#allocation8 + $0x2e4] ss:$8 sps:$4 sm:$0xff]  }
 0x8a2   :  { %5183 = vmatprep.subr.bf16.mxu0 %v7070_v49  ;;  %v7146_v49 = vld [vmem:[#allocation8 + $0x2f0] ss:$8 sps:$4 sm:$0xff]   ;;  %v7151_v50 = vld [vmem:[#allocation8 + $0x304] ss:$8 sps:$4 sm:$0xff]  }
 0x8a3   :  { %v4139_v52 = vpop.f32.mrb[44].mxu0 }
 0x8a4   :  { %v4146_v53 = vpack.c.bf16 %v4139_v52, %v4139_v52  ;;  %v4141_v55 = vpop.f32.mrb[45].mxu0  ;;  %v7154_v52 = vld [vmem:[#allocation8 + $0x314] ss:$8 sps:$4 sm:$0xff]  }
 0x8a5   :  { %5184 = vmatpush1.bf16.msra.mxu0 %v7068_v45  ;;  %v4147_v57 = vpack.c.bf16 %v4141_v55, %v4141_v55  ;;  %v4143_v58 = vpop.f32.mrb[46].mxu0  ;;  %v4154_v45 = vld [vmem:[#allocation2 + $0x20] sm:$0x1] }
 0x8a6   :  { %5185 = vmatprep.subr.bf16.mxu0 %v7073_v51  ;;  %4148 = vst [vmem:[#allocation2 + $0x40] sm:$0x1] %v4146_v53  ;;  %v4144_v60 = vpop.f32.mrb[47].mxu0  ;;  %v7149_v51 = vld [vmem:[#allocation8 + $0x300] ss:$8 sps:$4 sm:$0xff]  }
 0x8a7   :  { %4149 = vst [vmem:[#allocation2 + $0x48] sm:$0x1] %v4147_v57  ;;  %v4157_v53 = vld [vmem:[#allocation2 + $0x38] sm:$0x1]  ;;  %v7152_v55 = vld [vmem:[#allocation8 + $0x310] ss:$8 sps:$4 sm:$0xff]  }
 0x8a8   :  { %v7155_v57 = vld [vmem:[#allocation8 + $0x320] ss:$8 sps:$4 sm:$0xff]   ;;  %v7160_v58 = vld [vmem:[#allocation8 + $0x334] ss:$8 sps:$4 sm:$0xff]   ;;  %v7163_v60 = vld [vmem:[#allocation8 + $0x344] ss:$8 sps:$4 sm:$0xff]  }
 0x8a9   :  { %5186 = vmatpush1.bf16.msra.mxu0 %v7071_v56  ;;  %v7157_v56 = vld [vmem:[#allocation8 + $0x324] ss:$8 sps:$4 sm:$0xff]  }
 0x8aa   :  { %5187 = vmatprep.subr.bf16.mxu0 %v7076_v59  ;;  %v7158_v59 = vld [vmem:[#allocation8 + $0x330] ss:$8 sps:$4 sm:$0xff]  }
 0x8ad   :  { %5188 = vmatpush1.bf16.msra.mxu0 %v7074_v61  ;;  %v7161_v61 = vld [vmem:[#allocation8 + $0x340] ss:$8 sps:$4 sm:$0xff]  }
 0x8ae   :  { %5189 = vmatprep.subr.bf16.mxu0 %v7079_v62  ;;  %v7166_v62 = vld [vmem:[#allocation8 + $0x354] ss:$8 sps:$4 sm:$0xff]  }
 0x8b1   :  { %5190 = vmatpush1.bf16.msra.mxu0 %v7077_v63  ;;  %v7164_v63 = vld [vmem:[#allocation8 + $0x350] ss:$8 sps:$4 sm:$0xff]  }
 0x8b2   :  { %5191 = vmatprep.subr.bf16.mxu0 %v7082_v1  ;;  %v7169_v1 = vld [vmem:[#allocation8 + $0x364] ss:$8 sps:$4 sm:$0xff]  }
 0x8b5   :  { %5192 = vmatpush1.bf16.msra.mxu0 %v7080_v2  ;;  %v7167_v2 = vld [vmem:[#allocation8 + $0x360] ss:$8 sps:$4 sm:$0xff]  }
 0x8b6   :  { %5193 = vmatprep.subr.bf16.mxu0 %v7085_v3  ;;  %v7172_v3 = vld [vmem:[#allocation8 + $0x374] ss:$8 sps:$4 sm:$0xff]  }
 0x8b9   :  { %5194 = vmatpush1.bf16.msra.mxu0 %v7083_v54  ;;  %v7170_v54 = vld [vmem:[#allocation8 + $0x370] ss:$8 sps:$4 sm:$0xff]  }
 0x8ba   :  { %5195 = vmatprep.subr.bf16.mxu0 %v7088_v4  ;;  %v7175_v4 = vld [vmem:[#allocation8 + $0x384] ss:$8 sps:$4 sm:$0xff]  }
 0x8bd   :  { %5196 = vmatpush1.bf16.msra.mxu0 %v7086_v5  ;;  %v7173_v5 = vld [vmem:[#allocation8 + $0x380] ss:$8 sps:$4 sm:$0xff]  }
 0x8be   :  { %5197 = vmatprep.subr.bf16.mxu0 %v7091_v6  ;;  %v7178_v6 = vld [vmem:[#allocation8 + $0x394] ss:$8 sps:$4 sm:$0xff]  }
 0x8c1   :  { %5198 = vmatpush1.bf16.msra.mxu0 %v7089_v7  ;;  %v7176_v7 = vld [vmem:[#allocation8 + $0x390] ss:$8 sps:$4 sm:$0xff]  }
 0x8c2   :  { %5199 = vmatprep.subr.bf16.mxu0 %v7094_v8  ;;  %v7181_v8 = vld [vmem:[#allocation8 + $0x3a4] ss:$8 sps:$4 sm:$0xff]  }
 0x8c5   :  { %5200 = vmatpush1.bf16.msra.mxu0 %v7092_v9  ;;  %v7179_v9 = vld [vmem:[#allocation8 + $0x3a0] ss:$8 sps:$4 sm:$0xff]  }
 0x8c6   :  { %5201 = vmatprep.subr.bf16.mxu0 %v7097_v10  ;;  %v7184_v10 = vld [vmem:[#allocation8 + $0x3b4] ss:$8 sps:$4 sm:$0xff]  }
 0x8c9   :  { %5202 = vmatpush1.bf16.msra.mxu0 %v7095_v11  ;;  %v7182_v11 = vld [vmem:[#allocation8 + $0x3b0] ss:$8 sps:$4 sm:$0xff]  }
 0x8ca   :  { %5203 = vmatprep.subr.bf16.mxu0 %v7100_v12  ;;  %v7187_v12 = vld [vmem:[#allocation8 + $0x3c4] ss:$8 sps:$4 sm:$0xff]  }
 0x8cd   :  { %5204 = vmatpush1.bf16.msra.mxu0 %v7098_v13  ;;  %v7185_v13 = vld [vmem:[#allocation8 + $0x3c0] ss:$8 sps:$4 sm:$0xff]  }
 0x8ce   :  { %5214 = vmatprep.subr.bf16.mxu0 %v7103_v14  ;;  %v7190_v14 = vld [vmem:[#allocation8 + $0x3d4] ss:$8 sps:$4 sm:$0xff]  }
 0x8d0   :  { %5206 = vmatmul.mubr.bf16.vlgmr.msra.gmra.mrb[48].mxu0 %v4152_v15  ;;  %v7188_v15 = vld [vmem:[#allocation8 + $0x3d0] ss:$8 sps:$4 sm:$0xff]  }
 0x8d1   :  { %5215 = vmatpush1.bf16.msra.mxu0 %v7101_v16  ;;  %5246 = vmatprep.mubr.bf16.mxu0 %v4155_v18  ;;  %v7193_v16 = vld [vmem:[#allocation8 + $0x3e4] ss:$8 sps:$4 sm:$0xff]   ;;  %v7196_v18 = vld [vmem:[#allocation8 + $0x3f4] ss:$8 sps:$4 sm:$0xff]  }
 0x8d2   :  { %5216 = vmatprep.subr.bf16.mxu0 %v7106_v17  ;;  %v7191_v17 = vld [vmem:[#allocation8 + $0x3e0] ss:$8 sps:$4 sm:$0xff]  }
 0x8d5   :  { %5217 = vmatpush1.bf16.msra.mxu0 %v7104_v19  ;;  %v7194_v19 = vld [vmem:[#allocation8 + $0x3f0] ss:$8 sps:$4 sm:$0xff]  }
 0x8d6   :  { %5218 = vmatprep.subr.bf16.mxu0 %v7109_v20  ;;  %v7199_v20 = vld [vmem:[#allocation8 + $0x404] ss:$8 sps:$4 sm:$0xff]  }
 0x8d9   :  { %5219 = vmatpush1.bf16.msra.mxu0 %v7107_v22  ;;  %v7197_v22 = vld [vmem:[#allocation8 + $0x400] ss:$8 sps:$4 sm:$0xff]  }
 0x8da   :  { %5220 = vmatprep.subr.bf16.mxu0 %v7112_v24  ;;  %v7202_v24 = vld [vmem:[#allocation8 + $0x414] ss:$8 sps:$4 sm:$0xff]  }
 0x8dd   :  { %5221 = vmatpush1.bf16.msra.mxu0 %v7110_v25  ;;  %v4156_v25 = vld [vmem:[#allocation2 + $0x30] sm:$0x1] }
 0x8de   :  { %5222 = vmatprep.subr.bf16.mxu0 %v7115_v26  ;;  %v4159_v26 = vld [vmem:[#allocation2 + $0x48] sm:$0x1] }
 0x8e1   :  { %5223 = vmatpush1.bf16.msra.mxu0 %v7113_v27  ;;  %v7200_v27 = vld [vmem:[#allocation8 + $0x410] ss:$8 sps:$4 sm:$0xff]  }
 0x8e2   :  { %5224 = vmatprep.subr.bf16.mxu0 %v7118_v28  ;;  %v7205_v28 = vld [vmem:[#allocation8 + $0x424] ss:$8 sps:$4 sm:$0xff]  }
 0x8e5   :  { %5225 = vmatpush1.bf16.msra.mxu0 %v7116_v29  ;;  %v7203_v29 = vld [vmem:[#allocation8 + $0x420] ss:$8 sps:$4 sm:$0xff]  }
 0x8e6   :  { %5226 = vmatprep.subr.bf16.mxu0 %v7121_v30  ;;  %v7208_v30 = vld [vmem:[#allocation8 + $0x434] ss:$8 sps:$4 sm:$0xff]  }
 0x8e9   :  { %5227 = vmatpush1.bf16.msra.mxu0 %v7119_v31  ;;  %v7206_v31 = vld [vmem:[#allocation8 + $0x430] ss:$8 sps:$4 sm:$0xff]  }
 0x8ea   :  { %5228 = vmatprep.subr.bf16.mxu0 %v7124_v32  ;;  %v7211_v32 = vld [vmem:[#allocation8 + $0x444] ss:$8 sps:$4 sm:$0xff]  }
 0x8ed   :  { %5229 = vmatpush1.bf16.msra.mxu0 %v7122_v33  ;;  %v7209_v33 = vld [vmem:[#allocation8 + $0x440] ss:$8 sps:$4 sm:$0xff]  }
 0x8ee   :  { %5230 = vmatprep.subr.bf16.mxu0 %v7127_v34  ;;  %v7214_v34 = vld [vmem:[#allocation8 + $0x454] ss:$8 sps:$4 sm:$0xff]  }
 0x8f1   :  { %5231 = vmatpush1.bf16.msra.mxu0 %v7125_v35  ;;  %v7212_v35 = vld [vmem:[#allocation8 + $0x450] ss:$8 sps:$4 sm:$0xff]  }
 0x8f2   :  { %5232 = vmatprep.subr.bf16.mxu0 %v7130_v36  ;;  %v7217_v36 = vld [vmem:[#allocation8 + $0x464] ss:$8 sps:$4 sm:$0xff]  }
 0x8f5   :  { %5233 = vmatpush1.bf16.msra.mxu0 %v7128_v0  ;;  %v7215_v0 = vld [vmem:[#allocation8 + $0x460] ss:$8 sps:$4 sm:$0xff]  }
 0x8f6   :  { %5234 = vmatprep.subr.bf16.mxu0 %v7133_v37  ;;  %v7220_v37 = vld [vmem:[#allocation8 + $0x474] ss:$8 sps:$4 sm:$0xff]  }
 0x8f9   :  { %5235 = vmatpush1.bf16.msra.mxu0 %v7131_v38  ;;  %v7218_v38 = vld [vmem:[#allocation8 + $0x470] ss:$8 sps:$4 sm:$0xff]  }
 0x8fa   :  { %5236 = vmatprep.subr.bf16.mxu0 %v7136_v39  ;;  %v7223_v39 = vld [vmem:[#allocation8 + $0x484] ss:$8 sps:$4 sm:$0xff]  }
 0x8fd   :  { %5237 = vmatpush1.bf16.msra.mxu0 %v7134_v40  ;;  %v7221_v40 = vld [vmem:[#allocation8 + $0x480] ss:$8 sps:$4 sm:$0xff]  }
 0x8fe   :  { %5238 = vmatprep.subr.bf16.mxu0 %v7139_v41  ;;  %v7226_v41 = vld [vmem:[#allocation8 + $0x494] ss:$8 sps:$4 sm:$0xff]  }
 0x901   :  { %5239 = vmatpush1.bf16.msra.mxu0 %v7137_v42  ;;  %v7224_v42 = vld [vmem:[#allocation8 + $0x490] ss:$8 sps:$4 sm:$0xff]  }
 0x902   :  { %5240 = vmatprep.subr.bf16.mxu0 %v7142_v43  ;;  %v7229_v43 = vld [vmem:[#allocation8 + $0x4a4] ss:$8 sps:$4 sm:$0xff]  }
 0x905   :  { %5241 = vmatpush1.bf16.msra.mxu0 %v7140_v44  ;;  %v7227_v44 = vld [vmem:[#allocation8 + $0x4a0] ss:$8 sps:$4 sm:$0xff]  }
 0x906   :  { %5242 = vmatprep.subr.bf16.mxu0 %v7145_v46  ;;  %v7232_v46 = vld [vmem:[#allocation8 + $0x4b4] ss:$8 sps:$4 sm:$0xff]  }
 0x909   :  { %5243 = vmatpush1.bf16.msra.mxu0 %v7143_v47  ;;  %v7230_v47 = vld [vmem:[#allocation8 + $0x4b0] ss:$8 sps:$4 sm:$0xff]  }
 0x90a   :  { %5244 = vmatprep.subr.bf16.mxu0 %v7148_v48  ;;  %v7235_v48 = vld [vmem:[#allocation8 + $0x4c4] ss:$8 sps:$4 sm:$0xff]  }
 0x90d   :  { %5245 = vmatpush1.bf16.msra.mxu0 %v7146_v49  ;;  %v7233_v49 = vld [vmem:[#allocation8 + $0x4c0] ss:$8 sps:$4 sm:$0xff]  }
 0x90e   :  { %5255 = vmatprep.subr.bf16.mxu0 %v7151_v50  ;;  %v7238_v50 = vld [vmem:[#allocation8 + $0x4d4] ss:$8 sps:$4 sm:$0xff]  }
 0x910   :  { %5247 = vmatmul.mubr.bf16.vlgmr.msra.gmra.mrb[48].mxu0 %v4154_v45  ;;  %v7236_v45 = vld [vmem:[#allocation8 + $0x4d0] ss:$8 sps:$4 sm:$0xff]  }
 0x911   :  { %5256 = vmatpush1.bf16.msra.mxu0 %v7149_v51  ;;  %5287 = vmatprep.mubr.bf16.mxu0 %v4157_v53  ;;  %v7241_v51 = vld [vmem:[#allocation8 + $0x4e4] ss:$8 sps:$4 sm:$0xff]   ;;  %v7244_v53 = vld [vmem:[#allocation8 + $0x4f4] ss:$8 sps:$4 sm:$0xff]  }
 0x912   :  { %5257 = vmatprep.subr.bf16.mxu0 %v7154_v52  ;;  %v7239_v52 = vld [vmem:[#allocation8 + $0x4e0] ss:$8 sps:$4 sm:$0xff]  }
 0x915   :  { %5258 = vmatpush1.bf16.msra.mxu0 %v7152_v55  ;;  %v7242_v55 = vld [vmem:[#allocation8 + $0x4f0] ss:$8 sps:$4 sm:$0xff]  }
 0x916   :  { %5259 = vmatprep.subr.bf16.mxu0 %v7157_v56  ;;  %v4158_v56 = vld [vmem:[#allocation2 + $0x40] sm:$0x1] }
 0x919   :  { %5260 = vmatpush1.bf16.msra.mxu0 %v7155_v57  ;;  %v4320_v57 = vld [vmem:[%s7994_s12] sm:$0x3] }
 0x91a   :  { %5261 = vmatprep.subr.bf16.mxu0 %v7160_v58  ;;  %v4325_v58 = vrot.slane %v4320_v57, %v7803_v21  ;;  %v7246_v21 = vld [vmem:[%s7996_s14] sm:$0xff]  }
 0x91d   :  { %5262 = vmatpush1.bf16.msra.mxu0 %v7158_v59  ;;  %v4329_v59 = vrot.slane %v4320_v57, %v7808_v23  ;;  %v7247_v23 = vld [vmem:[%s7996_s14 + $0x48] sm:$0xff]  }
 0x91e   :  { %5263 = vmatprep.subr.bf16.mxu0 %v7163_v60 }
 0x921   :  { %5264 = vmatpush1.bf16.msra.mxu0 %v7161_v61 }
 0x922   :  { %5265 = vmatprep.subr.bf16.mxu0 %v7166_v62 }
 0x925   :  { %5266 = vmatpush1.bf16.msra.mxu0 %v7164_v63 }
 0x926   :  { %5267 = vmatprep.subr.bf16.mxu0 %v7169_v1 }
 0x929   :  { %5268 = vmatpush1.bf16.msra.mxu0 %v7167_v2 }
 0x92a   :  { %5269 = vmatprep.subr.bf16.mxu0 %v7172_v3 }
 0x92d   :  { %5270 = vmatpush1.bf16.msra.mxu0 %v7170_v54  ;;  %v7245_v54 = vld [vmem:[%s7996_s14 + $0x40] sm:$0xff]  }
 0x92e   :  { %5271 = vmatprep.subr.bf16.mxu0 %v7175_v4 }
 0x931   :  { %5272 = vmatpush1.bf16.msra.mxu0 %v7173_v5  ;;  %v5339_v5 = vld [vmem:[%s7995_s13] sm:$0x3] }
 0x932   :  { %5273 = vmatprep.subr.bf16.mxu0 %v7178_v6  ;;  %v7248_v6 = vld [vmem:[%s7996_s14 + $0x8] sm:$0xff]  }
 0x935   :  { %5274 = vmatpush1.bf16.msra.mxu0 %v7176_v7  ;;  %v7249_v7 = vld [vmem:[%s7996_s14 + $0x50] sm:$0xff]  }
 0x936   :  { %5275 = vmatprep.subr.bf16.mxu0 %v7181_v8  ;;  %v7250_v8 = vld [vmem:[%s7996_s14 + $0x10] sm:$0xff]  }
 0x939   :  { %5276 = vmatpush1.bf16.msra.mxu0 %v7179_v9  ;;  %v7251_v9 = vld [vmem:[%s7996_s14 + $0x58] sm:$0xff]  }
 0x93a   :  { %5277 = vmatprep.subr.bf16.mxu0 %v7184_v10  ;;  %v7252_v10 = vld [vmem:[%s7996_s14 + $0x18] sm:$0xff]  }
 0x93d   :  { %5278 = vmatpush1.bf16.msra.mxu0 %v7182_v11  ;;  %v7253_v11 = vld [vmem:[%s7996_s14 + $0x60] sm:$0xff]  }
 0x93e   :  { %5279 = vmatprep.subr.bf16.mxu0 %v7187_v12  ;;  %v7254_v12 = vld [vmem:[%s7996_s14 + $0x20] sm:$0xff]  }
 0x941   :  { %5280 = vmatpush1.bf16.msra.mxu0 %v7185_v13  ;;  %v7255_v13 = vld [vmem:[%s7996_s14 + $0x68] sm:$0xff]  }
 0x942   :  { %5281 = vmatprep.subr.bf16.mxu0 %v7190_v14  ;;  %v7256_v14 = vld [vmem:[%s7996_s14 + $0x28] sm:$0xff]  }
 0x945   :  { %5282 = vmatpush1.bf16.msra.mxu0 %v7188_v15  ;;  %v7257_v15 = vld [vmem:[%s7996_s14 + $0x70] sm:$0xff]  }
 0x946   :  { %5283 = vmatprep.subr.bf16.mxu0 %v7193_v16  ;;  %v7258_v16 = vld [vmem:[%s7996_s14 + $0x30] sm:$0xff]  }
 0x949   :  { %5284 = vmatpush1.bf16.msra.mxu0 %v7191_v17  ;;  %v7259_v17 = vld [vmem:[%s7996_s14 + $0x78] sm:$0xff]  }
 0x94a   :  { %5285 = vmatprep.subr.bf16.mxu0 %v7196_v18  ;;  %v7260_v18 = vld [vmem:[%s7996_s14 + $0x38] sm:$0xff]   ;;  %s7327_s14 = scalar_lea.vmem %s5606_s17, 32 }
 0x94b   :  { %p7328_p10 = scmp.ne.s32.totalorder %s5606_s17, %s7327_s14  ;;  %p7333_p12 = scmp.lt.s32.totalorder %s7327_s14, %s7327_s14 }
 0x94d   :  { %5286 = vmatpush1.bf16.msra.mxu0 %v7194_v19  ;;  %p7334_p13 = por %p7333_p12, %p7332_p11 }
 0x94e   :  { %5296 = vmatprep.subr.bf16.mxu0 %v7199_v20 }
 0x94f   :  { %p7335_p0 = pnand %p7334_p13, %p7328_p10 }
 0x950   :  { %5288 = vmatmul.mubr.bf16.vlgmr.msra.gmra.mrb[48].mxu0 %v4156_v25 }
 0x951   :  { %5297 = vmatpush1.bf16.msra.mxu0 %v7197_v22  ;;  %5328 = vmatprep.mubr.bf16.mxu0 %v4159_v26  ;;  %v6233_v26 = vld [vmem:[%s7997_s15] ss:$0 sm:$0xff] }
 0x952   :  { %5298 = vmatprep.subr.bf16.mxu0 %v7202_v24 }
 0x955   :  { %5299 = vmatpush1.bf16.msra.mxu0 %v7200_v27 }
 0x956   :  { %5300 = vmatprep.subr.bf16.mxu0 %v7205_v28 }
 0x959   :  { %5301 = vmatpush1.bf16.msra.mxu0 %v7203_v29 }
 0x95a   :  { %5302 = vmatprep.subr.bf16.mxu0 %v7208_v30 }
 0x95d   :  { %5303 = vmatpush1.bf16.msra.mxu0 %v7206_v31 }
 0x95e   :  { %5304 = vmatprep.subr.bf16.mxu0 %v7211_v32 }
 0x961   :  { %5305 = vmatpush1.bf16.msra.mxu0 %v7209_v33 }
 0x962   :  { %5306 = vmatprep.subr.bf16.mxu0 %v7214_v34 }
 0x965   :  { %5307 = vmatpush1.bf16.msra.mxu0 %v7212_v35 }
 0x966   :  { %5308 = vmatprep.subr.bf16.mxu0 %v7217_v36 }
 0x969   :  { %5309 = vmatpush1.bf16.msra.mxu0 %v7215_v0 }
 0x96a   :  { %5310 = vmatprep.subr.bf16.mxu0 %v7220_v37 }
 0x96d   :  { %5311 = vmatpush1.bf16.msra.mxu0 %v7218_v38 }
 0x96e   :  { %5312 = vmatprep.subr.bf16.mxu0 %v7223_v39 }
 0x971   :  { %5313 = vmatpush1.bf16.msra.mxu0 %v7221_v40 }
 0x972   :  { %5314 = vmatprep.subr.bf16.mxu0 %v7226_v41 }
 0x975   :  { %5315 = vmatpush1.bf16.msra.mxu0 %v7224_v42 }
 0x976   :  { %5316 = vmatprep.subr.bf16.mxu0 %v7229_v43 }
 0x979   :  { %5317 = vmatpush1.bf16.msra.mxu0 %v7227_v44 }
 0x97a   :  { %5318 = vmatprep.subr.bf16.mxu0 %v7232_v46 }
 0x97d   :  { %5319 = vmatpush1.bf16.msra.mxu0 %v7230_v47 }
 0x97e   :  { %5320 = vmatprep.subr.bf16.mxu0 %v7235_v48 }
 0x981   :  { %5321 = vmatpush1.bf16.msra.mxu0 %v7233_v49 }
 0x982   :  { %5322 = vmatprep.subr.bf16.mxu0 %v7238_v50 }
 0x985   :  { %5323 = vmatpush1.bf16.msra.mxu0 %v7236_v45 }
 0x986   :  { %5324 = vmatprep.subr.bf16.mxu0 %v7241_v51 }
 0x989   :  { %5325 = vmatpush1.bf16.msra.mxu0 %v7239_v52 }
 0x98a   :  { %5326 = vmatprep.subr.bf16.mxu0 %v7244_v53 }
 0x98d   :  { %5327 = vmatpush1.bf16.msra.mxu0 %v7242_v55 }
 0x990   :  { %5329 = vmatmul.mubr.bf16.vlgmr.msra.gmra.mrb[48].mxu0 %v4158_v56 }
 0xa63   :  { %v5330_v60 = vpop.f32.mrb[48].mxu0 }
 0xa64   :  { %v6337_v61 = vadd.f32 %v5330_v60, %v4325_v58  ;;  %v5332_v62 = vpop.f32.mrb[49].mxu0 }
 0xa65   :  { %v6338_v63 = vadd.f32 %v5332_v62, %v4329_v59  ;;  %v5334_v1 = vpop.f32.mrb[50].mxu0 }
 0xa66   :  { %v5335_v2 = vpop.f32.mrb[51].mxu0  ;;  %v5337_v4 = vmax.f32 %v6337_v61, 0.0 }
 0xa67   :  { %v5338_v3 = vmax.f32 %v6338_v63, 0.0 }
 0xa69   :  { %6230 = vmatprep.subr.msk.mxu1 %vm3898_vm5, %v5338_v3 }
 0xa6a   :  { %6231 = vmatpush1.msk.msra.mxu1 %vm3898_vm5, %v5337_v4 }
 0xa6b   :  { %6232 = vmatmul.mubr.msk.f32.vlgmr.msra.gmra.mrb[48].mxu1 %vm5340_vm7, %v5339_v5  ;;  %6265 = vmatprep.subr.bf16.mxu1 %v7245_v54 }
 0xa6c   :  { %6266 = vmatpush3.bf16.msra.mxu1 %v7246_v21 }
 0xa6d   :  { %6267 = vmatprep.subr.bf16.mxu1 %v7247_v23 }
 0xa70   :  { %6268 = vmatpush3.bf16.msra.mxu1 %v7248_v6 }
 0xa71   :  { %6269 = vmatprep.subr.bf16.mxu1 %v7249_v7 }
 0xa74   :  { %6270 = vmatpush3.bf16.msra.mxu1 %v7250_v8 }
 0xa75   :  { %6271 = vmatprep.subr.bf16.mxu1 %v7251_v9 }
 0xa78   :  { %6272 = vmatpush3.bf16.msra.mxu1 %v7252_v10 }
 0xa79   :  { %6273 = vmatprep.subr.bf16.mxu1 %v7253_v11 }
 0xa7c   :  { %6274 = vmatpush3.bf16.msra.mxu1 %v7254_v12 }
 0xa7d   :  { %6275 = vmatprep.subr.bf16.mxu1 %v7255_v13 }
 0xa80   :  { %6276 = vmatpush3.bf16.msra.mxu1 %v7256_v14 }
 0xa81   :  { %6277 = vmatprep.subr.bf16.mxu1 %v7257_v15 }
 0xa84   :  { %6278 = vmatpush3.bf16.msra.mxu1 %v7258_v16 }
 0xa85   :  { %6279 = vmatprep.subr.bf16.mxu1 %v7259_v17 }
 0xa88   :  { %6280 = vmatpush3.bf16.msra.mxu1 %v7260_v18 }
 0xb3e   :  { %v5416_v19 = vpop.f32.mrb[48].mxu1 }
 0xb3f   :  { %v5418_v20 = vpop.f32.mrb[49].mxu1  ;;  %v5421_v24 = vpack.c.bf16 %v5416_v19, %v5416_v19 }
 0xb40   :  { %v5422_v22 = vpack.c.bf16 %v5418_v20, %v5418_v20 }
 0xb42   :  { %5590 = vmatprep.mubr.bf16.mxu1 %v5422_v22 }
 0xb43   :  { %5591 = vmatmul.mubr.bf16.vlgmr.msra.gmra.mrb[52].mxu1 %v5421_v24 }
 0xc16   :  { %v6281_v25 = vpop.f32.mrb[52].mxu1 }
 0xc17   :  { %v6282_v27 = vpop.f32.mrb[53].mxu1 }
 0xc18   :  { %v6283_v28 = vadd.f32 %v6282_v27, %v6281_v25  ;;  %v6284_v29 = vpop.f32.mrb[54].mxu1 }
 0xc19   :  { %v6285_v30 = vpop.f32.mrb[55].mxu1 }
 0xc1a   :  { %v5593_v31 = vadd.f32 %v6283_v28, %v6233_v26 }
 0xc1c   :  { %5598 = vst [vmem:[#allocation9] sm:$0x3] %v5593_v31 }
 0xc1d   :  { %7338 = shalt.err (!%p7335_p0)
}
 0xc1e   :  { %s7339_s15 = scalar_lea.hbm %s7998_s16, 32 }
 0xc1f   :  { %p7340_p1 = scmp.ne.s32.totalorder %s7998_s16, %s7339_s15  ;;  %p7343_p2 = scmp.lt.u32.totalorder %s7339_s15, %s7998_s16 }
 0xc21   :  { %p7345_p3 = pnand %p7343_p2, %p7340_p1 }
 0xc23   :  { %7348 = shalt.err (!%p7345_p3)
}
 0xc24   :  { %5608 = dma.vmem_to_hbm [thread:$0]  %s5606_s17, 32, %s7998_s16, [#allocation5]  }
 0xc25   :  { %7353 = dma.done.wait [#allocation5], 32  }
 0xc26   :  { %7354 = vsyncadd [#allocation5], 4294967264 }
 0xc27   :  { %5612 = vsyncpa [#allocation4], 1 }
 0xc28   :  { %5613 = vsyncpa [#allocation7], 1 }
 0xc29   :  { %5614 = vsyncpa [#allocation5], 1 }

</bundles_post_ra>
